<compile_context>
chip_gen: v7x
topology: tpu7x:2x2x1
jax: 0.10.0
libtpu: 0.0.40
codegen_flags: <defaults>
</compile_context>

<pallas_src>
import functools

import jax
import jax.numpy as jnp
from jax.experimental import pallas as pl
from jax.experimental.pallas import tpu as pltpu

NUM_EMBEDDINGS = 1024
EMBEDDING_DIM = 32
COMMITMENT_COST = 0.25

_DEFAULT_TILE_N = 1024


def _round_up(x, m):
    return (x + m - 1) // m * m


def _vq_kernel(n_total, x_ref, etm2_ref, esq_ref, emb_ref,
               q_ref, sse_ref, cnt_ref):
    """One (TN, D) tile of the VQ forward.

    x_ref:    (TN, D)   input rows of this tile
    etm2_ref: (D, K)    codebook, transposed and pre-scaled by -2 (resident)
    esq_ref:  (1, K)    precomputed ||e_k||^2 (resident)
    emb_ref:  (K, D)    unscaled codebook for the gather matmul (resident)
    q_ref:    (TN, D)   quantized rows (straight-through forward value)
    sse_ref:  (1, 1, 1) per-tile sum of squared error
    cnt_ref:  (1, 8, K) per-tile per-code counts (8 identical rows; row 0 used)
    """
    tile = pl.program_id(0)
    tn, d = x_ref.shape
    k = emb_ref.shape[0]
    ragged = (n_total % tn) != 0  # trace-time constant
    hi = jax.lax.Precision.HIGHEST

    x = x_ref[...].astype(jnp.float32)                       # (TN, D)

    if ragged:
        # Rows past n_total in the last tile hold unspecified data; zero them
        # (cheap: only D=32 lanes wide) so they contribute nothing to the SSE.
        row = jax.lax.broadcasted_iota(jnp.int32, (tn, 1), 0) + tile * tn
        valid = row < n_total                                 # (TN, 1)
        x = jnp.where(valid, x, 0.0)

    # argmin_k(||x||^2 + ||e_k||^2 - 2 x.e_k) == argmin_k(||e_k||^2 - 2 x.e_k)
    # -2 is folded into the codebook, so the distance is one MXU pass + 1 add.
    xe = jnp.dot(x, etm2_ref[...], preferred_element_type=jnp.float32,
                 precision=hi)                                # (TN, K) = -2 x.e
    dist = xe + esq_ref[...]                                  # (TN, K)

    # First-index argmin (matches torch.argmin tie-breaking).
    lane = jax.lax.broadcasted_iota(jnp.int32, (tn, k), 1)
    min_d = jnp.min(dist, axis=1, keepdims=True)              # (TN, 1)
    idx = jnp.min(jnp.where(dist == min_d, lane, k),
                  axis=1, keepdims=True)                       # (TN, 1)
    if ragged:
        # Mask the narrow (TN, 1) index instead of the (TN, K) one-hot:
        # lane == k never matches, so padded rows select nothing.
        idx = jnp.where(valid, idx, k)

    enc = (lane == idx).astype(jnp.float32)                    # (TN, K)

    # quantized = enc @ E  (MXU, contracting over K; unscaled codebook)
    quantized = jax.lax.dot_general(
        enc, emb_ref[...], dimension_numbers=(((1,), (0,)), ((), ())),
        preferred_element_type=jnp.float32, precision=hi)      # (TN, D)
    q_ref[...] = quantized.astype(q_ref.dtype)

    # Partial SSE.  Padded rows have x == 0 and quantized == 0 -> contribute 0.
    diff = quantized - x                                       # (TN, D)
    sse = jnp.sum(jnp.sum(diff * diff, axis=0, keepdims=True),
                  axis=1, keepdims=True)                       # (1, 1)
    sse_ref[...] = sse.reshape(1, 1, 1)

    # Per-code counts on the (idle) MXU instead of a VPU/XLU column reduce.
    ones8 = jnp.ones((8, tn), dtype=jnp.float32)
    cnt8 = jax.lax.dot_general(
        ones8, enc, dimension_numbers=(((1,), (0,)), ((), ())),
        preferred_element_type=jnp.float32)                    # (8, K)
    cnt_ref[...] = cnt8.reshape(1, 8, k)


def vector_quantizer(inputs, embedding, *, commitment_cost=COMMITMENT_COST,
                     tile_n=None):
    """inputs: (..., D) float array; embedding: (K, D) codebook."""
    k, d = embedding.shape
    flat = inputs.reshape(-1, d)
    n = flat.shape[0]

    if tile_n is None:
        tile_n = _DEFAULT_TILE_N
    # Keep the grid >= 2 steps whenever possible so the "parallel" axis gives
    # both v7x TensorCores work; never below 8 rows (sublane granularity).
    tn = min(tile_n, max(8, _round_up(pl.cdiv(n, 2), 8)))
    num_tiles = pl.cdiv(n, tn)

    # Layout / arithmetic plumbing done once, outside the kernel.
    emb = embedding.astype(jnp.float32)                 # (K, D)
    etm2 = (-2.0 * emb).T                               # (D, K), exact scale
    esq = jnp.sum(emb * emb, axis=1, keepdims=True).T   # (1, K)

    bytes_accessed = (n * d * flat.dtype.itemsize * 2          # read x, write q
                      + (2 * d * k + k) * 4                    # resident inputs
                      + num_tiles * (8 * k + 1) * 4)           # partial outputs
    cost = pl.CostEstimate(flops=2 * n * k * d * 2 + 2 * 8 * n * k,
                           transcendentals=0,
                           bytes_accessed=bytes_accessed)

    q_flat, sse_part, cnt_part = pl.pallas_call(
        functools.partial(_vq_kernel, n),
        grid=(num_tiles,),
        in_specs=[
            pl.BlockSpec((tn, d), lambda i: (i, 0)),      # x tile
            pl.BlockSpec((d, k), lambda i: (0, 0)),       # -2 E^T, resident
            pl.BlockSpec((1, k), lambda i: (0, 0)),       # ||e||^2, resident
            pl.BlockSpec((k, d), lambda i: (0, 0)),       # E, resident
        ],
        out_specs=(
            pl.BlockSpec((tn, d), lambda i: (i, 0)),      # quantized tile
            pl.BlockSpec((1, 1, 1), lambda i: (i, 0, 0)), # per-tile SSE
            pl.BlockSpec((1, 8, k), lambda i: (i, 0, 0)), # per-tile counts
        ),
        out_shape=(
            jax.ShapeDtypeStruct((n, d), inputs.dtype),
            jax.ShapeDtypeStruct((num_tiles, 1, 1), jnp.float32),
            jax.ShapeDtypeStruct((num_tiles, 8, k), jnp.float32),
        ),
        compiler_params=pltpu.CompilerParams(
            dimension_semantics=("parallel",),            # megacore on v7x
            vmem_limit_bytes=48 * 1024 * 1024),
        cost_estimate=cost,
    )(flat, etm2, esq, emb)

    quantized = q_flat.reshape(inputs.shape)

    # Tiny final reductions in the wrapper (normalize by the TOTAL N).
    mse = jnp.sum(sse_part) / float(n * d)
    loss = (1.0 + commitment_cost) * mse            # q_latent + cc * e_latent
    avg_probs = jnp.sum(cnt_part[:, 0, :], axis=0) / float(n)   # (K,)
    perplexity = jnp.exp(-jnp.sum(avg_probs * jnp.log(avg_probs + 1e-10)))
    return quantized, loss, perplexity


def _reference(inputs, embedding, commitment_cost=COMMITMENT_COST):
    """Pure-JAX reference mirroring the PyTorch forward (f32 throughout)."""
    d = embedding.shape[1]
    flat = inputs.reshape(-1, d).astype(jnp.float32)
    emb = embedding.astype(jnp.float32)
    hi = jax.lax.Precision.HIGHEST
    dist = (jnp.sum(flat ** 2, axis=1, keepdims=True)
            + jnp.sum(emb ** 2, axis=1)
            - 2.0 * jnp.dot(flat, emb.T, precision=hi))
    idx = jnp.argmin(dist, axis=1)
    enc = jax.nn.one_hot(idx, emb.shape[0], dtype=jnp.float32)
    quantized = jnp.dot(enc, emb, precision=hi).reshape(inputs.shape)
    mse = jnp.mean((quantized - inputs) ** 2)
    loss = (1.0 + commitment_cost) * mse
    avg_probs = jnp.mean(enc, axis=0)
    perplexity = jnp.exp(-jnp.sum(avg_probs * jnp.log(avg_probs + 1e-10)))
    return quantized, loss, perplexity


if __name__ == "__main__":
    key = jax.random.PRNGKey(0)
    k_emb, k_in, k_emb2, k_in2 = jax.random.split(key, 4)

    # --- case 1: module-faithful init, small input (2 grid steps, no ragged) -
    embedding = jax.random.uniform(
        k_emb, (NUM_EMBEDDINGS, EMBEDDING_DIM), dtype=jnp.float32,
        minval=-1.0 / NUM_EMBEDDINGS, maxval=1.0 / NUM_EMBEDDINGS)
    inputs = jax.random.normal(k_in, (2, 8, EMBEDDING_DIM), dtype=jnp.float32)

    q, loss, perp = vector_quantizer(inputs, embedding)
    jax.block_until_ready((q, loss, perp))
    q_r, loss_r, perp_r = _reference(inputs, embedding)
    assert jnp.allclose(q, q_r, atol=1e-5), "quantized mismatch (case 1)"
    assert jnp.allclose(loss, loss_r, atol=1e-5), "loss mismatch (case 1)"
    assert jnp.allclose(perp, perp_r, atol=1e-3), "perplexity mismatch (case 1)"

    # --- case 2: multi-tile grid + ragged last tile (masking path) ----------
    embedding2 = jax.random.normal(
        k_emb2, (NUM_EMBEDDINGS, EMBEDDING_DIM), dtype=jnp.float32)
    inputs2 = jax.random.normal(k_in2, (4, 100, EMBEDDING_DIM),
                                dtype=jnp.float32)

    q2, loss2, perp2 = vector_quantizer(inputs2, embedding2, tile_n=128)
    jax.block_until_ready((q2, loss2, perp2))
    q2_r, loss2_r, perp2_r = _reference(inputs2, embedding2)
    assert jnp.allclose(q2, q2_r, atol=1e-5), "quantized mismatch (case 2)"
    assert jnp.allclose(loss2, loss2_r, rtol=1e-5, atol=1e-5), \
        "loss mismatch (case 2)"
    assert jnp.allclose(perp2, perp2_r, rtol=1e-4, atol=1e-3), \
        "perplexity mismatch (case 2)"

    print("KERNEL_OK")
</pallas_src>

<mosaic_0001>
module attributes {stable_mosaic.version = 11 : i64} {
  func.func @_vq_kernel(%arg0: i32, %arg1: memref<8x32xf32, #tpu.memory_space<vmem>>, %arg2: memref<32x1024xf32, #tpu.memory_space<vmem>>, %arg3: memref<1x1024xf32, #tpu.memory_space<vmem>>, %arg4: memref<1024x32xf32, #tpu.memory_space<vmem>>, %arg5: memref<8x32xf32, #tpu.memory_space<vmem>>, %arg6: memref<1x1x1xf32, #tpu.memory_space<vmem>>, %arg7: memref<1x8x1024xf32, #tpu.memory_space<vmem>>) attributes {dimension_semantics = [#tpu.dimension_semantics<parallel>], iteration_bounds = array<i64: 2>, scalar_prefetch = 0 : i64, scratch_operands = 0 : i64, tpu.core_type = #tpu.core_type<tc>, window_params = [{transform_indices = @transform_0, window_bounds = array<i64: 8, 32>}, {pipeline_mode = #tpu.pipeline_mode<synchronous>, transform_indices = @transform_1, window_bounds = array<i64: 32, 1024>}, {pipeline_mode = #tpu.pipeline_mode<synchronous>, transform_indices = @transform_2, window_bounds = array<i64: 1, 1024>}, {pipeline_mode = #tpu.pipeline_mode<synchronous>, transform_indices = @transform_3, window_bounds = array<i64: 1024, 32>}, {transform_indices = @transform_4, window_bounds = array<i64: 8, 32>}, {transform_indices = @transform_5, window_bounds = array<i64: 1, 1, 1>}, {transform_indices = @transform_6, window_bounds = array<i64: 1, 8, 1024>}]} {
    %c0 = arith.constant 0 : index
    %c0_0 = arith.constant 0 : index
    %0 = vector.load %arg1[%c0, %c0_0] : memref<8x32xf32, #tpu.memory_space<vmem>>, vector<8x32xf32>
    %c0_1 = arith.constant 0 : index
    %c0_2 = arith.constant 0 : index
    %1 = vector.load %arg2[%c0_1, %c0_2] : memref<32x1024xf32, #tpu.memory_space<vmem>>, vector<32x1024xf32>
    %cst = arith.constant dense<0.000000e+00> : vector<8x1024xf32>
    %2 = tpu.matmul %0, %1, %cst {dimension_numbers = #tpu.dot_dimension_numbers<[1], [0], [0], [1], [0, 0, 1, 1], [], []>, precision = #tpu.contract_precision<fp32>} : vector<8x32xf32>, vector<32x1024xf32>, vector<8x1024xf32> -> vector<8x1024xf32>
    %c0_3 = arith.constant 0 : index
    %c0_4 = arith.constant 0 : index
    %3 = vector.load %arg3[%c0_3, %c0_4] : memref<1x1024xf32, #tpu.memory_space<vmem>>, vector<1x1024xf32>
    %4 = vector.broadcast %3 : vector<1x1024xf32> to vector<8x1024xf32>
    %5 = arith.addf %2, %4 : vector<8x1024xf32>
    %6 = tpu.iota {dimensions = array<i32: 1>} : vector<8x1024xi32>
    %cst_5 = arith.constant dense<0x7F800000> : vector<8xf32>
    %7 = vector.multi_reduction <minimumf>, %5, %cst_5 [1] : vector<8x1024xf32> to vector<8xf32>
    %8 = vector.shape_cast %7 : vector<8xf32> to vector<8x1xf32>
    %9 = vector.broadcast %8 : vector<8x1xf32> to vector<8x1024xf32>
    %10 = arith.cmpf oeq, %5, %9 : vector<8x1024xf32>
    %c1024_i32 = arith.constant 1024 : i32
    %11 = vector.broadcast %c1024_i32 : i32 to vector<8x1024xi32>
    %12 = arith.select %10, %6, %11 : vector<8x1024xi1>, vector<8x1024xi32>
    %cst_6 = arith.constant dense<2147483647> : vector<8xi32>
    %13 = vector.multi_reduction <minsi>, %12, %cst_6 [1] : vector<8x1024xi32> to vector<8xi32>
    %14 = vector.shape_cast %13 : vector<8xi32> to vector<8x1xi32>
    %15 = vector.broadcast %14 : vector<8x1xi32> to vector<8x1024xi32>
    %16 = arith.cmpi eq, %6, %15 : vector<8x1024xi32>
    %17 = arith.extui %16 : vector<8x1024xi1> to vector<8x1024xi32>
    %18 = arith.sitofp %17 : vector<8x1024xi32> to vector<8x1024xf32>
    %c0_7 = arith.constant 0 : index
    %c0_8 = arith.constant 0 : index
    %19 = vector.load %arg4[%c0_7, %c0_8] : memref<1024x32xf32, #tpu.memory_space<vmem>>, vector<1024x32xf32>
    %cst_9 = arith.constant dense<0.000000e+00> : vector<8x32xf32>
    %20 = tpu.matmul %18, %19, %cst_9 {dimension_numbers = #tpu.dot_dimension_numbers<[1], [0], [0], [1], [0, 0, 1, 1], [], []>, precision = #tpu.contract_precision<fp32>} : vector<8x1024xf32>, vector<1024x32xf32>, vector<8x32xf32> -> vector<8x32xf32>
    %c0_10 = arith.constant 0 : index
    %c0_11 = arith.constant 0 : index
    %21 = vector.load %arg5[%c0_10, %c0_11] : memref<8x32xf32, #tpu.memory_space<vmem>>, vector<8x32xf32>
    tpu.vector_store %arg5[%c0_10, %c0_11], %20 {strides = array<i32>} : memref<8x32xf32, #tpu.memory_space<vmem>>, vector<8x32xf32>,
    %22 = arith.subf %20, %0 : vector<8x32xf32>
    %23 = arith.mulf %22, %22 : vector<8x32xf32>
    %cst_12 = arith.constant dense<0.000000e+00> : vector<32xf32>
    %24 = vector.multi_reduction <add>, %23, %cst_12 [0] : vector<8x32xf32> to vector<32xf32>
    %25 = vector.shape_cast %24 : vector<32xf32> to vector<1x32xf32>
    %cst_13 = arith.constant dense<0.000000e+00> : vector<1xf32>
    %26 = vector.multi_reduction <add>, %25, %cst_13 [1] : vector<1x32xf32> to vector<1xf32>
    %27 = vector.shape_cast %26 : vector<1xf32> to vector<1x1xf32>
    %28 = vector.shape_cast %27 : vector<1x1xf32> to vector<1x1x1xf32>
    %c0_14 = arith.constant 0 : index
    %c0_15 = arith.constant 0 : index
    %c0_16 = arith.constant 0 : index
    %29 = vector.load %arg6[%c0_14, %c0_15, %c0_16] : memref<1x1x1xf32, #tpu.memory_space<vmem>>, vector<1x1x1xf32>
    tpu.vector_store %arg6[%c0_14, %c0_15, %c0_16], %28 {strides = array<i32>} : memref<1x1x1xf32, #tpu.memory_space<vmem>>, vector<1x1x1xf32>,
    %cst_17 = arith.constant 1.000000e+00 : f32
    %30 = vector.broadcast %cst_17 : f32 to vector<8x8xf32>
    %cst_18 = arith.constant dense<0.000000e+00> : vector<8x1024xf32>
    %31 = tpu.matmul %30, %18, %cst_18 {dimension_numbers = #tpu.dot_dimension_numbers<[1], [0], [0], [1], [0, 0, 1, 1], [], []>} : vector<8x8xf32>, vector<8x1024xf32>, vector<8x1024xf32> -> vector<8x1024xf32>
    %32 = vector.shape_cast %31 : vector<8x1024xf32> to vector<1x8x1024xf32>
    %c0_19 = arith.constant 0 : index
    %c0_20 = arith.constant 0 : index
    %c0_21 = arith.constant 0 : index
    %33 = vector.load %arg7[%c0_19, %c0_20, %c0_21] : memref<1x8x1024xf32, #tpu.memory_space<vmem>>, vector<1x8x1024xf32>
    tpu.vector_store %arg7[%c0_19, %c0_20, %c0_21], %32 {strides = array<i32>} : memref<1x8x1024xf32, #tpu.memory_space<vmem>>, vector<1x8x1024xf32>,
    return
  }
  func.func @transform_0(%arg0: i32) -> (i32, i32) {
    %c0_i32 = arith.constant 0 : i32
    %c0_i32_0 = arith.constant 0 : i32
    return %arg0, %c0_i32 : i32, i32
  }
  func.func @transform_1(%arg0: i32) -> (i32, i32) {
    %c0_i32 = arith.constant 0 : i32
    %c0_i32_0 = arith.constant 0 : i32
    %c0_i32_1 = arith.constant 0 : i32
    return %c0_i32, %c0_i32_0 : i32, i32
  }
  func.func @transform_2(%arg0: i32) -> (i32, i32) {
    %c0_i32 = arith.constant 0 : i32
    %c0_i32_0 = arith.constant 0 : i32
    %c0_i32_1 = arith.constant 0 : i32
    return %c0_i32, %c0_i32_0 : i32, i32
  }
  func.func @transform_3(%arg0: i32) -> (i32, i32) {
    %c0_i32 = arith.constant 0 : i32
    %c0_i32_0 = arith.constant 0 : i32
    %c0_i32_1 = arith.constant 0 : i32
    return %c0_i32, %c0_i32_0 : i32, i32
  }
  func.func @transform_4(%arg0: i32) -> (i32, i32) {
    %c0_i32 = arith.constant 0 : i32
    %c0_i32_0 = arith.constant 0 : i32
    return %arg0, %c0_i32 : i32, i32
  }
  func.func @transform_5(%arg0: i32) -> (i32, i32, i32) {
    %c0_i32 = arith.constant 0 : i32
    %c0_i32_0 = arith.constant 0 : i32
    %c0_i32_1 = arith.constant 0 : i32
    return %arg0, %c0_i32, %c0_i32_0 : i32, i32, i32
  }
  func.func @transform_6(%arg0: i32) -> (i32, i32, i32) {
    %c0_i32 = arith.constant 0 : i32
    %c0_i32_0 = arith.constant 0 : i32
    %c0_i32_1 = arith.constant 0 : i32
    return %arg0, %c0_i32, %c0_i32_0 : i32, i32, i32
  }
}

</mosaic_0001>

<bundles_post_ra>
// kernel: tpu_custom_call.1
= control target key start
LH: loop header
LB: loop body
LE: loop exit
PB: predicated region body
PF: predicated region fallthrough
CT: control target
= control target key end

     0   :  { %s12669_s0 = inlined_call_operand.vmem [shape: f32[16,32], index: 0, kind: input, shape index: {}]   ;;  %s12670_s1 = inlined_call_operand.vmem [shape: f32[32,1024], index: 1, kind: input, shape index: {}]   ;;  %s12671_s2 = inlined_call_operand.vmem [shape: f32[1,1024], index: 2, kind: input, shape index: {}]   ;;  %s12672_s3 = inlined_call_operand.vmem [shape: f32[1024,32], index: 3, kind: input, shape index: {}]   ;;  %s12673_s4 = inlined_call_operand.hbm [shape: f32[16,32], index: 4, kind: output, shape index: {0}]   ;;  %s12674_s5 = inlined_call_operand.vmem [shape: f32[2,1,1], index: 5, kind: output, shape index: {1}]   ;;  %s12675_s6 = inlined_call_operand.hbm [shape: f32[2,8,1024], index: 6, kind: output, shape index: {2}]  }
   0x1   :  { %13002 = sst [smem:[#allocation54_spill]] %s12669_s0 }
   0x2   :  { %12 = vsyncpa [#allocation3], 0 }
   0x3   :  { %14 = vsyncpa [#allocation3 + $0x1], 0 }
   0x4   :  { %15 = vsyncpa [#allocation5], 0 }
   0x5   :  { %17 = vsyncpa [#allocation5 + $0x1], 0  ;;  %s8728_s21 = smov 0   ;;  %s8730_s22 = smov 0  }
   0x6   :  { %s8732_s23 = smov 0   ;;  %s8734_s24 = smov 0  }
   0x7 LB: > { %s8749_s25 = sadd.s32 4294967295, %s8687_s24   ;;  %s6639_s26 = sadd.s32 4294967294, %s8687_s24   ;;  %s8687_s24 = sphi %s8734_s24, %s13727_s24   ;;  %s8683_s23 = sphi %s8732_s23, %s13726_s23   ;;  %s8679_s22 = sphi %s8730_s22, %s13725_s22   ;;  %s8675_s21 = sphi %s8728_s21, %s13724_s21  }
   0x8   : > { %s8753_s27 = sadd.s32 1, %s8687_s24   ;;  %s119_s28 = sadd.s32 1, %s8683_s23 }
   0x9   : > { %s116_s29 = ssub.s32 %s8687_s24, %s8753_s27  ;;  %p129_p0 = scmp.ne.s32.totalorder %s8683_s23, %s8679_s22 }
   0xa   : > { %p117_p1 = scmp.eq.s32.totalorder %s116_s29, 0  ;;  %p130_p2 = scmp.eq.s32.totalorder %s8749_s25, 1 }
   0xb   : > { %p135_p3 = scmp.ne.s32.totalorder %s8679_s22, %s8675_s21  ;;  %p136_p4 = scmp.eq.s32.totalorder %s6639_s26, 1 }
   0xc   : > { %s8764_s30 = scalar_select %p117_p1, %s8683_s23, %s119_s28  }
   0xd   : > { %p8766_p5 = por %p130_p2, %p129_p0  ;;  %p8770_p6 = por %p136_p4, %p135_p3 }
   0xe   : > { %p6642_p7 = scmp.ge.s32.totalorder %s8687_s24, 1  ;;  %p222_p8 = scmp.lt.s32.totalorder %s8687_s24, 3 }
  0x10   : > { %p223_p9 = pnand %p6642_p7, %p222_p8 }
  0x12   : > { %226 = sbr.rel (%p223_p9) target bundleno = 1576 (0x628), region = 36 }
  0x19   : > { %v268_v0 = vld [vmem:[%s12670_s1 + $0x8] sm:$0xff]  ;;  %v270_v2 = vld [vmem:[%s12670_s1 + $0x18] sm:$0xff]  ;;  %p259_p10 = scmp.lt.s32.totalorder %s8749_s25, 1  ;;  %v267_v7 = vld [vmem:[%s12670_s1] sm:$0xff]  ;;  %v12697_v9 = vmov 0.0   ;;  %vm341_vm0 = vcmask 261120  }
  0x1a   : > { %v276_v1 = vld [vmem:[%s12670_s1 + $0x48] sm:$0xff]  ;;  %v345_v3 = vand.u32 4294901760, %v268_v0  ;;  %v278_v5 = vld [vmem:[%s12670_s1 + $0x58] sm:$0xff]  ;;  %v888_v6 = vand.u32 4294901760, %v270_v2  ;;  %v275_v8 = vld [vmem:[%s12670_s1 + $0x40] sm:$0xff]  ;;  %417 = vmatprep.mubr.f32.mxu0 %v12697_v9  ;;  %960 = vmatprep.mubr.f32.mxu1 %v12697_v9  ;;  %v347_v11 = vand.u32 4294901760, %v267_v7 }
  0x1b   : > { %v349_v4 = vand.u32 4294901760, %v276_v1  ;;  %v892_v10 = vand.u32 4294901760, %v278_v5  ;;  %v351_v12 = vand.u32 4294901760, %v275_v8  ;;  %v269_v13 = vld [vmem:[%s12670_s1 + $0x10] sm:$0xff]  ;;  %v284_v15 = vld [vmem:[%s12670_s1 + $0x88] sm:$0xff]  ;;  %v286_v21 = vld [vmem:[%s12670_s1 + $0x98] sm:$0xff] }
  0x1c   : > { %v277_v14 = vld [vmem:[%s12670_s1 + $0x50] sm:$0xff]  ;;  %v8808_v17 = vsub.f32 %v268_v0, %v345_v3  ;;  %v8812_v19 = vsub.f32 %v270_v2, %v888_v6  ;;  %v292_v20 = vld [vmem:[%s12670_s1 + $0xc8] sm:$0xff]  ;;  %v294_v22 = vld [vmem:[%s12670_s1 + $0xd8] sm:$0xff]  ;;  %s8826_s18 = scalar_select %p259_p10, %s8749_s25, 1  ;;  %v8834_v26 = vsub.f32 %v267_v7, %v347_v11  ;;  %v890_v29 = vand.u32 4294901760, %v269_v13 }
  0x1d   : > { %v8806_v16 = vpack.c.bf16 %v349_v4, %v345_v3  ;;  %v8810_v18 = vsub.f32 %v276_v1, %v349_v4  ;;  %v8828_v23 = vpack.c.bf16 %v892_v10, %v888_v6  ;;  %v8830_v24 = vsub.f32 %v278_v5, %v892_v10  ;;  %v283_v27 = vld [vmem:[%s12670_s1 + $0x80] sm:$0xff]  ;;  %v285_v37 = vld [vmem:[%s12670_s1 + $0x90] sm:$0xff]  ;;  %s13005_s0 = sld [smem:[#allocation54_spill]]  ;;  %s6697_s16 = sshll.u32 %s8749_s25, 10 }
  0x1e   : > { %v8832_v25 = vpack.c.bf16 %v351_v12, %v347_v11  ;;  %v8840_v28 = vsub.f32 %v275_v8, %v351_v12  ;;  %v894_v30 = vand.u32 4294901760, %v277_v14  ;;  %v353_v31 = vand.u32 4294901760, %v284_v15  ;;  %s6645_s26 = sshll.u32 %s8826_s18, 3  ;;  %v291_v35 = vld [vmem:[%s12670_s1 + $0xc0] sm:$0xff]  ;;  %v293_v42 = vld [vmem:[%s12670_s1 + $0xd0] sm:$0xff]  ;;  %s8691_s20 = smov [#allocation2]  }
  0x1f   : > { %7539 = vmatprep.subr.bf16.mxu0 %v8806_v16  ;;  %7587 = vmatprep.subr.bf16.mxu1 %v8828_v23  ;;  %v357_v32 = vand.u32 4294901760, %v292_v20  ;;  %v896_v33 = vand.u32 4294901760, %v286_v21  ;;  %v900_v34 = vand.u32 4294901760, %v294_v22  ;;  %v355_v36 = vand.u32 4294901760, %v283_v27 }
  0x20   : > { %7541 = vmatpush1.bf16.msra.mxu0 %v8832_v25  ;;  %v8851_v38 = vpack.c.bf16 %v894_v30, %v890_v29  ;;  %v8853_v39 = vsub.f32 %v269_v13, %v890_v29  ;;  %v8855_v40 = vsub.f32 %v277_v14, %v894_v30  ;;  %v8857_v41 = vsub.f32 %v284_v15, %v353_v31 }
  0x21   : > { %v8867_v43 = vpack.c.bf16 %v357_v32, %v353_v31  ;;  %v8869_v44 = vsub.f32 %v292_v20, %v357_v32  ;;  %v8871_v45 = vpack.c.bf16 %v900_v34, %v896_v33  ;;  %v8873_v46 = vsub.f32 %v286_v21, %v896_v33 }
  0x22   : > { %7589 = vmatpush1.bf16.msra.mxu1 %v8851_v38  ;;  %v8876_v47 = vsub.f32 %v294_v22, %v900_v34  ;;  %v359_v48 = vand.u32 4294901760, %v291_v35  ;;  %v8878_v49 = vsub.f32 %v283_v27, %v355_v36  ;;  %v898_v50 = vand.u32 4294901760, %v285_v37 }
  0x23   : > { %s8865_s15 = scalar_lea.vmem %s13005_s0, %s6645_s26  ;;  %7543 = vmatprep.subr.bf16.mxu0 %v8867_v43  ;;  %7591 = vmatprep.subr.bf16.mxu1 %v8871_v45  ;;  %v902_v51 = vand.u32 4294901760, %v293_v42  ;;  %v431_v52 = vand.u32 4294901760, %v8808_v17  ;;  %v443_v53 = vand.u32 4294901760, %v8810_v18  ;;  %v974_v54 = vand.u32 4294901760, %v8812_v19  ;;  %s12573_s26 = sand.u32 1, %s8679_s22  }
  0x24   : > { %v266_v55 = vld [vmem:[%s8865_s15] sm:$0xff]  ;;  %v8886_v56 = vpack.c.bf16 %v359_v48, %v355_v36  ;;  %v8888_v57 = vsub.f32 %v291_v35, %v359_v48  ;;  %v8890_v58 = vsub.f32 %v285_v37, %v898_v50  ;;  %v986_v59 = vand.u32 4294901760, %v8830_v24  ;;  %s6644_s28 = sshll.u32 %s12573_s26, 6  ;;  %s6643_s9 = sshll.u32 %s12573_s26, 3 }
  0x25   : > { %v8893_v60 = vpack.c.bf16 %v902_v51, %v898_v50  ;;  %v8895_v61 = vsub.f32 %v293_v42, %v902_v51  ;;  %v432_v62 = vsub.f32 %v8808_v17, %v431_v52  ;;  %v444_v63 = vsub.f32 %v8810_v18, %v443_v53  ;;  %s12576_s29 = scalar_lea.vmem [#allocation4], %s6644_s28  ;;  %s246_s10 = scalar_lea.vmem [#allocation2], %s6643_s9 }
  0x26   : > { %7545 = vmatpush1.bf16.msra.mxu0 %v8886_v56  ;;  %v975_v0 = vsub.f32 %v8812_v19, %v974_v54  ;;  %v987_v1 = vsub.f32 %v8830_v24, %v986_v59  ;;  %v343_v2 = vsel %vm341_vm0, %v266_v55, 0  ;;  %v437_v3 = vand.u32 4294901760, %v8834_v26  ;;  %s6512_s14 = sshll.u32 %s246_s10, 4  ;;  %s6491_s17 = scalar_lea.sflag [#allocation3], %s12573_s26  ;;  %s12597_s14 = int_to_ptr.vmem [resolvable:$true] %s6512_s14 }
  0x27   : > { %7593 = vmatpush1.bf16.msra.mxu1 %v8893_v60  ;;  %v433_v4 = vand.u32 4294901760, %v432_v62  ;;  %v445_v5 = vand.u32 4294901760, %v444_v63  ;;  %v8913_v6 = vand.u32 4294901760, %v343_v2  ;;  %v449_v7 = vand.u32 4294901760, %v8840_v28  ;;  %s8593_s19 = scalar_lea.vmem %s12597_s14, 128  ;;  %s8597_s28 = sshll.u32 %s8691_s20, 4  ;;  %s8598_s28 = int_to_ptr.vmem [resolvable:$false] %s8597_s28 }
  0x28   : > { %v976_v8 = vand.u32 4294901760, %v975_v0  ;;  %v988_v10 = vand.u32 4294901760, %v987_v1  ;;  %v438_v11 = vsub.f32 %v8834_v26, %v437_v3  ;;  %v980_v12 = vand.u32 4294901760, %v8853_v39  ;;  %p8594_p11 = scmp.ne.s32.totalorder %s12597_s14, %s8593_s19  ;;  %s8599_s9 = scalar_lea.vmem %s8598_s28, 256 }
  0x29   : > { %v7546_v13 = vpack.c.bf16 %v445_v5, %v433_v4  ;;  %v8921_v14 = vsub.f32 %v343_v2, %v8913_v6  ;;  %v450_v15 = vsub.f32 %v8840_v28, %v449_v7  ;;  %v992_v20 = vand.u32 4294901760, %v8855_v40  ;;  %p8600_p0 = scmp.lt.s32.totalorder %s12597_s14, %s8598_s28  ;;  %p8601_p1 = scmp.lt.s32.totalorder %s8599_s9, %s8593_s19 }
  0x2a   : > { %v7594_v21 = vpack.c.bf16 %v988_v10, %v976_v8  ;;  %v439_v22 = vand.u32 4294901760, %v438_v11  ;;  %v981_v27 = vsub.f32 %v8853_v39, %v980_v12  ;;  %v455_v29 = vand.u32 4294901760, %v8857_v41  ;;  %p8595_p12 = pnand %p8594_p11, %p8766_p5 }
  0x2b   : > { %7547 = vmatprep.subr.bf16.mxu0 %v7546_v13  ;;  %v8932_v30 = vand.u32 4294901760, %v8921_v14  ;;  %v451_v31 = vand.u32 4294901760, %v450_v15  ;;  %v993_v32 = vsub.f32 %v8855_v40, %v992_v20  ;;  %v467_v33 = vand.u32 4294901760, %v8869_v44  ;;  %p8602_p2 = por %p8601_p1, %p8600_p0 }
  0x2c   : > { %7595 = vmatprep.subr.bf16.mxu1 %v7594_v21  ;;  %v982_v34 = vand.u32 4294901760, %v981_v27  ;;  %v456_v35 = vsub.f32 %v8857_v41, %v455_v29  ;;  %v998_v36 = vand.u32 4294901760, %v8873_v46  ;;  %v1010_v37 = vand.u32 4294901760, %v8876_v47  ;;  %p8596_p13 = pneg %p8595_p12 }
  0x2d   : > { %v421_v42 = vsub.f32 %v8921_v14, %v8932_v30  ;;  %v7548_v48 = vpack.c.bf16 %v451_v31, %v439_v22  ;;  %v994_v50 = vand.u32 4294901760, %v993_v32  ;;  %v468_v51 = vsub.f32 %v8869_v44, %v467_v33 }
  0x2e   : > { %v457_v55 = vand.u32 4294901760, %v456_v35  ;;  %v999_v62 = vsub.f32 %v8873_v46, %v998_v36  ;;  %v1011_v63 = vsub.f32 %v8876_v47, %v1010_v37  ;;  %v461_v0 = vand.u32 4294901760, %v8878_v49  ;;  %p8603_p3 = pnand %p8602_p2, %p8596_p13 }
  0x2f   : > { %v8955_v1 = vand.u32 4294901760, %v421_v42  ;;  %v7596_v2 = vpack.c.bf16 %v994_v50, %v982_v34  ;;  %v469_v4 = vand.u32 4294901760, %v468_v51  ;;  %v473_v5 = vand.u32 4294901760, %v8888_v57 }
  0x30   : > { %v1000_v8 = vand.u32 4294901760, %v999_v62  ;;  %v1012_v10 = vand.u32 4294901760, %v1011_v63  ;;  %v462_v11 = vsub.f32 %v8878_v49, %v461_v0  ;;  %v1004_v13 = vand.u32 4294901760, %v8890_v58 }
  0x31   : > { %423 = vmatmul.mubr.f32.vlgmr.msra.gmra.mrb[0].mxu0 %v8955_v1  ;;  %966 = vmatmul.mubr.f32.vlgmr.msra.gmra.mrb[0].mxu1 %v8955_v1  ;;  %v7550_v15 = vpack.c.bf16 %v469_v4, %v457_v55  ;;  %v474_v21 = vsub.f32 %v8888_v57, %v473_v5  ;;  %v1016_v22 = vand.u32 4294901760, %v8895_v61  ;;  %v7602_v55 = vpack.c.bf16 %v8830_v24, %v8812_v19  ;;  %v273_v24 = vld [vmem:[%s12670_s1 + $0x30] sm:$0xff] }
  0x32   : > { %7549 = vmatpush1.bf16.msra.mxu0 %v7548_v48  ;;  %7597 = vmatpush1.bf16.msra.mxu1 %v7596_v2  ;;  %v7598_v27 = vpack.c.bf16 %v1012_v10, %v1000_v8  ;;  %v463_v31 = vand.u32 4294901760, %v462_v11  ;;  %v1005_v32 = vsub.f32 %v8890_v58, %v1004_v13  ;;  %v7554_v48 = vpack.c.bf16 %v8810_v18, %v8808_v17  ;;  %v282_v17 = vld [vmem:[%s12670_s1 + $0x78] sm:$0xff] }
  0x33   : > { %7551 = vmatprep.subr.bf16.mxu0 %v7550_v15  ;;  %v475_v34 = vand.u32 4294901760, %v474_v21  ;;  %v1017_v35 = vsub.f32 %v8895_v61, %v1016_v22  ;;  %533 = vmatprep.mubr.f32.mxu0 %v12697_v9  ;;  %v7556_v63 = vpack.c.bf16 %v8840_v28, %v8834_v26  ;;  %v7558_v2 = vpack.c.bf16 %v8869_v44, %v8857_v41  ;;  %v272_v21 = vld [vmem:[%s12670_s1 + $0x28] sm:$0xff] }
  0x34   : > { %7599 = vmatprep.subr.bf16.mxu1 %v7598_v27  ;;  %v1006_v42 = vand.u32 4294901760, %v1005_v32  ;;  %1076 = vmatprep.mubr.f32.mxu1 %v12697_v9  ;;  %v7604_v4 = vpack.c.bf16 %v8855_v40, %v8853_v39  ;;  %v7606_v8 = vpack.c.bf16 %v8876_v47, %v8873_v46  ;;  %v7560_v10 = vpack.c.bf16 %v8888_v57, %v8878_v49  ;;  %v280_v27 = vld [vmem:[%s12670_s1 + $0x68] sm:$0xff]  ;;  %v290_v47 = vld [vmem:[%s12670_s1 + $0xb8] sm:$0xff] }
  0x35   : > { %v7552_v50 = vpack.c.bf16 %v475_v34, %v463_v31  ;;  %v1018_v51 = vand.u32 4294901760, %v1017_v35  ;;  %v7608_v11 = vpack.c.bf16 %v8895_v61, %v8890_v58  ;;  %v7570_v15 = vpack.c.bf16 %v443_v53, %v431_v52  ;;  %v274_v31 = vld [vmem:[%s12670_s1 + $0x38] sm:$0xff]  ;;  %v271_v52 = vld [vmem:[%s12670_s1 + $0x20] sm:$0xff]  ;;  %v288_v28 = vld [vmem:[%s12670_s1 + $0xa8] sm:$0xff] }
  0x36   : > { %v7618_v18 = vpack.c.bf16 %v986_v59, %v974_v54  ;;  %v279_v53 = vld [vmem:[%s12670_s1 + $0x60] sm:$0xff]  ;;  %v7572_v32 = vpack.c.bf16 %v449_v7, %v437_v3  ;;  %v1431_v34 = vand.u32 4294901760, %v272_v21  ;;  %v1435_v19 = vand.u32 4294901760, %v280_v27  ;;  %v281_v54 = vld [vmem:[%s12670_s1 + $0x70] sm:$0xff]  ;;  %v296_v3 = vld [vmem:[%s12670_s1 + $0xe8] sm:$0xff] }
  0x37   : > { %7553 = vmatpush1.bf16.msra.mxu0 %v7552_v50  ;;  %v7600_v62 = vpack.c.bf16 %v1018_v51, %v1006_v42  ;;  %v7574_v59 = vpack.c.bf16 %v467_v33, %v455_v29  ;;  %v1974_v26 = vand.u32 4294901760, %v274_v31  ;;  %v1978_v35 = vand.u32 4294901760, %v282_v17 }
  0x38   : > { %7555 = vmatprep.subr.bf16.mxu0 %v7554_v48  ;;  %v7620_v41 = vpack.c.bf16 %v992_v20, %v980_v12  ;;  %v7622_v44 = vpack.c.bf16 %v1010_v37, %v998_v36  ;;  %v1433_v7 = vand.u32 4294901760, %v271_v52  ;;  %v1437_v29 = vand.u32 4294901760, %v279_v53  ;;  %v298_v12 = vld [vmem:[%s12670_s1 + $0xf8] sm:$0xff]  ;;  %v287_v20 = vld [vmem:[%s12670_s1 + $0xa0] sm:$0xff] }
  0x39   : > { %7601 = vmatpush1.bf16.msra.mxu1 %v7600_v62  ;;  %v7576_v33 = vpack.c.bf16 %v473_v5, %v461_v0  ;;  %v7624_v39 = vpack.c.bf16 %v1016_v22, %v1004_v13  ;;  %v1976_v40 = vand.u32 4294901760, %v273_v24  ;;  %v1980_v46 = vand.u32 4294901760, %v281_v54  ;;  %v295_v36 = vld [vmem:[%s12670_s1 + $0xe0] sm:$0xff] }
  0x3a   : > { %7603 = vmatprep.subr.bf16.mxu1 %v7602_v55  ;;  %535 = vmatmul.mubr.f32.vlgmr.msra.gmra.mrb[0].mxu0 %v8913_v6  ;;  %v9078_v49 = vpack.c.bf16 %v1435_v19, %v1431_v34  ;;  %v9080_v57 = vsub.f32 %v272_v21, %v1431_v34  ;;  %v1439_v58 = vand.u32 4294901760, %v288_v28  ;;  %v1443_v61 = vand.u32 4294901760, %v296_v3 }
  0x3b   : > { %7557 = vmatpush1.bf16.msra.mxu0 %v7556_v63  ;;  %621 = vmatprep.mubr.f32.mxu0 %v12697_v9  ;;  %v9089_v37 = vsub.f32 %v280_v27, %v1435_v19  ;;  %v9091_v0 = vpack.c.bf16 %v1978_v35, %v1974_v26  ;;  %v9093_v5 = vsub.f32 %v274_v31, %v1974_v26  ;;  %v1982_v42 = vand.u32 4294901760, %v290_v47  ;;  %v9107_v63 = vld [vmem:[%s12670_s1 + $0xb0] sm:$0xff] }
  0x3c   : > { %1078 = vmatmul.mubr.f32.vlgmr.msra.gmra.mrb[0].mxu1 %v8913_v6  ;;  %7559 = vmatprep.subr.bf16.mxu0 %v7558_v2  ;;  %v9096_v13 = vsub.f32 %v282_v17, %v1978_v35  ;;  %v9098_v22 = vpack.c.bf16 %v1437_v29, %v1433_v7  ;;  %v1986_v48 = vand.u32 4294901760, %v298_v12  ;;  %v9100_v50 = vsub.f32 %v271_v52, %v1433_v7  ;;  %v9112_v2 = vld [vmem:[%s12670_s1 + $0xf0] sm:$0xff] }
  0x3d   : > { %7605 = vmatpush1.bf16.msra.mxu1 %v7604_v4  ;;  %1164 = vmatprep.mubr.f32.mxu1 %v12697_v9  ;;  %v9102_v51 = vsub.f32 %v279_v53, %v1437_v29  ;;  %v1441_v55 = vand.u32 4294901760, %v287_v20  ;;  %v1445_v62 = vand.u32 4294901760, %v295_v36  ;;  %v9114_v4 = vpack.c.bf16 %v1980_v46, %v1976_v40 }
  0x3e   : > { %7607 = vmatprep.subr.bf16.mxu1 %v7606_v8  ;;  %v9116_v8 = vsub.f32 %v273_v24, %v1976_v40  ;;  %v9125_v21 = vsub.f32 %v296_v3, %v1443_v61  ;;  %v1517_v27 = vand.u32 4294901760, %v9080_v57  ;;  %v1529_v31 = vand.u32 4294901760, %v9089_v37 }
  0x3f   : > { %7561 = vmatpush1.bf16.msra.mxu0 %v7560_v10  ;;  %v9118_v10 = vsub.f32 %v281_v54, %v1980_v46  ;;  %v9129_v17 = vpack.c.bf16 %v1986_v48, %v1982_v42  ;;  %v1984_v52 = vand.u32 4294901760, %v9107_v63  ;;  %v1988_v53 = vand.u32 4294901760, %v9112_v2 }
  0x40   : > { %7563 = vmatprep.subr.bf16.mxu0 %v8806_v16  ;;  %v2060_v34 = vand.u32 4294901760, %v9093_v5  ;;  %v2072_v19 = vand.u32 4294901760, %v9096_v13  ;;  %v9145_v24 = vsub.f32 %v287_v20, %v1441_v55  ;;  %v9147_v54 = vsub.f32 %v295_v36, %v1445_v62 }
  0x41   : > { %7609 = vmatpush1.bf16.msra.mxu1 %v7608_v11  ;;  %v9120_v11 = vpack.c.bf16 %v1443_v61, %v1439_v58  ;;  %v1518_v26 = vsub.f32 %v9080_v57, %v1517_v27  ;;  %v9164_v3 = vsub.f32 %v9107_v63, %v1984_v52 }
  0x42   : > { %7611 = vmatprep.subr.bf16.mxu1 %v8828_v23  ;;  %624 = vmatmul.mubr.f32.vlgmr.msra.gmra.mrb[0].mxu0 %v8921_v14  ;;  %v2061_v7 = vsub.f32 %v9093_v5, %v2060_v34  ;;  %v12678_v40 = vand.u32 4294901760, %v9145_v24  ;;  %v12679_v46 = vand.u32 4294901760, %v9147_v54 }
  0x43   : > { %7565 = vmatpush1.bf16.msra.mxu0 %v8832_v25  ;;  %702 = vmatprep.mubr.f32.mxu0 %v12697_v9  ;;  %v12680_v36 = vand.u32 4294901760, %v9164_v3 }
  0x44   : > { %1167 = vmatmul.mubr.f32.vlgmr.msra.gmra.mrb[0].mxu1 %v8921_v14  ;;  %7567 = vmatprep.subr.bf16.mxu0 %v8867_v43 }
  0x45   : > { %7613 = vmatpush1.bf16.msra.mxu1 %v8851_v38  ;;  %1245 = vmatprep.mubr.f32.mxu1 %v12697_v9 }
  0x46   : > { %7615 = vmatprep.subr.bf16.mxu1 %v8871_v45 }
  0x47   : > { %7569 = vmatpush1.bf16.msra.mxu0 %v8886_v56 }
  0x48   : > { %7571 = vmatprep.subr.bf16.mxu0 %v7570_v15  ;;  %v9123_v15 = vsub.f32 %v288_v28, %v1439_v58  ;;  %v1553_v28 = vand.u32 4294901760, %v9125_v21 }
  0x49   : > { %7617 = vmatpush1.bf16.msra.mxu1 %v8893_v60 }
  0x4a   : > { %7619 = vmatprep.subr.bf16.mxu1 %v7618_v18  ;;  %706 = vmatmul.mubr.f32.vlgmr.msra.gmra.mrb[0].mxu0 %v8932_v30  ;;  %v9131_v18 = vsub.f32 %v290_v47, %v1982_v42  ;;  %v1541_v35 = vand.u32 4294901760, %v9123_v15  ;;  %v1519_v47 = vand.u32 4294901760, %v1518_v26  ;;  %v1554_v58 = vsub.f32 %v9125_v21, %v1553_v28 }
  0x4b   : > { %7573 = vmatpush1.bf16.msra.mxu0 %v7572_v32  ;;  %800 = vmatprep.mubr.f32.mxu0 %v12697_v9  ;;  %v9139_v32 = vpack.c.bf16 %v1445_v62, %v1441_v55  ;;  %v1548_v26 = vsub.f32 %v9145_v24, %v12678_v40  ;;  %v2091_v40 = vsub.f32 %v9164_v3, %v12680_v36 }
  0x4c   : > { %1249 = vmatmul.mubr.f32.vlgmr.msra.gmra.mrb[0].mxu1 %v8932_v30  ;;  %7575 = vmatprep.subr.bf16.mxu0 %v7574_v59  ;;  %v1535_v59 = vand.u32 4294901760, %v9102_v51  ;;  %v12677_v29 = vand.u32 4294901760, %v9131_v18 }
  0x4d   : > { %7621 = vmatpush1.bf16.msra.mxu1 %v7620_v41  ;;  %1343 = vmatprep.mubr.f32.mxu1 %v12697_v9  ;;  %v2066_v41 = vand.u32 4294901760, %v9116_v8  ;;  %v2092_v36 = vand.u32 4294901760, %v2091_v40  ;;  %v7652_v40 = vpack.c.bf16 %v9102_v51, %v9100_v50 }
  0x4e   : > { %7623 = vmatprep.subr.bf16.mxu1 %v7622_v44  ;;  %v12681_v44 = vand.u32 4294901760, %v9118_v10 }
  0x4f   : > { %7577 = vmatpush1.bf16.msra.mxu0 %v7576_v33  ;;  %v2067_v61 = vsub.f32 %v9116_v8, %v2066_v41 }
  0x50   : > { %7579 = vmatprep.subr.bf16.mxu0 %v8806_v16  ;;  %v9137_v16 = vsub.f32 %v298_v12, %v1986_v48  ;;  %v2079_v20 = vsub.f32 %v9118_v10, %v12681_v44  ;;  %v2062_v48 = vand.u32 4294901760, %v2061_v7  ;;  %v9223_v7 = vpack.c.bf16 %v1988_v53, %v1984_v52 }
  0x51   : > { %7625 = vmatpush1.bf16.msra.mxu1 %v7624_v39 }
  0x52   : > { %7627 = vmatprep.subr.bf16.mxu1 %v8828_v23  ;;  %802 = vmatmul.mubr.f32.vlgmr.msra.gmra.mrb[0].mxu0 %v8913_v6  ;;  %v1523_v23 = vand.u32 4294901760, %v9100_v50  ;;  %v12676_v33 = vand.u32 4294901760, %v9137_v16 }
  0x53   : > { %7581 = vmatpush1.bf16.msra.mxu0 %v8832_v25  ;;  %880 = vmatprep.mubr.f32.mxu0 %v12697_v9  ;;  %v1530_v25 = vsub.f32 %v9089_v37, %v1529_v31 }
  0x54   : > { %1345 = vmatmul.mubr.f32.vlgmr.msra.gmra.mrb[0].mxu1 %v8913_v6  ;;  %7583 = vmatprep.subr.bf16.mxu0 %v8867_v43  ;;  %v9167_v43 = vsub.f32 %v9112_v2, %v1988_v53  ;;  %v1524_v39 = vsub.f32 %v9100_v50, %v1523_v23  ;;  %v2097_v62 = vsub.f32 %v9137_v16, %v12676_v33  ;;  %v13008_v50 = vand.u32 4294901760, %v9137_v16 }
  0x55   : > { %7629 = vmatpush1.bf16.msra.mxu1 %v8851_v38  ;;  %1423 = vmatprep.mubr.f32.mxu1 %v12697_v9  ;;  %v2073_v38 = vsub.f32 %v9096_v13, %v2072_v19  ;;  %v1531_v12 = vand.u32 4294901760, %v1530_v25  ;;  %v1560_v25 = vsub.f32 %v9147_v54, %v12679_v46 }
  0x56   : > { %7631 = vmatprep.subr.bf16.mxu1 %v8871_v45  ;;  %v1536_v45 = vsub.f32 %v9102_v51, %v1535_v59  ;;  %v12682_v42 = vand.u32 4294901760, %v9167_v43  ;;  %v1525_v63 = vand.u32 4294901760, %v1524_v39  ;;  %v2068_v39 = vand.u32 4294901760, %v2067_v61 }
  0x57   : > { %7585 = vmatpush1.bf16.msra.mxu0 %v8886_v56  ;;  %v1542_v56 = vsub.f32 %v9123_v15, %v1541_v35  ;;  %v2074_v55 = vand.u32 4294901760, %v2073_v38  ;;  %v7642_v38 = vpack.c.bf16 %v1531_v12, %v1519_v47  ;;  %v2098_v47 = vand.u32 4294901760, %v2097_v62 }
  0x58   : > { %7635 = vmatprep.subr.bf16.mxu0 %v9078_v49  ;;  %v1537_v2 = vand.u32 4294901760, %v1536_v45  ;;  %v2080_v45 = vand.u32 4294901760, %v2079_v20  ;;  %v2103_v46 = vsub.f32 %v9167_v43, %v12682_v42  ;;  %v7714_v62 = vpack.c.bf16 %v2072_v19, %v2060_v34 }
  0x59   : > { %7633 = vmatpush1.bf16.msra.mxu1 %v8893_v60  ;;  %v2085_v60 = vsub.f32 %v9131_v18, %v12677_v29  ;;  %v1543_v33 = vand.u32 4294901760, %v1542_v56  ;;  %v1555_v29 = vand.u32 4294901760, %v1554_v58  ;;  %v7690_v52 = vpack.c.bf16 %v2074_v55, %v2062_v48 }
  0x5a   : > { %7683 = vmatprep.subr.bf16.mxu1 %v9091_v0  ;;  %882 = vmatmul.mubr.f32.vlgmr.msra.gmra.mrb[0].mxu0 %v8913_v6  ;;  %v7644_v12 = vpack.c.bf16 %v1537_v2, %v1525_v63  ;;  %v1549_v56 = vand.u32 4294901760, %v1548_v26  ;;  %v1561_v58 = vand.u32 4294901760, %v1560_v25  ;;  %v7692_v20 = vpack.c.bf16 %v2080_v45, %v2068_v39 }
  0x5b   : > { %7637 = vmatpush1.bf16.msra.mxu0 %v9098_v22  ;;  %1503 = vmatprep.mubr.f32.mxu0 %v12697_v9  ;;  %v2086_v53 = vand.u32 4294901760, %v2085_v60  ;;  %v7646_v61 = vpack.c.bf16 %v1555_v29, %v1543_v33  ;;  %v2104_v44 = vand.u32 4294901760, %v2103_v46  ;;  %v7650_v55 = vpack.c.bf16 %v9089_v37, %v9080_v57 }
  0x5c   : > { %1425 = vmatmul.mubr.f32.vlgmr.msra.gmra.mrb[0].mxu1 %v8913_v6  ;;  %7639 = vmatprep.subr.bf16.mxu0 %v9120_v11  ;;  %v7648_v48 = vpack.c.bf16 %v1561_v58, %v1549_v56  ;;  %v7698_v33 = vpack.c.bf16 %v9096_v13, %v9093_v5  ;;  %v7700_v46 = vpack.c.bf16 %v9118_v10, %v9116_v8  ;;  %v13006_v37 = vand.u32 4294901760, %v9118_v10 }
  0x5d   : > { %7685 = vmatpush1.bf16.msra.mxu1 %v9114_v4  ;;  %2046 = vmatprep.mubr.f32.mxu1 %v12697_v9  ;;  %v7694_v42 = vpack.c.bf16 %v2098_v47, %v2086_v53  ;;  %v7696_v29 = vpack.c.bf16 %v2104_v44, %v2092_v36  ;;  %v7702_v44 = vpack.c.bf16 %v9137_v16, %v9131_v18  ;;  %v13007_v13 = vand.u32 4294901760, %v9131_v18 }
  0x5e   : > { %7687 = vmatprep.subr.bf16.mxu1 %v9129_v17  ;;  %v7656_v36 = vpack.c.bf16 %v9147_v54, %v9145_v24  ;;  %v7666_v60 = vpack.c.bf16 %v1529_v31, %v1517_v27  ;;  %v7670_v57 = vpack.c.bf16 %v1553_v28, %v1541_v35  ;;  %v7716_v5 = vpack.c.bf16 %v13006_v37, %v2066_v41 }
  0x5f   : > { %7641 = vmatpush1.bf16.msra.mxu0 %v9139_v32  ;;  %v7718_v51 = vpack.c.bf16 %v13008_v50, %v13007_v13  ;;  %v13011_v8 = vand.u32 4294901760, %v9164_v3  ;;  %v13012_v10 = vand.u32 4294901760, %v9167_v43  ;;  %v301_v18 = vlaneseq }
  0x60   : > { %7643 = vmatprep.subr.bf16.mxu0 %v7642_v38 }
  0x61   : > { %7689 = vmatpush1.bf16.msra.mxu1 %v9223_v7  ;;  %v7720_v31 = vpack.c.bf16 %v13012_v10, %v13011_v8 }
  0x62   : > { %1509 = vmatmul.mubr.f32.vlgmr.msra.gmra.mrb[2].mxu0 %v8955_v1  ;;  %7691 = vmatprep.subr.bf16.mxu1 %v7690_v52 }
  0x63   : > { %7645 = vmatpush1.bf16.msra.mxu0 %v7644_v12  ;;  %1619 = vmatprep.mubr.f32.mxu0 %v12697_v9 }
  0x64   : > { %2052 = vmatmul.mubr.f32.vlgmr.msra.gmra.mrb[2].mxu1 %v8955_v1  ;;  %7647 = vmatprep.subr.bf16.mxu0 %v7646_v61  ;;  %v7654_v1 = vpack.c.bf16 %v9125_v21, %v9123_v15  ;;  %v13009_v15 = vand.u32 4294901760, %v9145_v24  ;;  %v13010_v21 = vand.u32 4294901760, %v9147_v54 }
  0x65   : > { %7693 = vmatpush1.bf16.msra.mxu1 %v7692_v20  ;;  %2162 = vmatprep.mubr.f32.mxu1 %v12697_v9 }
  0x66   : > { %7695 = vmatprep.subr.bf16.mxu1 %v7694_v42  ;;  %v7704_v42 = vpack.c.bf16 %v9167_v43, %v9164_v3  ;;  %v7672_v27 = vpack.c.bf16 %v13010_v21, %v13009_v15 }
  0x67   : > { %7649 = vmatpush1.bf16.msra.mxu0 %v7648_v48 }
  0x68   : > { %7651 = vmatprep.subr.bf16.mxu0 %v7650_v55 }
  0x69   : > { %7697 = vmatpush1.bf16.msra.mxu1 %v7696_v29 }
  0x6a   : > { %1621 = vmatmul.mubr.f32.vlgmr.msra.gmra.mrb[2].mxu0 %v8913_v6  ;;  %7699 = vmatprep.subr.bf16.mxu1 %v7698_v33 }
  0x6b   : > { %7653 = vmatpush1.bf16.msra.mxu0 %v7652_v40  ;;  %1707 = vmatprep.mubr.f32.mxu0 %v12697_v9  ;;  %v9325_v40 = vand.u32 127, %v301_v18 }
  0x6c   : > { %2164 = vmatmul.mubr.f32.vlgmr.msra.gmra.mrb[2].mxu1 %v8913_v6  ;;  %7655 = vmatprep.subr.bf16.mxu0 %v7654_v1 }
  0x6d   : > { %7701 = vmatpush1.bf16.msra.mxu1 %v7700_v46  ;;  %2250 = vmatprep.mubr.f32.mxu1 %v12697_v9  ;;  %v9328_v1 = vadd.s32 128, %v9325_v40  ;;  %v9331_v46 = vadd.s32 256, %v9325_v40 }
  0x6e   : > { %7703 = vmatprep.subr.bf16.mxu1 %v7702_v44  ;;  %v9334_v44 = vadd.s32 384, %v9325_v40 }
  0x6f   : > { %7657 = vmatpush1.bf16.msra.mxu0 %v7656_v36  ;;  %13013 = vst [vmem:[#allocation8_spill] sm:$0xff] %v9331_v46 }
  0x70   : > { %7659 = vmatprep.subr.bf16.mxu0 %v9078_v49  ;;  %13014 = vst [vmem:[#allocation9_spill] sm:$0xff] %v9334_v44 }
  0x71   : > { %7705 = vmatpush1.bf16.msra.mxu1 %v7704_v42  ;;  %v9337_v42 = vadd.s32 512, %v9325_v40 }
  0x72   : > { %1710 = vmatmul.mubr.f32.vlgmr.msra.gmra.mrb[2].mxu0 %v8921_v14  ;;  %7707 = vmatprep.subr.bf16.mxu1 %v9091_v0 }
  0x73   : > { %7661 = vmatpush1.bf16.msra.mxu0 %v9098_v22  ;;  %1788 = vmatprep.mubr.f32.mxu0 %v12697_v9  ;;  %13015 = vst [vmem:[#allocation10_spill] sm:$0xff] %v9337_v42 }
  0x74   : > { %2253 = vmatmul.mubr.f32.vlgmr.msra.gmra.mrb[2].mxu1 %v8921_v14  ;;  %7663 = vmatprep.subr.bf16.mxu0 %v9120_v11  ;;  %v7668_v14 = vpack.c.bf16 %v1535_v59, %v1523_v23 }
  0x75   : > { %7709 = vmatpush1.bf16.msra.mxu1 %v9114_v4  ;;  %2331 = vmatprep.mubr.f32.mxu1 %v12697_v9 }
  0x76   : > { %7711 = vmatprep.subr.bf16.mxu1 %v9129_v17 }
  0x77   : > { %7665 = vmatpush1.bf16.msra.mxu0 %v9139_v32 }
  0x78   : > { %7667 = vmatprep.subr.bf16.mxu0 %v7666_v60  ;;  %v9340_v60 = vadd.s32 640, %v9325_v40 }
  0x79   : > { %7713 = vmatpush1.bf16.msra.mxu1 %v9223_v7 }
  0x7a   : > { %1792 = vmatmul.mubr.f32.vlgmr.msra.gmra.mrb[2].mxu0 %v8932_v30  ;;  %7715 = vmatprep.subr.bf16.mxu1 %v7714_v62  ;;  %13016 = vst [vmem:[#allocation11_spill] sm:$0xff] %v9340_v60  ;;  %v9343_v62 = vadd.s32 768, %v9325_v40 }
  0x7b   : > { %7669 = vmatpush1.bf16.msra.mxu0 %v7668_v14  ;;  %1886 = vmatprep.mubr.f32.mxu0 %v12697_v9  ;;  %v9346_v14 = vadd.s32 896, %v9325_v40 }
  0x7c   : > { %2335 = vmatmul.mubr.f32.vlgmr.msra.gmra.mrb[2].mxu1 %v8932_v30  ;;  %7671 = vmatprep.subr.bf16.mxu0 %v7670_v57  ;;  %13017 = vst [vmem:[#allocation12_spill] sm:$0xff] %v9343_v62 }
  0x7d   : > { %7717 = vmatpush1.bf16.msra.mxu1 %v7716_v5  ;;  %2429 = vmatprep.mubr.f32.mxu1 %v12697_v9  ;;  %13018 = vst [vmem:[#allocation13_spill] sm:$0xff] %v9346_v14 }
  0x7e   : > { %7719 = vmatprep.subr.bf16.mxu1 %v7718_v51 }
  0x7f   : > { %7673 = vmatpush1.bf16.msra.mxu0 %v7672_v27 }
  0x80   : > { %7675 = vmatprep.subr.bf16.mxu0 %v9078_v49 }
  0x81   : > { %7721 = vmatpush1.bf16.msra.mxu1 %v7720_v31 }
  0x82   : > { %1888 = vmatmul.mubr.f32.vlgmr.msra.gmra.mrb[2].mxu0 %v8913_v6  ;;  %7723 = vmatprep.subr.bf16.mxu1 %v9091_v0 }
  0x83   : > { %7677 = vmatpush1.bf16.msra.mxu0 %v9098_v22  ;;  %1966 = vmatprep.mubr.f32.mxu0 %v12697_v9 }
  0x84   : > { %2431 = vmatmul.mubr.f32.vlgmr.msra.gmra.mrb[2].mxu1 %v8913_v6  ;;  %7679 = vmatprep.subr.bf16.mxu0 %v9120_v11  ;;  %v302_v11 = vshrl.u32 %v301_v18, 7 }
  0x85   : > { %7725 = vmatpush1.bf16.msra.mxu1 %v9114_v4  ;;  %2509 = vmatprep.mubr.f32.mxu1 %v12697_v9 }
  0x86   : > { %7727 = vmatprep.subr.bf16.mxu1 %v9129_v17  ;;  %v303_v16 = vsub.s32 0, %v302_v11  ;;  %v319_v4 = vsub.s32 4, %v302_v11  ;;  %v299_v17 = vld [vmem:[%s12671_s2] sm:$0xff]  ;;  %v307_v34 = vsub.s32 1, %v302_v11  ;;  %v311_v19 = vsub.s32 2, %v302_v11 }
  0x87   : > { %7681 = vmatpush1.bf16.msra.mxu0 %v9139_v32  ;;  %v323_v32 = vsub.s32 5, %v302_v11  ;;  %v327_v24 = vsub.s32 6, %v302_v11  ;;  %v315_v54 = vsub.s32 3, %v302_v11  ;;  %v331_v23 = vsub.s32 7, %v302_v11  ;;  %v2619_v11 = vld [vmem:[%s12672_s3 + $0x80] sm:$0xff] }
  0x88   : > { %v304_v59 = vrot.slane %v299_v17, %v303_v16  ;;  %v308_v35 = vrot.slane %v299_v17, %v307_v34  ;;  %v312_v3 = vrot.slane %v299_v17, %v311_v19  ;;  %v2620_v16 = vld [vmem:[%s12672_s3 + $0x88] sm:$0xff] }
  0x89   : > { %7729 = vmatpush1.bf16.msra.mxu1 %v9223_v7  ;;  %v324_v28 = vrot.slane %v299_v17, %v323_v32  ;;  %v328_v43 = vrot.slane %v299_v17, %v327_v24  ;;  %v316_v41 = vrot.slane %v299_v17, %v315_v54  ;;  %v332_v2 = vrot.slane %v299_v17, %v331_v23  ;;  %v9376_v32 = vld [vmem:[%s12672_s3 + $0x8] sm:$0xff]  ;;  %v9382_v24 = vld [vmem:[%s12672_s3 + $0x90] sm:$0xff]  ;;  %v9387_v54 = vld [vmem:[%s12672_s3 + $0x98] sm:$0xff] }
  0x8a   : > { %1968 = vmatmul.mubr.f32.vlgmr.msra.gmra.mrb[2].mxu0 %v8913_v6  ;;  %v2783_v34 = vand.u32 4294901760, %v2620_v16  ;;  %v2735_v23 = vand.u32 4294901760, %v9376_v32 }
  0x8c   : > { %2511 = vmatmul.mubr.f32.vlgmr.msra.gmra.mrb[2].mxu1 %v8913_v6  ;;  %v320_v6 = vrot.slane %v299_v17, %v319_v4  ;;  %v9371_v4 = vld [vmem:[%s12672_s3] sm:$0xff]  ;;  %v2780_v17 = vand.u32 4294901760, %v2619_v11 }
  0x8d   : > { %v2732_v19 = vand.u32 4294901760, %v9371_v4 }
 0x12d   : > { %v883_v30 = vpop.f32.mrb[0].mxu0 }
 0x12e   : > { %v885_v49 = vpop.f32.mrb[1].mxu0  ;;  %v8498_v26 = vadd.f32 %v883_v30, %v304_v59  ;;  %v2786_v59 = vand.u32 4294901760, %v9382_v24 }
 0x12f   : > { %v1426_v0 = vpop.f32.mrb[0].mxu1  ;;  %v8499_v38 = vadd.f32 %v885_v49, %v308_v35  ;;  %v9395_v35 = vld [vmem:[%s12672_s3 + $0x10] sm:$0xff] }
 0x130   : > { %v1428_v22 = vpop.f32.mrb[1].mxu1  ;;  %v8500_v52 = vadd.f32 %v1426_v0, %v312_v3  ;;  %v9402_v3 = vsub.f32 %v2619_v11, %v2780_v17 }
 0x131   : > { %v8501_v56 = vadd.f32 %v1428_v22, %v316_v41  ;;  %v9409_v41 = vsub.f32 %v9371_v4, %v2732_v19 }
 0x15d   : > { %v1969_v63 = vpop.f32.mrb[2].mxu0 }
 0x15e   : > { %v8502_v25 = vadd.f32 %v1969_v63, %v320_v6  ;;  %v1971_v7 = vpop.f32.mrb[3].mxu0  ;;  %v2789_v6 = vand.u32 4294901760, %v9387_v54  ;;  %v2738_v63 = vand.u32 4294901760, %v9395_v35 }
 0x15f   : > { %v2512_v39 = vpop.f32.mrb[2].mxu1  ;;  %v8503_v45 = vadd.f32 %v1971_v7, %v324_v28  ;;  %v9400_v28 = vld [vmem:[%s12672_s3 + $0x18] sm:$0xff] }
 0x160   : > { %v2526_v53 = vmin.f32 %v8498_v26, %v8502_v25  ;;  %v8504_v47 = vadd.f32 %v2512_v39, %v328_v43  ;;  %v2514_v12 = vpop.f32.mrb[3].mxu1  ;;  %v9404_v43 = vsub.f32 %v2620_v16, %v2783_v34  ;;  %v2741_v7 = vand.u32 4294901760, %v9400_v28  ;;  %v9493_v16 = vld [vmem:[%s12672_s3 + $0xb0] sm:$0xff] }
 0x161   : > { %v2527_v58 = vmin.f32 %v8499_v38, %v8503_v45  ;;  %v8505_v61 = vadd.f32 %v2514_v12, %v332_v2  ;;  %v9413_v2 = vsub.f32 %v9376_v32, %v2735_v23  ;;  %v9498_v32 = vld [vmem:[%s12672_s3 + $0xb8] sm:$0xff] }
 0x162   : > { %v2528_v20 = vmin.f32 %v8500_v52, %v8504_v47  ;;  %v12695_v39 = vand.u32 4294901760, %v9404_v43 }
 0x163   : > { %v2529_v48 = vmin.f32 %v8501_v56, %v8505_v61  ;;  %v2530_v55 = vmin.f32 %v2526_v53, %v2527_v58  ;;  %v12689_v53 = vand.u32 4294901760, %v9413_v2 }
 0x165   : > { %v2531_v29 = vmin.f32 %v2528_v20, %v2529_v48 }
 0x167   : > { %v2532_v33 = vmin.f32 %v2530_v55, %v2531_v29  ;;  %v2854_v55 = vsub.f32 %v9413_v2, %v12689_v53 }
 0x169   : > { %2533 = vmin.xlane.f32.xlu0 %v2532_v33 }
 0x1f6   : > { %v2534_v36 = vpop.xlane.xlu0 %2533 }
 0x1f7   : > { %vm2535_vm1 = vcmp.eq.f32.partialorder %v8498_v26, %v2534_v36  ;;  %vm2536_vm2 = vcmp.eq.f32.partialorder %v8499_v38, %v2534_v36  ;;  %vm2537_vm3 = vcmp.eq.f32.partialorder %v8500_v52, %v2534_v36  ;;  %vm2538_vm4 = vcmp.eq.f32.partialorder %v8501_v56, %v2534_v36 }
 0x1f8   : > { %vm2539_vm5 = vcmp.eq.f32.partialorder %v8502_v25, %v2534_v36  ;;  %vm2540_vm6 = vcmp.eq.f32.partialorder %v8503_v45, %v2534_v36  ;;  %vm2541_vm7 = vcmp.eq.f32.partialorder %v8504_v47, %v2534_v36  ;;  %vm2542_vm8 = vcmp.eq.f32.partialorder %v8505_v61, %v2534_v36 }
 0x1f9   : > { %v2543_v57 = vsel %vm2535_vm1, %v9325_v40, 1024  ;;  %v2544_v37 = vsel %vm2536_vm2, %v9328_v1, 1024  ;;  %v2545_v5 = vsel %vm2537_vm3, %v9331_v46, 1024  ;;  %v2546_v13 = vsel %vm2538_vm4, %v9334_v44, 1024 }
 0x1fa   : > { %v2547_v50 = vsel %vm2539_vm5, %v9337_v42, 1024  ;;  %v2548_v51 = vsel %vm2540_vm6, %v9340_v60, 1024  ;;  %v2549_v15 = vsel %vm2541_vm7, %v9343_v62, 1024  ;;  %v2550_v21 = vsel %vm2542_vm8, %v9346_v14, 1024 }
 0x1fb   : > { %vm2551_vm9 = vcmp.lt.s32.totalorder %v2543_v57, %v2547_v50  ;;  %vm2553_vm10 = vcmp.lt.s32.totalorder %v2544_v37, %v2548_v51  ;;  %vm2555_vm11 = vcmp.lt.s32.totalorder %v2545_v5, %v2549_v15  ;;  %vm2557_vm12 = vcmp.lt.s32.totalorder %v2546_v13, %v2550_v21 }
 0x1fc   : > { %v2552_v27 = vsel %vm2551_vm9, %v2543_v57, %v2547_v50  ;;  %v2554_v8 = vsel %vm2553_vm10, %v2544_v37, %v2548_v51  ;;  %v2556_v10 = vsel %vm2555_vm11, %v2545_v5, %v2549_v15  ;;  %v2558_v31 = vsel %vm2557_vm12, %v2546_v13, %v2550_v21  ;;  %v9465_v57 = vld [vmem:[%s12672_s3 + $0xa0] sm:$0xff]  ;;  %v9470_v37 = vld [vmem:[%s12672_s3 + $0xa8] sm:$0xff] }
 0x1fd   : > { %vm2559_vm13 = vcmp.lt.s32.totalorder %v2552_v27, %v2554_v8  ;;  %vm2561_vm14 = vcmp.lt.s32.totalorder %v2556_v10, %v2558_v31  ;;  %v9418_v26 = vsub.f32 %v9382_v24, %v2786_v59  ;;  %v9423_v25 = vsub.f32 %v9387_v54, %v2789_v6 }
 0x1fe   : > { %v2560_v30 = vsel %vm2559_vm13, %v2552_v27, %v2554_v8  ;;  %v2562_v49 = vsel %vm2561_vm14, %v2556_v10, %v2558_v31  ;;  %v12696_v38 = vand.u32 4294901760, %v9402_v3  ;;  %v12690_v45 = vand.u32 4294901760, %v9409_v41  ;;  %v9481_v10 = vld [vmem:[%s12672_s3 + $0x20] sm:$0xff]  ;;  %v9486_v31 = vld [vmem:[%s12672_s3 + $0x28] sm:$0xff] }
 0x1ff   : > { %vm2563_vm15 = vcmp.lt.s32.totalorder %v2560_v30, %v2562_v49  ;;  %v9432_v52 = vsub.f32 %v9395_v35, %v2738_v63  ;;  %v12688_v47 = vand.u32 4294901760, %v9418_v26  ;;  %v12687_v12 = vand.u32 4294901760, %v9423_v25  ;;  %v9624_v35 = vld [vmem:[%s12672_s3 + $0x48] sm:$0xff] }
 0x200   : > { %v9356_v0 = vsel %vm2563_vm15, %v2560_v30, %v2562_v49  ;;  %v9440_v56 = vsub.f32 %v9400_v28, %v2741_v7  ;;  %v2959_v58 = vsub.f32 %v9402_v3, %v12696_v38  ;;  %v2966_v61 = vsub.f32 %v9404_v43, %v12695_v39  ;;  %v9615_v38 = vld [vmem:[%s12672_s3 + $0x40] sm:$0xff] }
 0x201   : > { %v2566_v22 = vshra.s32 %v9356_v0, 16  ;;  %v2847_v20 = vsub.f32 %v9409_v41, %v12690_v45  ;;  %v12684_v48 = vand.u32 4294901760, %v9432_v52  ;;  %v2973_v29 = vsub.f32 %v9418_v26, %v12688_v47 }
 0x202   : > { %v2980_v33 = vsub.f32 %v9423_v25, %v12687_v12  ;;  %v12683_v36 = vand.u32 4294901760, %v9440_v56  ;;  %v2960_v5 = vand.u32 4294901760, %v2959_v58  ;;  %v2967_v13 = vand.u32 4294901760, %v2966_v61 }
 0x203   : > { %v9359_v18 = vcvt.s32.f32 %v2566_v22  ;;  %v2848_v50 = vand.u32 4294901760, %v2847_v20  ;;  %v2861_v51 = vsub.f32 %v9432_v52, %v12684_v48  ;;  %v2855_v15 = vand.u32 4294901760, %v2854_v55 }
 0x204   : > { %v2974_v21 = vand.u32 4294901760, %v2973_v29  ;;  %v2981_v27 = vand.u32 4294901760, %v2980_v33  ;;  %v2868_v8 = vsub.f32 %v9440_v56, %v12683_v36  ;;  %v7762_v30 = vpack.c.bf16 %v2967_v13, %v2960_v5 }
 0x205   : > { %2569 = vmin.xlane.f32.xlu0 %v9359_v18  ;;  %v2862_v49 = vand.u32 4294901760, %v2861_v51  ;;  %v2792_v22 = vand.u32 4294901760, %v9465_v57  ;;  %v2795_v11 = vand.u32 4294901760, %v9470_v37  ;;  %v7764_v58 = vpack.c.bf16 %v2855_v15, %v2848_v50 }
 0x206   : > { %v7766_v61 = vpack.c.bf16 %v2981_v27, %v2974_v21  ;;  %v2869_v20 = vand.u32 4294901760, %v2868_v8  ;;  %v9500_v55 = vpack.c.bf16 %v2783_v34, %v2780_v17  ;;  %7763 = vmatprep.subr.bf16.mxu1 %v7762_v30  ;;  %v2744_v5 = vand.u32 4294901760, %v9481_v10  ;;  %v9517_v17 = vld [vmem:[%s12672_s3 + $0x30] sm:$0xff] }
 0x207   : > { %v9505_v29 = vsub.f32 %v9465_v57, %v2792_v22  ;;  %v9510_v33 = vsub.f32 %v9470_v37, %v2795_v11  ;;  %v2747_v13 = vand.u32 4294901760, %v9486_v31  ;;  %7765 = vmatpush3.bf16.msra.mxu1 %v7764_v58  ;;  %v9522_v50 = vpack.c.bf16 %v2735_v23, %v2732_v19  ;;  %v9541_v19 = vld [vmem:[%s12672_s3 + $0x38] sm:$0xff] }
 0x208   : > { %v7768_v34 = vpack.c.bf16 %v2869_v20, %v2862_v49  ;;  %7731 = vmatprep.subr.bf16.mxu0 %v9500_v55  ;;  %v2798_v51 = vand.u32 4294901760, %v9493_v16  ;;  %v2801_v15 = vand.u32 4294901760, %v9498_v32  ;;  %7767 = vmatprep.subr.bf16.mxu1 %v7766_v61  ;;  %v9531_v8 = vsub.f32 %v9481_v10, %v2744_v5 }
 0x209   : > { %v12685_v21 = vand.u32 4294901760, %v9505_v29  ;;  %v12686_v27 = vand.u32 4294901760, %v9510_v33  ;;  %v9536_v4 = vsub.f32 %v9486_v31, %v2747_v13  ;;  %7733 = vmatpush3.bf16.msra.mxu0 %v9522_v50  ;;  %v9558_v49 = vpack.c.bf16 %v2789_v6, %v2786_v59 }
 0x20a   : > { %v9547_v23 = vsub.f32 %v9493_v16, %v2798_v51  ;;  %v9552_v30 = vsub.f32 %v9498_v32, %v2801_v15  ;;  %v12700_v58 = vand.u32 4294901760, %v9517_v17  ;;  %v12693_v36 = vand.u32 4294901760, %v9531_v8 }
 0x20b   : > { %v2987_v61 = vsub.f32 %v9505_v29, %v12685_v21  ;;  %v2994_v20 = vsub.f32 %v9510_v33, %v12686_v27  ;;  %v12692_v48 = vand.u32 4294901760, %v9536_v4  ;;  %7769 = vmatpush3.bf16.msra.mxu1 %v7768_v34  ;;  %7735 = vmatprep.subr.bf16.mxu0 %v9558_v49  ;;  %v12699_v59 = vand.u32 4294901760, %v9541_v19 }
 0x20c   : > { %v12691_v24 = vand.u32 4294901760, %v9547_v23  ;;  %v12694_v54 = vand.u32 4294901760, %v9552_v30  ;;  %v9576_v6 = vsub.f32 %v9517_v17, %v12700_v58  ;;  %v2875_v12 = vsub.f32 %v9531_v8, %v12693_v36 }
 0x20d   : > { %v2988_v21 = vand.u32 4294901760, %v2987_v61  ;;  %v2995_v27 = vand.u32 4294901760, %v2994_v20  ;;  %v2882_v34 = vsub.f32 %v9536_v4, %v12692_v48  ;;  %v9594_v61 = vsub.f32 %v9541_v19, %v12699_v59  ;;  %v9599_v20 = vld [vmem:[%s12672_s3 + $0xc0] sm:$0xff] }
 0x20e   : > { %v3001_v47 = vsub.f32 %v9547_v23, %v12691_v24  ;;  %v3008_v53 = vsub.f32 %v9552_v30, %v12694_v54  ;;  %v12702_v45 = vand.u32 4294901760, %v9576_v6  ;;  %v9604_v24 = vld [vmem:[%s12672_s3 + $0xc8] sm:$0xff]  ;;  %v2876_v36 = vand.u32 4294901760, %v2875_v12 }
 0x20f   : > { %v7770_v48 = vpack.c.bf16 %v2995_v27, %v2988_v21  ;;  %v2883_v54 = vand.u32 4294901760, %v2882_v34  ;;  %v9610_v39 = vpack.c.bf16 %v2741_v7, %v2738_v63  ;;  %v12701_v12 = vand.u32 4294901760, %v9594_v61 }
 0x210   : > { %v3002_v9 = vand.u32 4294901760, %v3001_v47  ;;  %v3009_v59 = vand.u32 4294901760, %v3008_v53  ;;  %v2889_v58 = vsub.f32 %v9576_v6, %v12702_v45  ;;  %v12713_v63 = vand.u32 4294901760, %v9599_v20  ;;  %v9638_v47 = vld [vmem:[%s12672_s3 + $0xd0] sm:$0xff] }
 0x211   : > { %7771 = vmatprep.subr.bf16.mxu1 %v7770_v48  ;;  %v7772_v28 = vpack.c.bf16 %v2883_v54, %v2876_v36  ;;  %7737 = vmatpush3.bf16.msra.mxu0 %v9610_v39  ;;  %v12710_v7 = vand.u32 4294901760, %v9604_v24  ;;  %v9633_v53 = vpack.c.bf16 %v2795_v11, %v2792_v22  ;;  %v9643_v48 = vld [vmem:[%s12672_s3 + $0xd8] sm:$0xff]  ;;  %v2896_v57 = vsub.f32 %v9594_v61, %v12701_v12 }
 0x212   : > { %v7774_v36 = vpack.c.bf16 %v3009_v59, %v3002_v9  ;;  %v2890_v21 = vand.u32 4294901760, %v2889_v58  ;;  %v12707_v37 = vand.u32 4294901760, %v9615_v38  ;;  %v9652_v22 = vsub.f32 %v9599_v20, %v12713_v63 }
 0x213   : > { %7773 = vmatpush3.bf16.msra.mxu1 %v7772_v28  ;;  %v9657_v11 = vsub.f32 %v9604_v24, %v12710_v7  ;;  %7739 = vmatprep.subr.bf16.mxu0 %v9633_v53  ;;  %v12706_v9 = vand.u32 4294901760, %v9624_v35  ;;  %v9665_v27 = vpack.c.bf16 %v2747_v13, %v2744_v5  ;;  %v2897_v58 = vand.u32 4294901760, %v2896_v57  ;;  %v9677_v28 = vld [vmem:[%s12672_s3 + $0x50] sm:$0xff] }
 0x214   : > { %7775 = vmatprep.subr.bf16.mxu1 %v7774_v36  ;;  %v9670_v54 = vsub.f32 %v9615_v38, %v12707_v37  ;;  %v12704_v59 = vand.u32 4294901760, %v9638_v47  ;;  %v12703_v34 = vand.u32 4294901760, %v9643_v48  ;;  %v12705_v10 = vand.u32 4294901760, %v9652_v22  ;;  %v9696_v36 = vld [vmem:[%s12672_s3 + $0x58] sm:$0xff] }
 0x215   : > { %v12708_v31 = vand.u32 4294901760, %v9657_v11  ;;  %v9684_v5 = vsub.f32 %v9624_v35, %v12706_v9  ;;  %7741 = vmatpush3.bf16.msra.mxu0 %v9665_v27  ;;  %v9691_v13 = vpack.c.bf16 %v2801_v15, %v2798_v51  ;;  %v7776_v57 = vpack.c.bf16 %v2897_v58, %v2890_v21 }
 0x216   : > { %13019 = vst [vmem:[#allocation14_spill] sm:$0xff] %v9670_v54  ;;  %v12709_v12 = vand.u32 4294901760, %v9670_v54  ;;  %v9702_v45 = vsub.f32 %v9638_v47, %v12704_v59  ;;  %v9707_v16 = vsub.f32 %v9643_v48, %v12703_v34  ;;  %v3015_v32 = vsub.f32 %v9652_v22, %v12705_v10 }
 0x217   : > { %13020 = vst [vmem:[#allocation15_spill] sm:$0xff] %v9684_v5  ;;  %v3022_v51 = vsub.f32 %v9657_v11, %v12708_v31  ;;  %v12711_v15 = vand.u32 4294901760, %v9684_v5  ;;  %7743 = vmatprep.subr.bf16.mxu0 %v9691_v13  ;;  %v12712_v21 = vand.u32 4294901760, %v9677_v28  ;;  %7777 = vmatpush3.bf16.msra.mxu1 %v7776_v57  ;;  %v12719_v10 = vand.u32 4294901760, %v9696_v36 }
 0x218   : > { %13021 = vst [vmem:[#allocation16_spill] sm:$0xff] %v9702_v45  ;;  %13022 = vst [vmem:[#allocation17_spill] sm:$0xff] %v9707_v16  ;;  %v2903_v58 = vsub.f32 %v9670_v54, %v12709_v12  ;;  %v12715_v34 = vand.u32 4294901760, %v9702_v45  ;;  %v12718_v59 = vand.u32 4294901760, %v9707_v16  ;;  %v3016_v9 = vand.u32 4294901760, %v3015_v32  ;;  %v9735_v12 = vld [vmem:[%s12672_s3 + $0xe0] sm:$0xff] }
 0x219   : > { %v3023_v37 = vand.u32 4294901760, %v3022_v51  ;;  %v2910_v31 = vsub.f32 %v9684_v5, %v12711_v15  ;;  %v9730_v57 = vsub.f32 %v9677_v28, %v12712_v21  ;;  %v9746_v15 = vsub.f32 %v9696_v36, %v12719_v10  ;;  %v9751_v21 = vld [vmem:[%s12672_s3 + $0xe8] sm:$0xff] }
 0x21a   : > { %v2904_v7 = vand.u32 4294901760, %v2903_v58  ;;  %v3029_v32 = vsub.f32 %v9702_v45, %v12715_v34  ;;  %v3036_v51 = vsub.f32 %v9707_v16, %v12718_v59  ;;  %v13025_v34 = vand.u32 4294901760, %v9517_v17  ;;  %v9763_v59 = vld [vmem:[%s12672_s3 + $0x60] sm:$0xff] }
 0x21b   : > { %13023 = vst [vmem:[#allocation18_spill] sm:$0xff] %v9730_v57  ;;  %13024 = vst [vmem:[#allocation19_spill] sm:$0xff] %v9746_v15  ;;  %v7778_v63 = vpack.c.bf16 %v3023_v37, %v3016_v9  ;;  %v2911_v58 = vand.u32 4294901760, %v2910_v31  ;;  %v12722_v62 = vand.u32 4294901760, %v9730_v57  ;;  %v13026_v14 = vand.u32 4294901760, %v9541_v19  ;;  %v9770_v9 = vld [vmem:[%s12672_s3 + $0x68] sm:$0xff] }
 0x21c   : > { %v3030_v10 = vand.u32 4294901760, %v3029_v32  ;;  %v3037_v60 = vand.u32 4294901760, %v3036_v51  ;;  %v12723_v46 = vand.u32 4294901760, %v9746_v15  ;;  %v12728_v37 = vand.u32 4294901760, %v9735_v12 }
 0x21d   : > { %v9758_v42 = vpack.c.bf16 %v13026_v14, %v13025_v34  ;;  %7779 = vmatprep.subr.bf16.mxu1 %v7778_v63  ;;  %v7780_v17 = vpack.c.bf16 %v2911_v58, %v2904_v7  ;;  %v2917_v14 = vsub.f32 %v9730_v57, %v12722_v62  ;;  %v12724_v19 = vand.u32 4294901760, %v9751_v21 }
 0x21e   : > { %v13027_v34 = vand.u32 4294901760, %v9599_v20  ;;  %v13028_v31 = vand.u32 4294901760, %v9604_v24  ;;  %v7782_v51 = vpack.c.bf16 %v3037_v60, %v3030_v10  ;;  %v2924_v63 = vsub.f32 %v9746_v15, %v12723_v46 }
 0x21f   : > { %7745 = vmatpush3.bf16.msra.mxu0 %v9758_v42  ;;  %v9789_v7 = vsub.f32 %v9735_v12, %v12728_v37  ;;  %v12726_v58 = vand.u32 4294901760, %v9763_v59  ;;  %7781 = vmatpush3.bf16.msra.mxu1 %v7780_v17  ;;  %v2918_v62 = vand.u32 4294901760, %v2917_v14  ;;  %v9795_v24 = vsub.f32 %v9751_v21, %v12724_v19 }
 0x220   : > { %v9781_v32 = vpack.c.bf16 %v13028_v31, %v13027_v34  ;;  %v12725_v60 = vand.u32 4294901760, %v9770_v9  ;;  %v13031_v20 = vand.u32 4294901760, %v9615_v38  ;;  %v13032_v10 = vand.u32 4294901760, %v9624_v35  ;;  %7783 = vmatprep.subr.bf16.mxu1 %v7782_v51 }
 0x221   : > { %13029 = vst [vmem:[#allocation20_spill] sm:$0xff] %v9789_v7  ;;  %13030 = vst [vmem:[#allocation21_spill] sm:$0xff] %v9795_v24  ;;  %v2925_v31 = vand.u32 4294901760, %v2924_v63  ;;  %v12727_v17 = vand.u32 4294901760, %v9789_v7  ;;  %v9809_v14 = vsub.f32 %v9763_v59, %v12726_v58  ;;  %v12730_v46 = vand.u32 4294901760, %v9795_v24 }
 0x222   : > { %7747 = vmatprep.subr.bf16.mxu0 %v9781_v32  ;;  %v9803_v34 = vpack.c.bf16 %v13032_v10, %v13031_v20  ;;  %v9815_v19 = vsub.f32 %v9770_v9, %v12725_v60  ;;  %v13035_v16 = vand.u32 4294901760, %v9638_v47  ;;  %v13037_v5 = vand.u32 4294901760, %v9677_v28 }
 0x223   : > { %13033 = vst [vmem:[#allocation22_spill] sm:$0xff] %v9809_v14  ;;  %v7784_v38 = vpack.c.bf16 %v2925_v31, %v2918_v62  ;;  %v3043_v35 = vsub.f32 %v9789_v7, %v12727_v17  ;;  %v12734_v51 = vand.u32 4294901760, %v9809_v14  ;;  %v3050_v63 = vsub.f32 %v9795_v24, %v12730_v46 }
 0x224   : > { %13034 = vst [vmem:[#allocation23_spill] sm:$0xff] %v9815_v19  ;;  %7749 = vmatpush3.bf16.msra.mxu0 %v9803_v34  ;;  %v12733_v20 = vand.u32 4294901760, %v9815_v19  ;;  %v2565_v46 = vand.u32 65535, %v9356_v0  ;;  %v13040_v47 = vand.u32 4294901760, %v9735_v12  ;;  %v13043_v28 = vand.u32 4294901760, %v9763_v59 }
 0x225   : > { %7785 = vmatpush3.bf16.msra.mxu1 %v7784_v38  ;;  %v3044_v10 = vand.u32 4294901760, %v3043_v35  ;;  %v2931_v60 = vsub.f32 %v9809_v14, %v12734_v51  ;;  %v3051_v58 = vand.u32 4294901760, %v3050_v63  ;;  %v2633_v63 = vld [vmem:[%s12672_s3 + $0xf0] sm:$0xff]  ;;  %v7794_v12 = vpack.c.bf16 %v9404_v43, %v9402_v3 }
 0x226   : > { %v2938_v62 = vsub.f32 %v9815_v19, %v12733_v20  ;;  %v2567_v38 = vcvt.s32.f32 %v2565_v46  ;;  %v2618_v46 = vld [vmem:[%s12672_s3 + $0x78] sm:$0xff]  ;;  %vm6194_vm10 = vcmask 64512  }
 0x227   : > { %v2932_v31 = vand.u32 4294901760, %v2931_v60  ;;  %v7786_v17 = vpack.c.bf16 %v3051_v58, %v3044_v10  ;;  %v2634_v58 = vld [vmem:[%s12672_s3 + $0xf8] sm:$0xff]  ;;  %v2822_v60 = vand.u32 4294901760, %v2633_v63 }
 0x228   : > { %v2939_v37 = vand.u32 4294901760, %v2938_v62  ;;  %v13068_v59 = vld [vmem:[#allocation20_spill] sm:$0xff] }
 0x229   : > { %7787 = vmatprep.subr.bf16.mxu1 %v7786_v17  ;;  %v2825_v17 = vand.u32 4294901760, %v2634_v58 }
 0x22a   : > { %v7788_v44 = vpack.c.bf16 %v2939_v37, %v2932_v31  ;;  %v9846_v37 = vsub.f32 %v2633_v63, %v2822_v60 }
 0x22b   : > { %v9848_v10 = vsub.f32 %v2634_v58, %v2825_v17 }
 0x22c   : > { %7789 = vmatpush3.bf16.msra.mxu1 %v7788_v44  ;;  %v2617_v44 = vld [vmem:[%s12672_s3 + $0x70] sm:$0xff] }
 0x22d   : > { %v2774_v0 = vand.u32 4294901760, %v2617_v44 }
 0x22f   : > { %v9850_v62 = vsub.f32 %v2617_v44, %v2774_v0 }
 0x231   : > { %v12753_v20 = vand.u32 4294901760, %v9850_v62 }
 0x233   : > { %v2945_v58 = vsub.f32 %v9850_v62, %v12753_v20  ;;  %v13038_v20 = vand.u32 4294901760, %v9696_v36 }
 0x235   : > { %v2946_v7 = vand.u32 4294901760, %v2945_v58  ;;  %v9880_v54 = vpack.c.bf16 %v13038_v20, %v13037_v5  ;;  %v13044_v5 = vand.u32 4294901760, %v9770_v9 }
 0x237   : > { %13039 = vst [vmem:[#allocation24_spill] sm:$0xff] %v9880_v54  ;;  %v9896_v36 = vpack.c.bf16 %v13044_v5, %v13043_v28  ;;  %v7798_v28 = vpack.c.bf16 %v9423_v25, %v9418_v26  ;;  %v7800_v5 = vpack.c.bf16 %v9440_v56, %v9432_v52 }
 0x239   : > { %13045 = vst [vmem:[#allocation26_spill] sm:$0xff] %v9896_v36 }
 0x292   : > { %v2570_v24 = vpop.xlane.xlu0 %2569 }
 0x293   : > { %vm2571_vm1 = vcmp.eq.f32.partialorder %v9359_v18, %v2570_v24  ;;  %v2777_v18 = vand.u32 4294901760, %v2618_v46  ;;  %v2576_v9 = vcvt.f32.s32 %v2570_v24  ;;  %v13055_v24 = vmov 0.0  }
 0x294   : > { %v2572_v35 = vsel %vm2571_vm1, %v2567_v38, inf  ;;  %v12747_v38 = vand.u32 4294901760, %v9846_v37 }
 0x295   : > { %2573 = vmin.xlane.f32.xlu1 %v2572_v35  ;;  %v9852_v31 = vsub.f32 %v2618_v46, %v2777_v18  ;;  %v12750_v35 = vand.u32 4294901760, %v9848_v10 }
 0x296   : > { %v3057_v19 = vsub.f32 %v9846_v37, %v12747_v38  ;;  %v13036_v38 = vand.u32 4294901760, %v9643_v48  ;;  %v13041_v48 = vand.u32 4294901760, %v9751_v21  ;;  %v10046_v21 = vld [vmem:[%s12672_s3 + $0x198] sm:$0xff] }
 0x297   : > { %v12756_v51 = vand.u32 4294901760, %v9852_v31  ;;  %v3064_v63 = vsub.f32 %v9848_v10, %v12750_v35 }
 0x298   : > { %v3058_v46 = vand.u32 4294901760, %v3057_v19  ;;  %v9874_v45 = vpack.c.bf16 %v13036_v38, %v13035_v16  ;;  %v9889_v16 = vpack.c.bf16 %v13041_v48, %v13040_v47  ;;  %v7796_v48 = vpack.c.bf16 %v9413_v2, %v9409_v41 }
 0x299   : > { %v2952_v44 = vsub.f32 %v9852_v31, %v12756_v51  ;;  %v3065_v14 = vand.u32 4294901760, %v3064_v63 }
 0x29a   : > { %7751 = vmatprep.subr.bf16.mxu0 %v9874_v45  ;;  %13042 = vst [vmem:[#allocation25_spill] sm:$0xff] %v9889_v16 }
 0x29b   : > { %v2953_v15 = vand.u32 4294901760, %v2952_v44  ;;  %v7790_v57 = vpack.c.bf16 %v3065_v14, %v3058_v46  ;;  %7753 = vmatpush3.bf16.msra.mxu0 %v9880_v54 }
 0x29c   : > { %7755 = vmatprep.subr.bf16.mxu0 %v9889_v16 }
 0x29d   : > { %v7792_v35 = vpack.c.bf16 %v2953_v15, %v2946_v7  ;;  %7791 = vmatprep.subr.bf16.mxu1 %v7790_v57  ;;  %v9899_v15 = vpack.c.bf16 %v2825_v17, %v2822_v60  ;;  %v9902_v57 = vpack.c.bf16 %v2777_v18, %v2774_v0  ;;  %v2577_v7 = vshll.u32 %v2576_v9, 16 }
 0x29e   : > { %v13049_v60 = vmov 0  ;;  %v13052_v17 = vmov 0  ;;  %v12757_v0 = vmov 1.0   ;;  %v7804_v9 = vpack.c.bf16 %v9536_v4, %v9531_v8 }
 0x29f   : > { %7793 = vmatpush3.bf16.msra.mxu1 %v7792_v35  ;;  %7757 = vmatpush3.bf16.msra.mxu0 %v9896_v36  ;;  %13046 = vst [vmem:[#allocation27_spill] sm:$0xff] %v9899_v15  ;;  %13047 = vst [vmem:[#allocation28_spill] sm:$0xff] %v9902_v57 }
 0x2a0   : > { %7827 = vmatprep.subr.bf16.mxu1 %v9500_v55  ;;  %7759 = vmatprep.subr.bf16.mxu0 %v9899_v15 }
 0x2a3   : > { %7761 = vmatpush3.bf16.msra.mxu0 %v9902_v57 }
 0x2a4   : > { %7795 = vmatprep.subr.bf16.mxu0 %v7794_v12  ;;  %v7802_v12 = vpack.c.bf16 %v9510_v33, %v9505_v29 }
 0x322   : > { %v2574_v19 = vpop.xlane.xlu1 %2573 }
 0x323   : > { %v2575_v14 = vcvt.f32.s32 %v2574_v19  ;;  %v7806_v19 = vpack.c.bf16 %v9552_v30, %v9547_v23 }
 0x325   : > { %v9911_v20 = vadd.s32 %v2577_v7, %v2575_v14  ;;  %v7808_v7 = vpack.c.bf16 %v9594_v61, %v9576_v6  ;;  %v7810_v14 = vpack.c.bf16 %v9657_v11, %v9652_v22 }
 0x327   : > { %13048 = vst [vmem:[#allocation29_spill] sm:$0xff] %v9911_v20  ;;  %vm9915_vm2 = vcmp.eq.s32.totalorder %v9328_v1, %v9911_v20  ;;  %vm9921_vm3 = vcmp.eq.s32.totalorder %v9325_v40, %v9911_v20 }
 0x328   : > { %v13050_v60 = vsel %vm9915_vm2, 4294967295, %v13049_v60  ;;  %v13053_v17 = vsel %vm9921_vm3, 4294967295, %v13052_v17  ;;  %6654 = vmatprep.mubr.msk.f32.mxu1 %vm9915_vm2, %v12757_v0  ;;  %v6646_v18 = vsel %vm9921_vm3, 1.0, %v13055_v24  ;;  %v6647_v1 = vsel %vm9915_vm2, 1.0, %v13055_v24 }
 0x329   : > { %13051 = vst [vmem:[#allocation30_spill] sm:$0xff] %v13050_v60  ;;  %13054 = vst [vmem:[#allocation31_spill] sm:$0xff] %v13053_v17  ;;  %v9934_v38 = vsub.f32 %v6646_v18, %v6646_v18  ;;  %6655 = vmatmul.mubr.msk.f32.vlgmr.msra.gmra.mrb[4].mxu1 %vm9921_vm3, %v12757_v0  ;;  %v2828_v40 = vsub.f32 %v6647_v1, %v6647_v1  ;;  %v9973_v18 = vld [vmem:[%s12672_s3 + $0x1f0] sm:$0xff]  ;;  %v9978_v1 = vld [vmem:[%s12672_s3 + $0x1f8] sm:$0xff] }
 0x32a   : > { %7829 = vmatpush3.bf16.msra.mxu1 %v9522_v50  ;;  %13056 = vst [vmem:[#allocation32_spill] sm:$0xff] %v9973_v18  ;;  %13057 = vst [vmem:[#allocation33_spill] sm:$0xff] %v9978_v1  ;;  %v13069_v0 = vld [vmem:[#allocation21_spill] sm:$0xff]  ;;  %v13073_v24 = vand.u32 4294901760, %v9978_v1  ;;  %v10051_v17 = vld [vmem:[%s12672_s3 + $0x110] sm:$0xff] }
 0x32b   : > { %7831 = vmatprep.subr.bf16.mxu1 %v9558_v49  ;;  %v2829_v35 = vand.u32 4294901760, %v2828_v40  ;;  %v12759_v63 = vand.u32 4294901760, %v9934_v38  ;;  %13075 = vst [vmem:[#allocation21_spill] sm:$0xff] %v10051_v17 }
 0x32d   : > { %3312 = vmatprep.mubr.f32.mxu1 %v2829_v35  ;;  %v2830_v58 = vsub.f32 %v2828_v40, %v2829_v35  ;;  %v2836_v44 = vsub.f32 %v9934_v38, %v12759_v63  ;;  %v13059_v35 = vld [vmem:[#allocation15_spill] sm:$0xff]  ;;  %v7818_v63 = vpack.c.bf16 %v13069_v0, %v13068_v59 }
 0x32e   : > { %7833 = vmatpush3.bf16.msra.mxu1 %v9610_v39 }
 0x32f   : > { %7835 = vmatprep.subr.bf16.mxu1 %v9633_v53  ;;  %v2831_v46 = vand.u32 4294901760, %v2830_v58  ;;  %v2837_v47 = vand.u32 4294901760, %v2836_v44  ;;  %v13060_v44 = vld [vmem:[#allocation16_spill] sm:$0xff] }
 0x331   : > { %2832 = vmatprep.mubr.f32.mxu0 %v2831_v46  ;;  %v13061_v46 = vld [vmem:[#allocation17_spill] sm:$0xff] }
 0x332   : > { %7837 = vmatpush3.bf16.msra.mxu1 %v9665_v27  ;;  %2838 = vmatmul.mubr.f32.vlgmr.msra.gmra.mrb[4].mxu0 %v2837_v47  ;;  %v7814_v47 = vpack.c.bf16 %v13061_v46, %v13060_v44 }
 0x333   : > { %7797 = vmatpush3.bf16.msra.mxu0 %v7796_v48  ;;  %3205 = vmatprep.mubr.f32.mxu0 %v2828_v40  ;;  %v13058_v40 = vld [vmem:[#allocation14_spill] sm:$0xff] }
 0x334   : > { %7839 = vmatprep.subr.bf16.mxu1 %v9691_v13  ;;  %7799 = vmatprep.subr.bf16.mxu0 %v7798_v28  ;;  %v7812_v58 = vpack.c.bf16 %v13059_v35, %v13058_v40  ;;  %v9988_v48 = vld [vmem:[%s12672_s3 + $0x180] sm:$0xff]  ;;  %v9993_v28 = vld [vmem:[%s12672_s3 + $0x188] sm:$0xff] }
 0x335   : > { %13062 = vst [vmem:[#allocation14_spill] sm:$0xff] %v9988_v48  ;;  %13063 = vst [vmem:[#allocation15_spill] sm:$0xff] %v9993_v28 }
 0x336   : > { %7841 = vmatpush3.bf16.msra.mxu1 %v9758_v42 }
 0x337   : > { %7801 = vmatpush3.bf16.msra.mxu0 %v7800_v5  ;;  %7843 = vmatprep.subr.bf16.mxu1 %v9781_v32  ;;  %v10018_v5 = vld [vmem:[%s12672_s3 + $0x100] sm:$0xff] }
 0x338   : > { %7803 = vmatprep.subr.bf16.mxu0 %v7802_v12  ;;  %v13071_v12 = vand.u32 4294901760, %v9973_v18 }
 0x33a   : > { %7845 = vmatpush3.bf16.msra.mxu1 %v9803_v34 }
 0x33b   : > { %7805 = vmatpush3.bf16.msra.mxu0 %v7804_v9  ;;  %7847 = vmatprep.subr.bf16.mxu1 %v9874_v45  ;;  %v10000_v9 = vld [vmem:[%s12672_s3 + $0x170] sm:$0xff] }
 0x33c   : > { %7807 = vmatprep.subr.bf16.mxu0 %v7806_v19  ;;  %13064 = vst [vmem:[#allocation16_spill] sm:$0xff] %v10000_v9  ;;  %v10005_v19 = vld [vmem:[%s12672_s3 + $0x178] sm:$0xff] }
 0x33d   : > { %13065 = vst [vmem:[#allocation17_spill] sm:$0xff] %v10005_v19 }
 0x33e   : > { %7849 = vmatpush3.bf16.msra.mxu1 %v9880_v54  ;;  %v10066_v54 = vld [vmem:[%s12672_s3 + $0x118] sm:$0xff] }
 0x33f   : > { %7809 = vmatpush3.bf16.msra.mxu0 %v7808_v7  ;;  %7851 = vmatprep.subr.bf16.mxu1 %v9889_v16  ;;  %v13066_v7 = vld [vmem:[#allocation18_spill] sm:$0xff]  ;;  %13079 = vst [vmem:[#allocation34_spill] sm:$0xff] %v10066_v54  ;;  %v13083_v16 = vand.u32 4294901760, %v10005_v19 }
 0x340   : > { %7811 = vmatprep.subr.bf16.mxu0 %v7810_v14  ;;  %v13067_v14 = vld [vmem:[#allocation19_spill] sm:$0xff] }
 0x341   : > { %v7816_v51 = vpack.c.bf16 %v13067_v14, %v13066_v7 }
 0x342   : > { %7853 = vmatpush3.bf16.msra.mxu1 %v9896_v36  ;;  %v10040_v36 = vsub.f32 %v9978_v1, %v13073_v24  ;;  %v13078_v24 = vand.u32 4294901760, %v9988_v48 }
 0x343   : > { %7813 = vmatpush3.bf16.msra.mxu0 %v7812_v58  ;;  %7855 = vmatprep.subr.bf16.mxu1 %v9899_v15  ;;  %v10023_v58 = vld [vmem:[%s12672_s3 + $0x108] sm:$0xff]  ;;  %v10035_v15 = vsub.f32 %v9973_v18, %v13071_v12  ;;  %v13076_v12 = vld [vmem:[#allocation22_spill] sm:$0xff] }
 0x344   : > { %7815 = vmatprep.subr.bf16.mxu0 %v7814_v47  ;;  %13070 = vst [vmem:[#allocation18_spill] sm:$0xff] %v10023_v58  ;;  %v10030_v47 = vld [vmem:[%s12672_s3 + $0x190] sm:$0xff]  ;;  %13074 = vst [vmem:[#allocation20_spill] sm:$0xff] %v10040_v36  ;;  %v13077_v18 = vld [vmem:[#allocation23_spill] sm:$0xff]  ;;  %v10059_v1 = vsub.f32 %v9988_v48, %v13078_v24  ;;  %v13081_v24 = vand.u32 4294901760, %v10000_v9 }
 0x345   : > { %13072 = vst [vmem:[#allocation19_spill] sm:$0xff] %v10035_v15  ;;  %v7820_v20 = vpack.c.bf16 %v13077_v18, %v13076_v12  ;;  %v13085_v12 = vand.u32 4294901760, %v9934_v38 }
 0x346   : > { %7857 = vmatpush3.bf16.msra.mxu1 %v9902_v57  ;;  %v10077_v48 = vsub.f32 %v10000_v9, %v13081_v24  ;;  %v10082_v57 = vsub.f32 %v10005_v19, %v13083_v16  ;;  %v13086_v24 = vmov 1.0   ;;  %v13087_v16 = vand.u32 4294901760, %v9402_v3  ;;  %v10113_v3 = vld [vmem:[%s12672_s3 + $0x1a0] sm:$0xff] }
 0x347   : > { %7817 = vmatpush3.bf16.msra.mxu0 %v7816_v51  ;;  %7891 = vmatprep.subr.bf16.mxu1 %v9500_v55  ;;  %v13080_v55 = vand.u32 4294901760, %v9993_v28  ;;  %v13088_v19 = vand.u32 4294901760, %v9404_v43  ;;  %v10118_v43 = vld [vmem:[%s12672_s3 + $0x1a8] sm:$0xff] }
 0x348   : > { %7819 = vmatprep.subr.bf16.mxu0 %v7818_v63  ;;  %13082 = vst [vmem:[#allocation35_spill] sm:$0xff] %v10077_v48  ;;  %13084 = vst [vmem:[#allocation36_spill] sm:$0xff] %v10082_v57 }
 0x349   : > { %v10071_v51 = vsub.f32 %v9993_v28, %v13080_v55  ;;  %3316 = vmatmul.mubr.f32.vlgmr.msra.gmra.mrb[6].mxu1 %v13085_v12  ;;  %v12779_v28 = vand.u32 4294901760, %v10035_v15  ;;  %v7858_v9 = vpack.c.bf16 %v13088_v19, %v13087_v16  ;;  %v13089_v55 = vand.u32 4294901760, %v10018_v5 }
 0x34a   : > { %7893 = vmatpush3.bf16.msra.mxu1 %v9522_v50  ;;  %6658 = vmatprep.mubr.msk.f32.mxu1 %vm9915_vm2, %v13086_v24  ;;  %v13090_v50 = vand.u32 4294901760, %v10023_v58  ;;  %v13094_v19 = vpack.c.bf16 %v9848_v10, %v9846_v37  ;;  %v13095_v16 = vand.u32 4294901760, %v10030_v47  ;;  %v13108_v15 = vand.u32 4294901760, %v9413_v2 }
 0x34b   : > { %7821 = vmatpush3.bf16.msra.mxu0 %v7820_v20  ;;  %7895 = vmatprep.subr.bf16.mxu1 %v9558_v49  ;;  %v10103_v63 = vsub.f32 %v10018_v5, %v13089_v55  ;;  %v13092_v49 = vand.u32 4294901760, %v10040_v36  ;;  %v13112_v2 = vand.u32 4294901760, %v9440_v56  ;;  %v13167_v60 = vld [vmem:[#allocation18_spill] sm:$0xff] }
 0x34c   : > { %v10108_v18 = vsub.f32 %v10023_v58, %v13090_v50  ;;  %7823 = vmatprep.subr.bf16.mxu0 %v13094_v19  ;;  %v10133_v50 = vsub.f32 %v10030_v47, %v13095_v16  ;;  %v13099_v19 = vand.u32 4294901760, %v10051_v17  ;;  %v13101_v16 = vand.u32 4294901760, %v10066_v54 }
 0x34d   : > { %v10124_v20 = vpack.c.bf16 %v13092_v49, %v12779_v28  ;;  %v13097_v49 = vand.u32 4294901760, %v10046_v21 }
 0x34e   : > { %13091 = vst [vmem:[#allocation37_spill] sm:$0xff] %v10108_v18  ;;  %13096 = vst [vmem:[#allocation39_spill] sm:$0xff] %v10133_v50  ;;  %v10146_v55 = vsub.f32 %v10051_v17, %v13099_v19  ;;  %7897 = vmatpush3.bf16.msra.mxu1 %v9610_v39  ;;  %v10152_v12 = vsub.f32 %v10066_v54, %v13101_v16  ;;  %v13104_v19 = vand.u32 4294901760, %v10082_v57  ;;  %v13107_v16 = vand.u32 4294901760, %v9409_v41 }
 0x34f   : > { %13093 = vst [vmem:[#allocation38_spill] sm:$0xff] %v10124_v20  ;;  %v10141_v28 = vsub.f32 %v10046_v21, %v13097_v49  ;;  %v10159_v49 = vld [vmem:[%s12672_s3 + $0x120] sm:$0xff]  ;;  %v13103_v20 = vand.u32 4294901760, %v10077_v48  ;;  %v13106_v39 = vpack.c.bf16 %v9852_v31, %v9850_v62  ;;  %7899 = vmatprep.subr.bf16.mxu1 %v9633_v53  ;;  %v13109_v54 = vand.u32 4294901760, %v9418_v26 }
 0x350   : > { %13100 = vst [vmem:[#allocation41_spill] sm:$0xff] %v10146_v55  ;;  %13102 = vst [vmem:[#allocation42_spill] sm:$0xff] %v10152_v12  ;;  %v7860_v58 = vpack.c.bf16 %v13108_v15, %v13107_v16  ;;  %v13110_v17 = vand.u32 4294901760, %v9423_v25  ;;  %v12788_v57 = vand.u32 4294901760, %v10103_v63  ;;  %v13111_v41 = vand.u32 4294901760, %v9432_v52 }
 0x351   : > { %13098 = vst [vmem:[#allocation40_spill] sm:$0xff] %v10141_v28  ;;  %v10165_v36 = vpack.c.bf16 %v13104_v19, %v13103_v20  ;;  %7825 = vmatpush3.bf16.msra.mxu0 %v13106_v39  ;;  %v12792_v20 = vand.u32 4294901760, %v10108_v18  ;;  %v10184_v19 = vld [vmem:[%s12672_s3 + $0x128] sm:$0xff]  ;;  %v13113_v26 = vand.u32 4294901760, %v9505_v29  ;;  %v13114_v25 = vand.u32 4294901760, %v9510_v33 }
 0x352   : > { %v7862_v48 = vpack.c.bf16 %v13110_v17, %v13109_v54  ;;  %7859 = vmatprep.subr.bf16.mxu0 %v7858_v9  ;;  %v7864_v53 = vpack.c.bf16 %v13112_v2, %v13111_v41  ;;  %v13115_v15 = vand.u32 4294901760, %v10059_v1  ;;  %v12791_v39 = vand.u32 4294901760, %v10133_v50  ;;  %7901 = vmatpush3.bf16.msra.mxu1 %v9665_v27 }
 0x353   : > { %13105 = vst [vmem:[#allocation43_spill] sm:$0xff] %v10165_v36  ;;  %v7866_v54 = vpack.c.bf16 %v13114_v25, %v13113_v26  ;;  %v13116_v16 = vand.u32 4294901760, %v10071_v51  ;;  %v12790_v52 = vand.u32 4294901760, %v10141_v28  ;;  %v12789_v56 = vand.u32 4294901760, %v10146_v55  ;;  %7903 = vmatprep.subr.bf16.mxu1 %v9691_v13  ;;  %v10246_v13 = vld [vmem:[%s12672_s3 + $0x1b0] sm:$0xff] }
 0x354   : > { %v3821_v17 = vsub.f32 %v10059_v1, %v13115_v15  ;;  %v12793_v41 = vand.u32 4294901760, %v10159_v49  ;;  %3208 = vmatmul.mubr.f32.vlgmr.msra.gmra.mrb[6].mxu0 %v9934_v38  ;;  %v13117_v33 = vand.u32 4294901760, %v10113_v3  ;;  %v13119_v26 = vand.u32 4294901760, %v10118_v43 }
 0x355   : > { %v3828_v9 = vsub.f32 %v10071_v51, %v13116_v16  ;;  %7861 = vmatpush3.bf16.msra.mxu0 %v7860_v58  ;;  %6656 = vmatprep.mubr.msk.f32.mxu0 %vm9915_vm2, %v13086_v24  ;;  %v13121_v27 = vand.u32 4294901760, %v9531_v8  ;;  %v13122_v38 = vand.u32 4294901760, %v9536_v4  ;;  %v13123_v58 = vand.u32 4294901760, %v9547_v23 }
 0x356   : > { %v10210_v2 = vsub.f32 %v10113_v3, %v13117_v33  ;;  %v10215_v25 = vsub.f32 %v10118_v43, %v13119_v26  ;;  %v3709_v33 = vsub.f32 %v10103_v63, %v12788_v57  ;;  %v3716_v26 = vsub.f32 %v10108_v18, %v12792_v20  ;;  %7863 = vmatprep.subr.bf16.mxu0 %v7862_v48 }
 0x357   : > { %v7868_v16 = vpack.c.bf16 %v13122_v38, %v13121_v27  ;;  %v13124_v15 = vand.u32 4294901760, %v9552_v30  ;;  %v13125_v8 = vand.u32 4294901760, %v9576_v6  ;;  %v13126_v4 = vand.u32 4294901760, %v9594_v61  ;;  %7905 = vmatpush3.bf16.msra.mxu1 %v9758_v42 }
 0x358   : > { %13118 = vst [vmem:[#allocation44_spill] sm:$0xff] %v10210_v2  ;;  %13120 = vst [vmem:[#allocation45_spill] sm:$0xff] %v10215_v25  ;;  %v3822_v38 = vand.u32 4294901760, %v3821_v17  ;;  %v3835_v57 = vsub.f32 %v10133_v50, %v12791_v39  ;;  %v3829_v48 = vand.u32 4294901760, %v3828_v9  ;;  %v3842_v23 = vsub.f32 %v10141_v28, %v12790_v52  ;;  %7907 = vmatprep.subr.bf16.mxu1 %v9781_v32 }
 0x359   : > { %v7870_v29 = vpack.c.bf16 %v13124_v15, %v13123_v58  ;;  %v7872_v27 = vpack.c.bf16 %v13126_v4, %v13125_v8  ;;  %v3723_v30 = vsub.f32 %v10146_v55, %v12789_v56  ;;  %v10257_v6 = vsub.f32 %v10159_v49, %v12793_v41  ;;  %7865 = vmatpush3.bf16.msra.mxu0 %v7864_v53 }
 0x35a   : > { %v13128_v61 = vand.u32 4294901760, %v10152_v12  ;;  %v12796_v9 = vand.u32 4294901760, %v10210_v2  ;;  %v13129_v58 = vand.u32 4294901760, %v10184_v19  ;;  %v13131_v4 = vand.u32 4294901760, %v9652_v22  ;;  %7867 = vmatprep.subr.bf16.mxu0 %v7866_v54 }
 0x35b   : > { %13127 = vst [vmem:[#allocation46_spill] sm:$0xff] %v10257_v6  ;;  %v13132_v42 = vand.u32 4294901760, %v9657_v11  ;;  %v3710_v52 = vand.u32 4294901760, %v3709_v33  ;;  %v3717_v39 = vand.u32 4294901760, %v3716_v26  ;;  %v13133_v20 = vand.u32 4294901760, %v13058_v40  ;;  %v10297_v40 = vld [vmem:[%s12672_s3 + $0x1b8] sm:$0xff]  ;;  %7909 = vmatpush3.bf16.msra.mxu1 %v9803_v34 }
 0x35c   : > { %v3730_v17 = vsub.f32 %v10152_v12, %v13128_v61  ;;  %v10268_v8 = vsub.f32 %v10184_v19, %v13129_v58  ;;  %v12798_v61 = vand.u32 4294901760, %v10246_v13  ;;  %v13134_v41 = vand.u32 4294901760, %v13059_v35  ;;  %7911 = vmatprep.subr.bf16.mxu1 %v9874_v45 }
 0x35d   : > { %v7874_v56 = vpack.c.bf16 %v13132_v42, %v13131_v4  ;;  %v13135_v53 = vand.u32 4294901760, %v13060_v44  ;;  %v13136_v32 = vand.u32 4294901760, %v13061_v46  ;;  %v13137_v22 = vand.u32 4294901760, %v13066_v7  ;;  %v10305_v7 = vld [vmem:[%s12672_s3 + $0x130] sm:$0xff]  ;;  %7869 = vmatpush3.bf16.msra.mxu0 %v7868_v16 }
 0x35e   : > { %13130 = vst [vmem:[#allocation47_spill] sm:$0xff] %v10268_v8  ;;  %v10280_v15 = vpack.c.bf16 %v13134_v41, %v13133_v20  ;;  %v13138_v11 = vand.u32 4294901760, %v13067_v14  ;;  %v3836_v26 = vand.u32 4294901760, %v3835_v57  ;;  %v10299_v35 = vpack.c.bf16 %v3829_v48, %v3822_v38  ;;  %v10310_v57 = vld [vmem:[%s12672_s3 + $0x138] sm:$0xff]  ;;  %v10315_v14 = vld [vmem:[%s12672_s3 + $0x1c0] sm:$0xff]  ;;  %7871 = vmatprep.subr.bf16.mxu0 %v7870_v29 }
 0x35f   : > { %v10286_v58 = vpack.c.bf16 %v13136_v32, %v13135_v53  ;;  %v3843_v20 = vand.u32 4294901760, %v3842_v23  ;;  %v3724_v44 = vand.u32 4294901760, %v3723_v30  ;;  %v12795_v46 = vand.u32 4294901760, %v10257_v6  ;;  %v13143_v32 = vld [vmem:[#allocation22_spill] sm:$0xff] }
 0x360   : > { %v10292_v33 = vpack.c.bf16 %v13138_v11, %v13137_v22  ;;  %v3731_v54 = vand.u32 4294901760, %v3730_v17  ;;  %v3849_v41 = vsub.f32 %v10210_v2, %v12796_v9  ;;  %v13139_v38 = vand.u32 4294901760, %v10215_v25  ;;  %v13145_v22 = vld [vmem:[#allocation23_spill] sm:$0xff]  ;;  %v13162_v9 = vld [vmem:[#allocation14_spill] sm:$0xff] }
 0x361   : > { %v12794_v23 = vand.u32 4294901760, %v10268_v8  ;;  %v13140_v30 = vand.u32 4294901760, %v13068_v59  ;;  %v13141_v4 = vand.u32 4294901760, %v13069_v0  ;;  %v10332_v34 = vpack.c.bf16 %v3717_v39, %v3710_v52  ;;  %v10351_v39 = vld [vmem:[%s12672_s3 + $0x1c8] sm:$0xff]  ;;  %7873 = vmatpush3.bf16.msra.mxu0 %v7872_v27  ;;  %v10404_v27 = vld [vmem:[%s12672_s3 + $0x1d0] sm:$0xff] }
 0x362   : > { %v3856_v48 = vsub.f32 %v10215_v25, %v13139_v38  ;;  %v12797_v17 = vand.u32 4294901760, %v10297_v40  ;;  %v10338_v53 = vsub.f32 %v10246_v13, %v12798_v61  ;;  %v13144_v16 = vand.u32 4294901760, %v13143_v32  ;;  %7875 = vmatprep.subr.bf16.mxu0 %v7874_v56  ;;  %v13164_v56 = vld [vmem:[#allocation15_spill] sm:$0xff] }
 0x363   : > { %v10330_v42 = vpack.c.bf16 %v13141_v4, %v13140_v30  ;;  %v13146_v45 = vand.u32 4294901760, %v13145_v22  ;;  %v12799_v59 = vand.u32 4294901760, %v10305_v7  ;;  %v12801_v0 = vand.u32 4294901760, %v10310_v57 }
 0x364   : > { %13142 = vst [vmem:[#allocation48_spill] sm:$0xff] %v10338_v53  ;;  %v12806_v52 = vand.u32 4294901760, %v10315_v14  ;;  %v10354_v38 = vpack.c.bf16 %v3843_v20, %v3836_v26  ;;  %v13147_v29 = vand.u32 4294901760, %v9846_v37  ;;  %v13148_v30 = vand.u32 4294901760, %v9848_v10  ;;  %v10374_v26 = vld [vmem:[%s12672_s3 + $0x140] sm:$0xff]  ;;  %v13151_v37 = vld [vmem:[#allocation24_spill] sm:$0xff] }
 0x365   : > { %v10344_v11 = vpack.c.bf16 %v13146_v45, %v13144_v16  ;;  %v13149_v32 = vand.u32 4294901760, %v9850_v62  ;;  %v13150_v16 = vand.u32 4294901760, %v9852_v31  ;;  %v3737_v45 = vsub.f32 %v10257_v6, %v12795_v46  ;;  %7913 = vmatpush3.bf16.msra.mxu1 %v13151_v37  ;;  %v10385_v31 = vld [vmem:[%s12672_s3 + $0x148] sm:$0xff]  ;;  %v13169_v6 = vld [vmem:[#allocation26_spill] sm:$0xff]  ;;  %7877 = vmatpush3.bf16.msra.mxu0 %v10280_v15  ;;  %v13177_v15 = vld [vmem:[#allocation28_spill] sm:$0xff] }
 0x366   : > { %v10360_v4 = vpack.c.bf16 %v13148_v30, %v13147_v29  ;;  %v10377_v10 = vpack.c.bf16 %v3731_v54, %v3724_v44  ;;  %v3850_v20 = vand.u32 4294901760, %v3849_v41  ;;  %v3857_v29 = vand.u32 4294901760, %v3856_v48  ;;  %v13152_v30 = vld [vmem:[#allocation25_spill] sm:$0xff]  ;;  %7879 = vmatprep.subr.bf16.mxu0 %v10286_v58  ;;  %v10488_v58 = vld [vmem:[%s12672_s3 + $0x1e8] sm:$0xff] }
 0x367   : > { %v10366_v22 = vpack.c.bf16 %v13150_v16, %v13149_v32  ;;  %v3744_v62 = vsub.f32 %v10268_v8, %v12794_v23  ;;  %7915 = vmatprep.subr.bf16.mxu1 %v13152_v30  ;;  %v13153_v32 = vld [vmem:[#allocation29_spill] sm:$0xff]  ;;  %v13155_v37 = vmov 0  ;;  %v10398_v54 = vsub.f32 %v10297_v40, %v12797_v17 }
 0x368   : > { %v13154_v16 = vld [vmem:[#allocation9_spill] sm:$0xff]  ;;  %v10414_v30 = vsub.f32 %v10305_v7, %v12799_v59  ;;  %v10424_v23 = vsub.f32 %v10315_v14, %v12806_v52  ;;  %v12809_v46 = vand.u32 4294901760, %v10374_v26  ;;  %v13163_v17 = vand.u32 4294901760, %v13162_v9 }
 0x369   : > { %vm10390_vm4 = vcmp.eq.s32.totalorder %v13154_v16, %v13153_v32  ;;  %13158 = vst [vmem:[#allocation23_spill] sm:$0xff] %v10398_v54  ;;  %v10409_v48 = vld [vmem:[%s12672_s3 + $0x1d8] sm:$0xff]  ;;  %v10419_v16 = vsub.f32 %v10310_v57, %v12801_v0  ;;  %v13165_v61 = vand.u32 4294901760, %v13164_v56  ;;  %v3738_v59 = vand.u32 4294901760, %v3737_v45  ;;  %7917 = vmatpush3.bf16.msra.mxu1 %v13169_v6  ;;  %7881 = vmatpush3.bf16.msra.mxu0 %v10292_v33 }
 0x36a   : > { %v13156_v37 = vsel %vm10390_vm4, 4294967295, %v13155_v37  ;;  %13159 = vst [vmem:[#allocation24_spill] sm:$0xff] %v10414_v30  ;;  %13161 = vst [vmem:[#allocation9_spill] sm:$0xff] %v10424_v23  ;;  %v13166_v44 = vand.u32 4294901760, %v10018_v5  ;;  %v13168_v36 = vand.u32 4294901760, %v13167_v60  ;;  %v12816_v8 = vand.u32 4294901760, %v10385_v31  ;;  %7883 = vmatprep.subr.bf16.mxu0 %v10330_v42 }
 0x36b   : > { %13157 = vst [vmem:[#allocation22_spill] sm:$0xff] %v13156_v37  ;;  %13160 = vst [vmem:[#allocation25_spill] sm:$0xff] %v10419_v16  ;;  %v10431_v41 = vpack.c.bf16 %v13165_v61, %v13163_v17  ;;  %v3745_v52 = vand.u32 4294901760, %v3744_v62  ;;  %v13170_v25 = vmov 0.0   ;;  %v10449_v5 = vld [vmem:[%s12672_s3 + $0x150] sm:$0xff]  ;;  %v13171_v60 = vld [vmem:[#allocation27_spill] sm:$0xff]  ;;  %v10458_v6 = vpack.c.bf16 %v3857_v29, %v3850_v20 }
 0x36c   : > { %v10437_v0 = vpack.c.bf16 %v13168_v36, %v13166_v44  ;;  %v6649_v9 = vsel %vm10390_vm4, 1.0, %v13170_v25  ;;  %v10454_v36 = vld [vmem:[%s12672_s3 + $0x158] sm:$0xff]  ;;  %7919 = vmatprep.subr.bf16.mxu1 %v13171_v60  ;;  %v13172_v17 = vand.u32 4294901760, %v10338_v53  ;;  %v13173_v44 = vand.u32 4294901760, %v10351_v39 }
 0x36d   : > { %v10478_v29 = vsub.f32 %v10374_v26, %v12809_v46  ;;  %v10495_v20 = vsub.f32 %v10385_v31, %v12816_v8  ;;  %7921 = vmatpush3.bf16.msra.mxu1 %v13177_v15  ;;  %v10500_v62 = vpack.c.bf16 %v3745_v52, %v3738_v59  ;;  %v13178_v56 = vand.u32 4294901760, %v10030_v47  ;;  %7885 = vmatpush3.bf16.msra.mxu0 %v10344_v11 }
 0x36e   : > { %v10463_v45 = vsub.f32 %v10338_v53, %v13172_v17  ;;  %v10469_v61 = vsub.f32 %v10351_v39, %v13173_v44  ;;  %v10483_v17 = vld [vmem:[%s12672_s3 + $0x1e0] sm:$0xff]  ;;  %v10490_v44 = vsub.f32 %v6649_v9, %v6649_v9  ;;  %v13179_v53 = vand.u32 4294901760, %v10046_v21  ;;  %7955 = vmatprep.subr.bf16.mxu1 %v10299_v35  ;;  %7887 = vmatprep.subr.bf16.mxu0 %v10360_v4 }
 0x36f   : > { %13175 = vst [vmem:[#allocation15_spill] sm:$0xff] %v10478_v29  ;;  %13176 = vst [vmem:[#allocation18_spill] sm:$0xff] %v10495_v20  ;;  %v13180_v9 = vand.u32 4294901760, %v10404_v27  ;;  %v13182_v8 = vand.u32 4294901760, %v10409_v48  ;;  %v13184_v47 = vand.u32 4294901760, %v10398_v54  ;;  %v13185_v33 = vand.u32 4294901760, %v10414_v30 }
 0x370   : > { %13174 = vst [vmem:[#allocation14_spill] sm:$0xff] %v10469_v61  ;;  %v10506_v2 = vpack.c.bf16 %v13179_v53, %v13178_v56  ;;  %v10529_v56 = vld [vmem:[%s12672_s3 + $0x160] sm:$0xff]  ;;  %v13186_v15 = vand.u32 4294901760, %v10419_v16  ;;  %6659 = vmatmul.mubr.msk.f32.vlgmr.msra.gmra.mrb[8].mxu1 %vm9921_vm3, %v13086_v24  ;;  %v13192_v37 = vand.u32 4294901760, %v10483_v17  ;;  %v13194_v60 = vand.u32 4294901760, %v10488_v58 }
 0x371   : > { %v10511_v12 = vsub.f32 %v10404_v27, %v13180_v9  ;;  %v10516_v46 = vsub.f32 %v10409_v48, %v13182_v8  ;;  %v3870_v21 = vsub.f32 %v10398_v54, %v13184_v47  ;;  %v10534_v8 = vld [vmem:[%s12672_s3 + $0x168] sm:$0xff]  ;;  %v3751_v35 = vsub.f32 %v10414_v30, %v13185_v33  ;;  %7957 = vmatpush3.bf16.msra.mxu1 %v10332_v34 }
 0x372   : > { %v3758_v9 = vsub.f32 %v10419_v16, %v13186_v15  ;;  %v13187_v47 = vand.u32 4294901760, %v10424_v23  ;;  %v13189_v33 = vand.u32 4294901760, %v10449_v5  ;;  %v13190_v15 = vand.u32 4294901760, %v10454_v36  ;;  %6660 = vmatprep.mubr.msk.f32.mxu1 %vm10390_vm4, %v13086_v24  ;;  %7959 = vmatprep.subr.bf16.mxu1 %v10354_v38 }
 0x373   : > { %13181 = vst [vmem:[#allocation26_spill] sm:$0xff] %v10511_v12  ;;  %13183 = vst [vmem:[#allocation27_spill] sm:$0xff] %v10516_v46  ;;  %v13191_v34 = vand.u32 4294901760, %v10469_v61  ;;  %v10584_v42 = vsub.f32 %v10488_v58, %v13194_v60  ;;  %v3871_v11 = vand.u32 4294901760, %v3870_v21  ;;  %v3752_v38 = vand.u32 4294901760, %v3751_v35  ;;  %7889 = vmatpush3.bf16.msra.mxu0 %v10366_v22 }
 0x374   : > { %v3877_v52 = vsub.f32 %v10424_v23, %v13187_v47  ;;  %v10555_v30 = vsub.f32 %v10449_v5, %v13189_v33  ;;  %v10560_v16 = vsub.f32 %v10454_v36, %v13190_v15  ;;  %v3864_v15 = vand.u32 4294901760, %v10463_v45  ;;  %7923 = vmatprep.subr.bf16.mxu0 %v10431_v41 }
 0x375   : > { %v3884_v59 = vsub.f32 %v10469_v61, %v13191_v34  ;;  %v10579_v47 = vsub.f32 %v10483_v17, %v13192_v37  ;;  %13195 = vst [vmem:[#allocation49_spill] sm:$0xff] %v10584_v42  ;;  %v3759_v33 = vand.u32 4294901760, %v3758_v9  ;;  %v13196_v45 = vand.u32 4294901760, %v10478_v29  ;;  %7961 = vmatpush3.bf16.msra.mxu1 %v10377_v10 }
 0x376   : > { %v13197_v34 = vand.u32 4294901760, %v10490_v44  ;;  %v13198_v37 = vand.u32 4294901760, %v10495_v20  ;;  %v13199_v4 = vand.u32 4294901760, %v10511_v12  ;;  %v13200_v35 = vand.u32 4294901760, %v10516_v46  ;;  %7963 = vmatprep.subr.bf16.mxu1 %v10458_v6  ;;  %6657 = vmatmul.mubr.msk.f32.vlgmr.msra.gmra.mrb[8].mxu0 %vm9921_vm3, %v13086_v24 }
 0x377   : > { %13193 = vst [vmem:[#allocation28_spill] sm:$0xff] %v10579_v47  ;;  %v3765_v23 = vsub.f32 %v10478_v29, %v13196_v45  ;;  %v13201_v45 = vand.u32 4294901760, %v10529_v56  ;;  %v3878_v10 = vand.u32 4294901760, %v3877_v52  ;;  %v12847_v55 = vand.u32 4294901760, %v10579_v47  ;;  %v13207_v29 = vld [vmem:[#allocation34_spill] sm:$0xff]  ;;  %7925 = vmatpush3.bf16.msra.mxu0 %v10437_v0 }
 0x378   : > { %v3692_v61 = vsub.f32 %v10490_v44, %v13197_v34  ;;  %v3772_v54 = vsub.f32 %v10495_v20, %v13198_v37  ;;  %v3891_v21 = vsub.f32 %v10511_v12, %v13199_v4  ;;  %v3898_v9 = vsub.f32 %v10516_v46, %v13200_v35  ;;  %v13205_v12 = vld [vmem:[#allocation21_spill] sm:$0xff]  ;;  %7927 = vmatprep.subr.bf16.mxu0 %v10506_v2 }
 0x379   : > { %v10608_v34 = vsub.f32 %v10529_v56, %v13201_v45  ;;  %v13203_v37 = vand.u32 4294901760, %v10534_v8  ;;  %v3885_v4 = vand.u32 4294901760, %v3884_v59  ;;  %v7966_v46 = vpack.c.bf16 %v3871_v11, %v3864_v15  ;;  %7965 = vmatpush3.bf16.msra.mxu1 %v10500_v62 }
 0x37a   : > { %v7968_v45 = vpack.c.bf16 %v3759_v33, %v3752_v38  ;;  %v13206_v20 = vand.u32 4294901760, %v13205_v12  ;;  %v13208_v28 = vand.u32 4294901760, %v13207_v29  ;;  %v3766_v50 = vand.u32 4294901760, %v3765_v23 }
 0x37b   : > { %13202 = vst [vmem:[#allocation50_spill] sm:$0xff] %v10608_v34  ;;  %v10613_v60 = vsub.f32 %v10534_v8, %v13203_v37  ;;  %v3693_v22 = vand.u32 4294901760, %v3692_v61  ;;  %v3773_v18 = vand.u32 4294901760, %v3772_v54  ;;  %v13209_v6 = vand.u32 4294901760, %v10555_v30  ;;  %7967 = vmatprep.subr.bf16.mxu1 %v7966_v46 }
 0x37c   : > { %v10624_v37 = vpack.c.bf16 %v13208_v28, %v13206_v20  ;;  %v13210_v52 = vand.u32 4294901760, %v10560_v16  ;;  %v3892_v12 = vand.u32 4294901760, %v3891_v21  ;;  %v3899_v28 = vand.u32 4294901760, %v3898_v9 }
 0x37d   : > { %13204 = vst [vmem:[#allocation51_spill] sm:$0xff] %v10613_v60  ;;  %v3779_v59 = vsub.f32 %v10555_v30, %v13209_v6  ;;  %v12846_v23 = vand.u32 4294901760, %v10608_v34  ;;  %v12845_v54 = vand.u32 4294901760, %v10613_v60  ;;  %3694 = vmatprep.mubr.f32.mxu0 %v3693_v22  ;;  %v7970_v61 = vpack.c.bf16 %v3885_v4, %v3878_v10  ;;  %7969 = vmatpush3.bf16.msra.mxu1 %v7968_v45  ;;  %v13218_v45 = vld [vmem:[#allocation20_spill] sm:$0xff] }
 0x37e   : > { %v3786_v35 = vsub.f32 %v10560_v16, %v13210_v52  ;;  %v3905_v20 = vsub.f32 %v10579_v47, %v12847_v55  ;;  %v13211_v29 = vand.u32 4294901760, %v10584_v42  ;;  %v13212_v62 = vand.u32 4294901760, %v10113_v3  ;;  %7929 = vmatpush3.bf16.msra.mxu0 %v10624_v37  ;;  %v13281_v55 = vld [vmem:[#allocation11_spill] sm:$0xff] }
 0x37f   : > { %v13213_v15 = vand.u32 4294901760, %v10118_v43  ;;  %v13214_v38 = vand.u32 4294901760, %v10159_v49  ;;  %v13215_v21 = vand.u32 4294901760, %v10184_v19  ;;  %v3780_v10 = vand.u32 4294901760, %v3779_v59  ;;  %7971 = vmatprep.subr.bf16.mxu1 %v7970_v61  ;;  %v13216_v19 = vld [vmem:[#allocation19_spill] sm:$0xff] }
 0x380   : > { %v3912_v33 = vsub.f32 %v10584_v42, %v13211_v29  ;;  %v3787_v4 = vand.u32 4294901760, %v3786_v35  ;;  %v7972_v22 = vpack.c.bf16 %v3773_v18, %v3766_v50  ;;  %v7974_v6 = vpack.c.bf16 %v3899_v28, %v3892_v12 }
 0x381   : > { %v10650_v11 = vpack.c.bf16 %v13213_v15, %v13212_v62  ;;  %v10656_v9 = vpack.c.bf16 %v13215_v21, %v13214_v38  ;;  %v3793_v46 = vsub.f32 %v10608_v34, %v12846_v23  ;;  %v3800_v3 = vsub.f32 %v10613_v60, %v12845_v54  ;;  %v13224_v38 = vld [vmem:[#allocation36_spill] sm:$0xff]  ;;  %v13280_v54 = vld [vmem:[#allocation27_spill] sm:$0xff] }
 0x382   : > { %v3906_v43 = vand.u32 4294901760, %v3905_v20  ;;  %v3913_v49 = vand.u32 4294901760, %v3912_v33  ;;  %v13217_v52 = vand.u32 4294901760, %v13216_v19  ;;  %v13219_v18 = vand.u32 4294901760, %v13218_v45  ;;  %7973 = vmatpush3.bf16.msra.mxu1 %v7972_v22  ;;  %v13222_v33 = vld [vmem:[#allocation35_spill] sm:$0xff] }
 0x383   : > { %7931 = vmatprep.subr.bf16.mxu0 %v10650_v11  ;;  %v13220_v59 = vand.u32 4294901760, %v10246_v13  ;;  %v13221_v12 = vand.u32 4294901760, %v10297_v40  ;;  %v7976_v29 = vpack.c.bf16 %v3787_v4, %v3780_v10  ;;  %v3794_v61 = vand.u32 4294901760, %v3793_v46  ;;  %7975 = vmatprep.subr.bf16.mxu1 %v7974_v6 }
 0x384   : > { %v3919_v35 = vsub.f32 %v13216_v19, %v13217_v52  ;;  %v3926_v50 = vsub.f32 %v13218_v45, %v13219_v18  ;;  %v3801_v20 = vand.u32 4294901760, %v3800_v3  ;;  %v13223_v62 = vand.u32 4294901760, %v13222_v33  ;;  %7933 = vmatpush3.bf16.msra.mxu0 %v10656_v9 }
 0x385   : > { %v10676_v28 = vpack.c.bf16 %v13221_v12, %v13220_v59  ;;  %v13225_v21 = vand.u32 4294901760, %v13224_v38  ;;  %v13226_v13 = vand.u32 4294901760, %v10305_v7  ;;  %v13227_v40 = vand.u32 4294901760, %v10310_v57  ;;  %v13230_v7 = vld [vmem:[#allocation8_spill] sm:$0xff] }
 0x386   : > { %v3807_v15 = vsub.f32 %v13222_v33, %v13223_v62  ;;  %v7978_v10 = vpack.c.bf16 %v3913_v49, %v3906_v43  ;;  %v3920_v4 = vand.u32 4294901760, %v3919_v35  ;;  %v3927_v22 = vand.u32 4294901760, %v3926_v50  ;;  %7977 = vmatpush3.bf16.msra.mxu1 %v7976_v29 }
 0x387   : > { %v3814_v52 = vsub.f32 %v13224_v38, %v13225_v21  ;;  %v10689_v18 = vpack.c.bf16 %v13227_v40, %v13226_v13  ;;  %7935 = vmatprep.subr.bf16.mxu0 %v10676_v28  ;;  %v13228_v46 = vand.u32 4294901760, %v10315_v14  ;;  %v13229_v3 = vand.u32 4294901760, %v10351_v39  ;;  %v13247_v40 = vld [vmem:[#allocation32_spill] sm:$0xff] }
 0x388   : > { %v7980_v12 = vpack.c.bf16 %v3801_v20, %v3794_v61  ;;  %v3808_v6 = vand.u32 4294901760, %v3807_v15  ;;  %vm10700_vm5 = vcmp.eq.s32.totalorder %v13230_v7, %v13153_v32  ;;  %v13231_v57 = vmov 0  ;;  %7979 = vmatprep.subr.bf16.mxu1 %v7978_v10 }
 0x389   : > { %v10696_v59 = vpack.c.bf16 %v13229_v3, %v13228_v46  ;;  %v3815_v62 = vand.u32 4294901760, %v3814_v52  ;;  %v13232_v57 = vsel %vm10700_vm5, 4294967295, %v13231_v57  ;;  %7937 = vmatpush3.bf16.msra.mxu0 %v10689_v18  ;;  %v13234_v43 = vand.u32 4294901760, %v10374_v26  ;;  %v13255_v3 = vld [vmem:[#allocation17_spill] sm:$0xff] }
 0x38a   : > { %13233 = vst [vmem:[#allocation21_spill] sm:$0xff] %v13232_v57  ;;  %v13235_v14 = vand.u32 4294901760, %v10385_v31  ;;  %v7982_v49 = vpack.c.bf16 %v3927_v22, %v3920_v4  ;;  %v13236_v35 = vand.u32 4294901760, %v10404_v27  ;;  %v13237_v50 = vand.u32 4294901760, %v10409_v48  ;;  %7981 = vmatpush3.bf16.msra.mxu1 %v7980_v12 }
 0x38b   : > { %7939 = vmatprep.subr.bf16.mxu0 %v10696_v59  ;;  %v6648_v61 = vsel %vm10700_vm5, 1.0, %v13170_v25  ;;  %v7984_v20 = vpack.c.bf16 %v3815_v62, %v3808_v6  ;;  %v13238_v26 = vand.u32 4294901760, %v10449_v5  ;;  %v13239_v31 = vand.u32 4294901760, %v10454_v36 }
 0x38c   : > { %v10709_v39 = vpack.c.bf16 %v13235_v14, %v13234_v43  ;;  %v10716_v29 = vpack.c.bf16 %v13237_v50, %v13236_v35  ;;  %7983 = vmatprep.subr.bf16.mxu1 %v7982_v49  ;;  %v10729_v27 = vsub.f32 %v6648_v61, %v6648_v61  ;;  %v13241_v48 = vand.u32 4294901760, %v10483_v17  ;;  %v13249_v17 = vld [vmem:[#allocation33_spill] sm:$0xff]  ;;  %v13259_v35 = vld [vmem:[#allocation39_spill] sm:$0xff]  ;;  %v13260_v50 = vld [vmem:[#allocation40_spill] sm:$0xff] }
 0x38d   : > { %v10726_v15 = vpack.c.bf16 %v13239_v31, %v13238_v26  ;;  %v13242_v21 = vand.u32 4294901760, %v10488_v58  ;;  %v13244_v5 = vand.u32 4294901760, %v10529_v56  ;;  %v13245_v36 = vand.u32 4294901760, %v10534_v8  ;;  %v13253_v8 = vld [vmem:[#allocation16_spill] sm:$0xff]  ;;  %v13258_v43 = vld [vmem:[#allocation37_spill] sm:$0xff]  ;;  %v13262_v26 = vld [vmem:[#allocation42_spill] sm:$0xff] }
 0x38e   : > { %7941 = vmatpush3.bf16.msra.mxu0 %v10709_v39  ;;  %7985 = vmatpush3.bf16.msra.mxu1 %v7984_v20  ;;  %v13248_v10 = vand.u32 4294901760, %v13247_v40  ;;  %v13250_v4 = vand.u32 4294901760, %v13249_v17  ;;  %v12848_v22 = vand.u32 4294901760, %v10729_v27  ;;  %v13252_v56 = vand.u32 4294901760, %v10490_v44  ;;  %v13261_v20 = vld [vmem:[#allocation41_spill] sm:$0xff]  ;;  %v13266_v40 = vld [vmem:[#allocation47_spill] sm:$0xff] }
 0x38f   : > { %13240 = vst [vmem:[#allocation34_spill] sm:$0xff] %v10726_v15  ;;  %7943 = vmatprep.subr.bf16.mxu0 %v10716_v29  ;;  %v10735_v52 = vpack.c.bf16 %v13242_v21, %v13241_v48  ;;  %8019 = vmatprep.subr.bf16.mxu1 %v10431_v41  ;;  %v10743_v13 = vpack.c.bf16 %v13245_v36, %v13244_v5  ;;  %v13254_v46 = vand.u32 4294901760, %v13253_v8  ;;  %v13256_v12 = vand.u32 4294901760, %v13255_v3  ;;  %v13263_v48 = vld [vmem:[#allocation44_spill] sm:$0xff]  ;;  %v13264_v21 = vld [vmem:[#allocation45_spill] sm:$0xff]  ;;  %v13265_v36 = vld [vmem:[#allocation46_spill] sm:$0xff] }
 0x390   : > { %v10750_v58 = vpack.c.bf16 %v13250_v4, %v13248_v10  ;;  %v3698_v62 = vsub.f32 %v10729_v27, %v12848_v22  ;;  %v7986_v7 = vpack.c.bf16 %v10071_v51, %v10059_v1  ;;  %v7988_v14 = vpack.c.bf16 %v13258_v43, %v10103_v63  ;;  %v13267_v17 = vld [vmem:[#allocation48_spill] sm:$0xff]  ;;  %v13270_v8 = vld [vmem:[#allocation25_spill] sm:$0xff] }
 0x391   : > { %13243 = vst [vmem:[#allocation19_spill] sm:$0xff] %v10735_v52  ;;  %13246 = vst [vmem:[#allocation20_spill] sm:$0xff] %v10743_v13  ;;  %6661 = vmatmul.mubr.msk.f32.vlgmr.msra.gmra.mrb[10].mxu1 %vm10700_vm5, %v13086_v24  ;;  %v10765_v6 = vpack.c.bf16 %v13256_v12, %v13254_v46  ;;  %v7990_v61 = vpack.c.bf16 %v13260_v50, %v13259_v35  ;;  %v7992_v31 = vpack.c.bf16 %v13262_v26, %v13261_v20  ;;  %v13271_v3 = vld [vmem:[#allocation9_spill] sm:$0xff]  ;;  %v13272_v12 = vld [vmem:[#allocation14_spill] sm:$0xff]  ;;  %v13282_v22 = vmov 0 }
 0x392   : > { %7945 = vmatpush3.bf16.msra.mxu0 %v10726_v15  ;;  %13251 = vst [vmem:[#allocation35_spill] sm:$0xff] %v10750_v58  ;;  %8021 = vmatpush3.bf16.msra.mxu1 %v10437_v0  ;;  %v3699_v49 = vand.u32 4294901760, %v3698_v62  ;;  %v7994_v5 = vpack.c.bf16 %v13264_v21, %v13263_v48  ;;  %v7996_v10 = vpack.c.bf16 %v13266_v40, %v13265_v36 }
 0x393   : > { %7947 = vmatprep.subr.bf16.mxu0 %v10735_v52  ;;  %4174 = vmatprep.mubr.f32.mxu1 %v13252_v56  ;;  %13257 = vst [vmem:[#allocation36_spill] sm:$0xff] %v10765_v6  ;;  %v13269_v56 = vld [vmem:[#allocation24_spill] sm:$0xff]  ;;  %v8002_v62 = vpack.c.bf16 %v13272_v12, %v13271_v3  ;;  %vm10827_vm6 = vcmp.eq.s32.totalorder %v13281_v55, %v13153_v32  ;;  %v10843_v55 = vld [vmem:[%s12672_s3 + $0x278] sm:$0xff] }
 0x394   : > { %8023 = vmatprep.subr.bf16.mxu1 %v10506_v2  ;;  %v8000_v46 = vpack.c.bf16 %v13270_v8, %v13269_v56  ;;  %v13283_v22 = vsel %vm10827_vm6, 4294967295, %v13282_v22  ;;  %13286 = vst [vmem:[#allocation39_spill] sm:$0xff] %v10843_v55  ;;  %v6651_v57 = vsel %vm10827_vm6, 1.0, %v13170_v25 }
 0x395   : > { %13284 = vst [vmem:[#allocation17_spill] sm:$0xff] %v13283_v22 }
 0x396   : > { %7949 = vmatpush3.bf16.msra.mxu0 %v10743_v13  ;;  %8025 = vmatpush3.bf16.msra.mxu1 %v10624_v37 }
 0x397   : > { %7951 = vmatprep.subr.bf16.mxu0 %v10750_v58  ;;  %8027 = vmatprep.subr.bf16.mxu1 %v10650_v11 }
 0x39a   : > { %7953 = vmatpush3.bf16.msra.mxu0 %v10765_v6  ;;  %8029 = vmatpush3.bf16.msra.mxu1 %v10656_v9 }
 0x39b   : > { %7987 = vmatprep.subr.bf16.mxu0 %v7986_v7  ;;  %8031 = vmatprep.subr.bf16.mxu1 %v10676_v28  ;;  %v10802_v7 = vld [vmem:[%s12672_s3 + $0x260] sm:$0xff] }
 0x39c   : > { %13273 = vst [vmem:[#allocation8_spill] sm:$0xff] %v10802_v7  ;;  %v12861_v53 = vand.u32 4294901760, %v10802_v7 }
 0x39d   : > { %3700 = vmatmul.mubr.f32.vlgmr.msra.gmra.mrb[10].mxu0 %v3699_v49  ;;  %v10813_v49 = vld [vmem:[%s12672_s3 + $0x2f0] sm:$0xff] }
 0x39e   : > { %7989 = vmatpush3.bf16.msra.mxu0 %v7988_v14  ;;  %4067 = vmatprep.mubr.f32.mxu0 %v10490_v44  ;;  %v13268_v44 = vld [vmem:[#allocation23_spill] sm:$0xff]  ;;  %13275 = vst [vmem:[#allocation33_spill] sm:$0xff] %v10813_v49  ;;  %v10857_v32 = vsub.f32 %v10802_v7, %v12861_v53 }
 0x39f   : > { %7991 = vmatprep.subr.bf16.mxu0 %v7990_v61  ;;  %8033 = vmatpush3.bf16.msra.mxu1 %v10689_v18  ;;  %v7998_v4 = vpack.c.bf16 %v13268_v44, %v13267_v17  ;;  %v10807_v14 = vld [vmem:[%s12672_s3 + $0x268] sm:$0xff]  ;;  %v10818_v61 = vld [vmem:[%s12672_s3 + $0x2f8] sm:$0xff] }
 0x3a0   : > { %8035 = vmatprep.subr.bf16.mxu1 %v10696_v59  ;;  %13274 = vst [vmem:[#allocation32_spill] sm:$0xff] %v10807_v14  ;;  %13276 = vst [vmem:[#allocation16_spill] sm:$0xff] %v10818_v61  ;;  %v10885_v53 = vld [vmem:[%s12672_s3 + $0x288] sm:$0xff] }
 0x3a2   : > { %7993 = vmatpush3.bf16.msra.mxu0 %v7992_v31  ;;  %v13277_v31 = vld [vmem:[#allocation15_spill] sm:$0xff] }
 0x3a3   : > { %7995 = vmatprep.subr.bf16.mxu0 %v7994_v5  ;;  %8037 = vmatpush3.bf16.msra.mxu1 %v10709_v39  ;;  %v13278_v5 = vld [vmem:[#allocation18_spill] sm:$0xff] }
 0x3a4   : > { %8039 = vmatprep.subr.bf16.mxu1 %v10716_v29 }
 0x3a6   : > { %7997 = vmatpush3.bf16.msra.mxu0 %v7996_v10  ;;  %v8004_v10 = vpack.c.bf16 %v13278_v5, %v13277_v31 }
 0x3a7   : > { %7999 = vmatprep.subr.bf16.mxu0 %v7998_v4  ;;  %8041 = vmatpush3.bf16.msra.mxu1 %v10726_v15  ;;  %v13279_v4 = vld [vmem:[#allocation26_spill] sm:$0xff] }
 0x3a8   : > { %8043 = vmatprep.subr.bf16.mxu1 %v10735_v52  ;;  %v8006_v23 = vpack.c.bf16 %v13280_v54, %v13279_v4  ;;  %v8010_v52 = vpack.c.bf16 %v10584_v42, %v10579_v47  ;;  %v13288_v42 = vand.u32 4294901760, %v10813_v49  ;;  %v10895_v15 = vld [vmem:[%s12672_s3 + $0x200] sm:$0xff] }
 0x3aa   : > { %8001 = vmatpush3.bf16.msra.mxu0 %v8000_v46  ;;  %v8008_v46 = vpack.c.bf16 %v10560_v16, %v10555_v30  ;;  %v10869_v22 = vsub.f32 %v10813_v49, %v13288_v42  ;;  %v8012_v42 = vpack.c.bf16 %v10613_v60, %v10608_v34  ;;  %v10947_v34 = vld [vmem:[%s12672_s3 + $0x218] sm:$0xff]  ;;  %v13295_v60 = vand.u32 4294901760, %v10857_v32 }
 0x3ab   : > { %8003 = vmatprep.subr.bf16.mxu0 %v8002_v62  ;;  %v10838_v62 = vld [vmem:[%s12672_s3 + $0x270] sm:$0xff]  ;;  %8045 = vmatpush3.bf16.msra.mxu1 %v10743_v13  ;;  %v10900_v13 = vld [vmem:[%s12672_s3 + $0x208] sm:$0xff] }
 0x3ac   : > { %13285 = vst [vmem:[#allocation37_spill] sm:$0xff] %v10838_v62  ;;  %8047 = vmatprep.subr.bf16.mxu1 %v10750_v58 }
 0x3ae   : > { %8005 = vmatpush3.bf16.msra.mxu0 %v8004_v10  ;;  %v13287_v10 = vand.u32 4294901760, %v10807_v14 }
 0x3af   : > { %8007 = vmatprep.subr.bf16.mxu0 %v8006_v23  ;;  %v13289_v23 = vand.u32 4294901760, %v10818_v61  ;;  %8049 = vmatpush3.bf16.msra.mxu1 %v10765_v6  ;;  %v13293_v6 = vand.u32 4294901760, %v10729_v27 }
 0x3b0   : > { %v10862_v58 = vsub.f32 %v10807_v14, %v13287_v10  ;;  %v10880_v10 = vld [vmem:[%s12672_s3 + $0x280] sm:$0xff]  ;;  %8083 = vmatprep.subr.bf16.mxu1 %v10431_v41  ;;  %v10905_v41 = vld [vmem:[%s12672_s3 + $0x290] sm:$0xff]  ;;  %v13290_v14 = vand.u32 4294901760, %v10838_v62 }
 0x3b1   : > { %v10874_v25 = vsub.f32 %v10818_v61, %v13289_v23  ;;  %v8014_v23 = vpack.c.bf16 %v13218_v45, %v13216_v19  ;;  %v10912_v19 = vld [vmem:[%s12672_s3 + $0x298] sm:$0xff]  ;;  %v10917_v45 = vld [vmem:[%s12672_s3 + $0x210] sm:$0xff]  ;;  %v12872_v61 = vand.u32 4294901760, %v10869_v22 }
 0x3b2   : > { %8009 = vmatpush3.bf16.msra.mxu0 %v8008_v46  ;;  %v10907_v46 = vsub.f32 %v6651_v57, %v6651_v57  ;;  %v10924_v57 = vsub.f32 %v10838_v62, %v13290_v14  ;;  %4178 = vmatmul.mubr.f32.vlgmr.msra.gmra.mrb[12].mxu1 %v13293_v6  ;;  %v13296_v49 = vand.u32 4294901760, %v10862_v58  ;;  %v13302_v6 = vand.u32 4294901760, %v10880_v10 }
 0x3b3   : > { %8011 = vmatprep.subr.bf16.mxu0 %v8010_v52  ;;  %v13292_v52 = vand.u32 4294901760, %v10843_v55  ;;  %8085 = vmatpush3.bf16.msra.mxu1 %v10437_v0  ;;  %v13298_v62 = vand.u32 4294901760, %v10874_v25 }
 0x3b4   : > { %13291 = vst [vmem:[#allocation40_spill] sm:$0xff] %v10924_v57  ;;  %6664 = vmatprep.mubr.msk.f32.mxu1 %vm10390_vm4, %v13086_v24  ;;  %v10953_v0 = vpack.c.bf16 %v13296_v49, %v13295_v60  ;;  %8087 = vmatprep.subr.bf16.mxu1 %v10506_v2  ;;  %v13300_v60 = vand.u32 4294901760, %v10059_v1  ;;  %v13301_v49 = vand.u32 4294901760, %v10071_v51  ;;  %v13306_v51 = vand.u32 4294901760, %v10895_v15 }
 0x3b5   : > { %v10929_v7 = vsub.f32 %v10843_v55, %v13292_v52  ;;  %v8016_v52 = vpack.c.bf16 %v13224_v38, %v13222_v33  ;;  %v10964_v47 = vpack.c.bf16 %v13298_v62, %v12872_v61  ;;  %v12876_v33 = vand.u32 4294901760, %v10924_v57 }
 0x3b6   : > { %13297 = vst [vmem:[#allocation41_spill] sm:$0xff] %v10953_v0  ;;  %8013 = vmatpush3.bf16.msra.mxu0 %v8012_v42  ;;  %v8050_v42 = vpack.c.bf16 %v13301_v49, %v13300_v60  ;;  %v10976_v55 = vsub.f32 %v10880_v10, %v13302_v6  ;;  %v13304_v62 = vand.u32 4294901760, %v10885_v53  ;;  %v10988_v60 = vsub.f32 %v10895_v15, %v13306_v51 }
 0x3b7   : > { %13299 = vst [vmem:[#allocation42_spill] sm:$0xff] %v10964_v47  ;;  %8015 = vmatprep.subr.bf16.mxu0 %v8014_v23  ;;  %v12875_v38 = vand.u32 4294901760, %v10929_v7  ;;  %8089 = vmatpush3.bf16.msra.mxu1 %v10624_v37  ;;  %v13308_v49 = vand.u32 4294901760, %v10900_v13  ;;  %v13310_v6 = vand.u32 4294901760, %v10905_v41  ;;  %v13313_v51 = vand.u32 4294901760, %v10103_v63  ;;  %v11033_v63 = vld [vmem:[%s12672_s3 + $0x2a8] sm:$0xff] }
 0x3b8   : > { %13303 = vst [vmem:[#allocation44_spill] sm:$0xff] %v10976_v55  ;;  %v10981_v23 = vsub.f32 %v10885_v53, %v13304_v62  ;;  %13307 = vst [vmem:[#allocation46_spill] sm:$0xff] %v10988_v60  ;;  %v11003_v62 = vld [vmem:[%s12672_s3 + $0x2a0] sm:$0xff]  ;;  %8091 = vmatprep.subr.bf16.mxu1 %v10650_v11  ;;  %v13315_v1 = vand.u32 4294901760, %v10912_v19  ;;  %v13317_v0 = vand.u32 4294901760, %v10917_v45  ;;  %v13320_v11 = vand.u32 4294901760, %v13260_v50 }
 0x3b9   : > { %v10993_v61 = vsub.f32 %v10900_v13, %v13308_v49  ;;  %v10998_v2 = vsub.f32 %v10905_v41, %v13310_v6  ;;  %v11009_v37 = vpack.c.bf16 %v12875_v38, %v12876_v33  ;;  %v13314_v49 = vand.u32 4294901760, %v13258_v43 }
 0x3ba   : > { %13305 = vst [vmem:[#allocation45_spill] sm:$0xff] %v10981_v23  ;;  %8017 = vmatpush3.bf16.msra.mxu0 %v8016_v52  ;;  %v11019_v47 = vsub.f32 %v10912_v19, %v13315_v1  ;;  %v11024_v57 = vsub.f32 %v10917_v45, %v13317_v0  ;;  %v13319_v52 = vand.u32 4294901760, %v13259_v35  ;;  %v13321_v43 = vand.u32 4294901760, %v10907_v46 }
 0x3bb   : > { %13309 = vst [vmem:[#allocation47_spill] sm:$0xff] %v10993_v61  ;;  %13311 = vst [vmem:[#allocation48_spill] sm:$0xff] %v10998_v2  ;;  %v8052_v6 = vpack.c.bf16 %v13314_v49, %v13313_v51  ;;  %8051 = vmatprep.subr.bf16.mxu0 %v8050_v42  ;;  %v13322_v51 = vand.u32 4294901760, %v13261_v20  ;;  %v13323_v0 = vand.u32 4294901760, %v13262_v26  ;;  %v12879_v35 = vand.u32 4294901760, %v10976_v55  ;;  %8093 = vmatpush3.bf16.msra.mxu1 %v10656_v9 }
 0x3bc   : > { %13312 = vst [vmem:[#allocation23_spill] sm:$0xff] %v11009_v37  ;;  %13316 = vst [vmem:[#allocation24_spill] sm:$0xff] %v11019_v47  ;;  %v8054_v38 = vpack.c.bf16 %v13320_v11, %v13319_v52  ;;  %v11038_v1 = vsub.f32 %v10907_v46, %v13321_v43  ;;  %v13324_v50 = vand.u32 4294901760, %v10947_v34  ;;  %v12881_v52 = vand.u32 4294901760, %v11003_v62  ;;  %v11054_v11 = vld [vmem:[%s12672_s3 + $0x220] sm:$0xff]  ;;  %8095 = vmatprep.subr.bf16.mxu1 %v10676_v28 }
 0x3bd   : > { %13318 = vst [vmem:[#allocation25_spill] sm:$0xff] %v11024_v57  ;;  %v8056_v42 = vpack.c.bf16 %v13323_v0, %v13322_v51  ;;  %4070 = vmatmul.mubr.f32.vlgmr.msra.gmra.mrb[12].mxu0 %v10729_v27  ;;  %v13326_v0 = vand.u32 4294901760, %v13263_v48  ;;  %v12877_v9 = vand.u32 4294901760, %v11019_v47  ;;  %v13329_v51 = vand.u32 4294901760, %v13266_v40 }
 0x3be   : > { %v11048_v49 = vsub.f32 %v10947_v34, %v13324_v50  ;;  %8053 = vmatpush3.bf16.msra.mxu0 %v8052_v6  ;;  %6662 = vmatprep.mubr.msk.f32.mxu0 %vm10390_vm4, %v13086_v24  ;;  %v13327_v50 = vand.u32 4294901760, %v13264_v21  ;;  %v13328_v6 = vand.u32 4294901760, %v13265_v36  ;;  %v13330_v20 = vand.u32 4294901760, %v13267_v17 }
 0x3bf   : > { %8055 = vmatprep.subr.bf16.mxu0 %v8054_v38  ;;  %v13331_v48 = vand.u32 4294901760, %v13268_v44  ;;  %v12880_v26 = vand.u32 4294901760, %v11054_v11  ;;  %v13334_v28 = vand.u32 4294901760, %v13271_v3  ;;  %v13335_v38 = vand.u32 4294901760, %v13272_v12  ;;  %8097 = vmatpush3.bf16.msra.mxu1 %v10689_v18 }
 0x3c0   : > { %13325 = vst [vmem:[#allocation9_spill] sm:$0xff] %v11048_v49  ;;  %v8058_v27 = vpack.c.bf16 %v13327_v50, %v13326_v0  ;;  %v8060_v43 = vpack.c.bf16 %v13329_v51, %v13328_v6  ;;  %v13332_v0 = vand.u32 4294901760, %v13269_v56  ;;  %v13333_v50 = vand.u32 4294901760, %v13270_v8  ;;  %v11104_v56 = vld [vmem:[%s12672_s3 + $0x228] sm:$0xff]  ;;  %8099 = vmatprep.subr.bf16.mxu1 %v10696_v59 }
 0x3c1   : > { %v8062_v21 = vpack.c.bf16 %v13331_v48, %v13330_v20  ;;  %v11090_v36 = vpack.c.bf16 %v13335_v38, %v13334_v28  ;;  %v4683_v40 = vsub.f32 %v10976_v55, %v12879_v35  ;;  %v12878_v17 = vand.u32 4294901760, %v11048_v49 }
 0x3c2   : > { %v8064_v33 = vpack.c.bf16 %v13333_v50, %v13332_v0  ;;  %v11099_v44 = vsub.f32 %v11003_v62, %v12881_v52  ;;  %v13337_v8 = vand.u32 4294901760, %v10981_v23  ;;  %v13338_v12 = vand.u32 4294901760, %v10988_v60  ;;  %8057 = vmatpush3.bf16.msra.mxu0 %v8056_v42 }
 0x3c3   : > { %v13339_v51 = vand.u32 4294901760, %v10993_v61  ;;  %v13340_v48 = vand.u32 4294901760, %v10998_v2  ;;  %v4704_v18 = vsub.f32 %v11019_v47, %v12877_v9  ;;  %v13341_v50 = vand.u32 4294901760, %v11024_v57  ;;  %8059 = vmatprep.subr.bf16.mxu0 %v8058_v27  ;;  %8101 = vmatpush3.bf16.msra.mxu1 %v10709_v39 }
 0x3c4   : > { %13336 = vst [vmem:[#allocation14_spill] sm:$0xff] %v11099_v44  ;;  %v4690_v3 = vsub.f32 %v10981_v23, %v13337_v8  ;;  %v4571_v20 = vsub.f32 %v10988_v60, %v13338_v12  ;;  %v13342_v38 = vand.u32 4294901760, %v11033_v63  ;;  %v13344_v12 = vand.u32 4294901760, %v13277_v31  ;;  %v11152_v31 = vld [vmem:[%s12672_s3 + $0x2b0] sm:$0xff]  ;;  %8103 = vmatprep.subr.bf16.mxu1 %v10716_v29  ;;  %v11199_v29 = vld [vmem:[%s12672_s3 + $0x2c8] sm:$0xff] }
 0x3c5   : > { %v4578_v6 = vsub.f32 %v10993_v61, %v13339_v51  ;;  %v4697_v0 = vsub.f32 %v10998_v2, %v13340_v48  ;;  %v4585_v28 = vsub.f32 %v11024_v57, %v13341_v50  ;;  %v13345_v42 = vand.u32 4294901760, %v13278_v5  ;;  %v13359_v57 = vld [vmem:[#allocation51_spill] sm:$0xff] }
 0x3c6   : > { %v11129_v8 = vsub.f32 %v11033_v63, %v13342_v38  ;;  %v13346_v59 = vand.u32 4294901760, %v13279_v4  ;;  %v13347_v48 = vand.u32 4294901760, %v13280_v54  ;;  %v12882_v50 = vand.u32 4294901760, %v11104_v56  ;;  %8061 = vmatpush3.bf16.msra.mxu0 %v8060_v43  ;;  %v13355_v43 = vld [vmem:[#allocation49_spill] sm:$0xff] }
 0x3c7   : > { %v11135_v51 = vpack.c.bf16 %v13345_v42, %v13344_v12  ;;  %v11147_v38 = vsub.f32 %v11054_v11, %v12880_v26  ;;  %v13349_v5 = vand.u32 4294901760, %v10555_v30  ;;  %v13350_v4 = vand.u32 4294901760, %v10560_v16  ;;  %v11172_v30 = vld [vmem:[%s12672_s3 + $0x230] sm:$0xff]  ;;  %8063 = vmatprep.subr.bf16.mxu0 %v8062_v21 }
 0x3c8   : > { %13343 = vst [vmem:[#allocation15_spill] sm:$0xff] %v11129_v8  ;;  %v11141_v9 = vpack.c.bf16 %v13347_v48, %v13346_v59  ;;  %v4684_v54 = vand.u32 4294901760, %v4683_v40  ;;  %v4592_v12 = vsub.f32 %v11048_v49, %v12878_v17  ;;  %v12892_v42 = vand.u32 4294901760, %v11099_v44  ;;  %v11167_v59 = vld [vmem:[%s12672_s3 + $0x2b8] sm:$0xff]  ;;  %v11183_v17 = vld [vmem:[%s12672_s3 + $0x2c0] sm:$0xff] }
 0x3c9   : > { %13348 = vst [vmem:[#allocation18_spill] sm:$0xff] %v11147_v38  ;;  %v11158_v27 = vpack.c.bf16 %v13350_v4, %v13349_v5  ;;  %v4691_v16 = vand.u32 4294901760, %v4690_v3  ;;  %v4572_v40 = vand.u32 4294901760, %v4571_v20  ;;  %v4579_v48 = vand.u32 4294901760, %v4578_v6  ;;  %v11178_v4 = vld [vmem:[%s12672_s3 + $0x238] sm:$0xff]  ;;  %v13357_v49 = vld [vmem:[#allocation50_spill] sm:$0xff] }
 0x3ca   : > { %v4698_v5 = vand.u32 4294901760, %v4697_v0  ;;  %v4705_v35 = vand.u32 4294901760, %v4704_v18  ;;  %v4586_v26 = vand.u32 4294901760, %v4585_v28  ;;  %v11192_v6 = vsub.f32 %v11104_v56, %v12882_v50  ;;  %v13352_v50 = vld [vmem:[#allocation34_spill] sm:$0xff]  ;;  %v13353_v0 = vld [vmem:[#allocation28_spill] sm:$0xff]  ;;  %8065 = vmatpush3.bf16.msra.mxu0 %v8064_v33 }
 0x3cb   : > { %v4593_v18 = vand.u32 4294901760, %v4592_v12  ;;  %v4711_v21 = vsub.f32 %v11099_v44, %v12892_v42  ;;  %v12894_v28 = vand.u32 4294901760, %v11178_v4  ;;  %v12893_v52 = vand.u32 4294901760, %v11183_v17  ;;  %8105 = vmatpush3.bf16.msra.mxu1 %v13352_v50  ;;  %v11222_v42 = vld [vmem:[%s12672_s3 + $0x240] sm:$0xff]  ;;  %v13361_v50 = vld [vmem:[#allocation19_spill] sm:$0xff]  ;;  %v11244_v33 = vld [vmem:[%s12672_s3 + $0x2d0] sm:$0xff]  ;;  %8067 = vmatprep.subr.bf16.mxu0 %v11090_v36 }
 0x3cc   : > { %13351 = vst [vmem:[#allocation26_spill] sm:$0xff] %v11192_v6  ;;  %v8146_v20 = vpack.c.bf16 %v4691_v16, %v4684_v54  ;;  %v13354_v3 = vand.u32 4294901760, %v13353_v0  ;;  %v13356_v39 = vand.u32 4294901760, %v13355_v43  ;;  %v11211_v37 = vpack.c.bf16 %v4579_v48, %v4572_v40  ;;  %8107 = vmatprep.subr.bf16.mxu1 %v13361_v50  ;;  %v11239_v48 = vld [vmem:[%s12672_s3 + $0x248] sm:$0xff] }
 0x3cd   : > { %v13358_v12 = vand.u32 4294901760, %v13357_v49  ;;  %v13360_v47 = vand.u32 4294901760, %v13359_v57  ;;  %v11225_v54 = vpack.c.bf16 %v4705_v35, %v4698_v5  ;;  %v13362_v16 = vand.u32 4294901760, %v11129_v8  ;;  %v11249_v35 = vld [vmem:[%s12672_s3 + $0x2d8] sm:$0xff] }
 0x3ce   : > { %v8074_v14 = vpack.c.bf16 %v13356_v39, %v13354_v3  ;;  %v13363_v49 = vand.u32 4294901760, %v11152_v31  ;;  %v13365_v5 = vand.u32 4294901760, %v11147_v38  ;;  %v13366_v0 = vand.u32 4294901760, %v11167_v59  ;;  %8069 = vmatpush3.bf16.msra.mxu0 %v11135_v51 }
 0x3cf   : > { %v11217_v2 = vpack.c.bf16 %v13360_v47, %v13358_v12  ;;  %v4718_v40 = vsub.f32 %v11129_v8, %v13362_v16  ;;  %v12897_v47 = vand.u32 4294901760, %v11199_v29  ;;  %v13368_v12 = vand.u32 4294901760, %v11172_v30  ;;  %8071 = vmatprep.subr.bf16.mxu0 %v11141_v9 }
 0x3d0   : > { %v11233_v57 = vsub.f32 %v11152_v31, %v13363_v49  ;;  %v11255_v39 = vsub.f32 %v11147_v38, %v13365_v5  ;;  %v11261_v43 = vsub.f32 %v11167_v59, %v13366_v0  ;;  %v11268_v16 = vpack.c.bf16 %v4593_v18, %v4586_v26  ;;  %v13372_v0 = vld [vmem:[#allocation20_spill] sm:$0xff] }
 0x3d1   : > { %v11266_v50 = vsub.f32 %v11172_v30, %v13368_v12  ;;  %v4712_v36 = vand.u32 4294901760, %v4711_v21  ;;  %v11273_v49 = vsub.f32 %v11178_v4, %v12894_v28  ;;  %v11278_v5 = vsub.f32 %v11183_v17, %v12893_v52  ;;  %8109 = vmatpush3.bf16.msra.mxu1 %v13372_v0  ;;  %v11288_v21 = vld [vmem:[%s12672_s3 + $0x250] sm:$0xff]  ;;  %v11293_v52 = vld [vmem:[%s12672_s3 + $0x258] sm:$0xff]  ;;  %v13373_v0 = vld [vmem:[#allocation35_spill] sm:$0xff] }
 0x3d2   : > { %13364 = vst [vmem:[#allocation27_spill] sm:$0xff] %v11233_v57  ;;  %13367 = vst [vmem:[#allocation11_spill] sm:$0xff] %v11261_v43  ;;  %8111 = vmatprep.subr.bf16.mxu1 %v13373_v0  ;;  %v4719_v28 = vand.u32 4294901760, %v4718_v40  ;;  %v13374_v12 = vand.u32 4294901760, %v10880_v10  ;;  %v13375_v26 = vand.u32 4294901760, %v10885_v53  ;;  %v11307_v38 = vsub.f32 %v11199_v29, %v12897_v47  ;;  %v13378_v10 = vld [vmem:[#allocation36_spill] sm:$0xff]  ;;  %8073 = vmatpush3.bf16.msra.mxu0 %v11158_v27 }
 0x3d3   : > { %13369 = vst [vmem:[#allocation34_spill] sm:$0xff] %v11266_v50  ;;  %13370 = vst [vmem:[#allocation28_spill] sm:$0xff] %v11273_v49  ;;  %v4600_v51 = vand.u32 4294901760, %v11255_v39  ;;  %v13377_v0 = vand.u32 4294901760, %v11192_v6  ;;  %v13379_v53 = vand.u32 4294901760, %v11222_v42  ;;  %v13381_v9 = vand.u32 4294901760, %v11244_v33  ;;  %8075 = vmatprep.subr.bf16.mxu0 %v8074_v14 }
 0x3d4   : > { %13371 = vst [vmem:[#allocation49_spill] sm:$0xff] %v11278_v5  ;;  %v11301_v18 = vpack.c.bf16 %v13375_v26, %v13374_v12  ;;  %13376 = vst [vmem:[#allocation50_spill] sm:$0xff] %v11307_v38  ;;  %v11319_v12 = vld [vmem:[%s12672_s3 + $0x2e0] sm:$0xff]  ;;  %v11324_v26 = vld [vmem:[%s12672_s3 + $0x2e8] sm:$0xff]  ;;  %v13384_v23 = vand.u32 4294901760, %v11261_v43  ;;  %v13385_v27 = vand.u32 4294901760, %v11266_v50 }
 0x3d5   : > { %v4606_v40 = vsub.f32 %v11192_v6, %v13377_v0  ;;  %8113 = vmatpush3.bf16.msra.mxu1 %v13378_v10  ;;  %v11334_v3 = vsub.f32 %v11222_v42, %v13379_v53  ;;  %v13380_v6 = vand.u32 4294901760, %v11239_v48  ;;  %v11344_v39 = vsub.f32 %v11244_v33, %v13381_v9 }
 0x3d6   : > { %v13382_v0 = vand.u32 4294901760, %v11249_v35  ;;  %8147 = vmatprep.subr.bf16.mxu1 %v8146_v20  ;;  %v8154_v10 = vpack.c.bf16 %v4719_v28, %v4712_v36  ;;  %v13383_v9 = vand.u32 4294901760, %v11233_v57  ;;  %v4613_v20 = vsub.f32 %v11266_v50, %v13385_v27  ;;  %8077 = vmatpush3.bf16.msra.mxu0 %v11217_v2 }
 0x3d7   : > { %v11339_v8 = vsub.f32 %v11239_v48, %v13380_v6  ;;  %v4607_v61 = vand.u32 4294901760, %v4606_v40  ;;  %v13387_v36 = vand.u32 4294901760, %v11273_v49  ;;  %v13388_v40 = vand.u32 4294901760, %v11278_v5 }
 0x3d8   : > { %v11349_v47 = vsub.f32 %v11249_v35, %v13382_v0  ;;  %v4725_v60 = vsub.f32 %v11233_v57, %v13383_v9  ;;  %v4732_v0 = vsub.f32 %v11261_v43, %v13384_v23  ;;  %6665 = vmatmul.mubr.msk.f32.vlgmr.msra.gmra.mrb[14].mxu1 %vm10700_vm5, %v13086_v24  ;;  %v13389_v6 = vand.u32 4294901760, %v11288_v21 }
 0x3d9   : > { %v4620_v14 = vsub.f32 %v11273_v49, %v13387_v36  ;;  %v4739_v9 = vsub.f32 %v11278_v5, %v13388_v40  ;;  %v13391_v44 = vand.u32 4294901760, %v11293_v52  ;;  %8149 = vmatpush3.bf16.msra.mxu1 %v11211_v37  ;;  %6666 = vmatprep.mubr.msk.f32.mxu1 %vm10827_vm6, %v13086_v24  ;;  %v13395_v49 = vand.u32 4294901760, %v11319_v12  ;;  %v13399_v5 = vld [vmem:[#allocation38_spill] sm:$0xff] }
 0x3da   : > { %v11376_v23 = vsub.f32 %v11288_v21, %v13389_v6  ;;  %8151 = vmatprep.subr.bf16.mxu1 %v11225_v54  ;;  %v13397_v36 = vand.u32 4294901760, %v11324_v26  ;;  %8079 = vmatprep.subr.bf16.mxu0 %v13399_v5  ;;  %v8156_v6 = vpack.c.bf16 %v4607_v61, %v4600_v51  ;;  %v13400_v2 = vand.u32 4294901760, %v10895_v15 }
 0x3db   : > { %v11381_v27 = vsub.f32 %v11293_v52, %v13391_v44  ;;  %v13394_v44 = vand.u32 4294901760, %v11307_v38  ;;  %v11399_v53 = vsub.f32 %v11319_v12, %v13395_v49  ;;  %v13401_v54 = vand.u32 4294901760, %v10900_v13 }
 0x3dc   : > { %13390 = vst [vmem:[#allocation51_spill] sm:$0xff] %v11376_v23  ;;  %v11404_v40 = vsub.f32 %v11324_v26, %v13397_v36  ;;  %v4614_v43 = vand.u32 4294901760, %v4613_v20  ;;  %v4621_v57 = vand.u32 4294901760, %v4620_v14  ;;  %v13402_v36 = vand.u32 4294901760, %v11334_v3  ;;  %v13406_v20 = vld [vmem:[#allocation43_spill] sm:$0xff] }
 0x3dd   : > { %13392 = vst [vmem:[#allocation19_spill] sm:$0xff] %v11381_v27  ;;  %v4746_v37 = vsub.f32 %v11307_v38, %v13394_v44  ;;  %13396 = vst [vmem:[#allocation20_spill] sm:$0xff] %v11399_v53  ;;  %v11411_v50 = vpack.c.bf16 %v13401_v54, %v13400_v2  ;;  %v4726_v44 = vand.u32 4294901760, %v4725_v60  ;;  %v4733_v38 = vand.u32 4294901760, %v4732_v0  ;;  %8153 = vmatpush3.bf16.msra.mxu1 %v11268_v16 }
 0x3de   : > { %13398 = vst [vmem:[#allocation35_spill] sm:$0xff] %v11404_v40  ;;  %v4627_v61 = vsub.f32 %v11334_v3, %v13402_v36  ;;  %v13403_v15 = vand.u32 4294901760, %v11339_v8  ;;  %v13404_v5 = vand.u32 4294901760, %v11344_v39  ;;  %v13405_v51 = vand.u32 4294901760, %v11349_v47  ;;  %8081 = vmatpush3.bf16.msra.mxu0 %v13406_v20  ;;  %8155 = vmatprep.subr.bf16.mxu1 %v8154_v10 }
 0x3df   : > { %v4740_v16 = vand.u32 4294901760, %v4739_v9  ;;  %v4747_v14 = vand.u32 4294901760, %v4746_v37  ;;  %v12924_v2 = vand.u32 4294901760, %v11399_v53  ;;  %8115 = vmatprep.subr.bf16.mxu0 %v11301_v18  ;;  %v4555_v36 = vand.u32 4294901760, %v11038_v1 }
 0x3e0   : > { %v4634_v13 = vsub.f32 %v11339_v8, %v13403_v15  ;;  %v4753_v60 = vsub.f32 %v11344_v39, %v13404_v5  ;;  %v4760_v0 = vsub.f32 %v11349_v47, %v13405_v51  ;;  %v8158_v15 = vpack.c.bf16 %v4733_v38, %v4726_v44 }
 0x3e1   : > { %v13407_v5 = vand.u32 4294901760, %v10905_v41  ;;  %v13408_v55 = vand.u32 4294901760, %v10912_v19  ;;  %v8160_v51 = vpack.c.bf16 %v4621_v57, %v4614_v43  ;;  %v13409_v10 = vand.u32 4294901760, %v10917_v45  ;;  %6663 = vmatmul.mubr.msk.f32.vlgmr.msra.gmra.mrb[14].mxu0 %vm10700_vm5, %v13086_v24  ;;  %8157 = vmatpush3.bf16.msra.mxu1 %v8156_v6 }
 0x3e2   : > { %v13410_v9 = vand.u32 4294901760, %v10947_v34  ;;  %v13411_v20 = vand.u32 4294901760, %v11376_v23  ;;  %v13412_v1 = vand.u32 4294901760, %v11381_v27  ;;  %v4635_v41 = vand.u32 4294901760, %v4634_v13  ;;  %8117 = vmatpush3.bf16.msra.mxu0 %v11411_v50  ;;  %4556 = vmatprep.mubr.f32.mxu0 %v4555_v36 }
 0x3e3   : > { %v11437_v49 = vpack.c.bf16 %v13408_v55, %v13407_v5  ;;  %v4628_v55 = vand.u32 4294901760, %v4627_v61  ;;  %v4754_v19 = vand.u32 4294901760, %v4753_v60  ;;  %v4761_v45 = vand.u32 4294901760, %v4760_v0  ;;  %8159 = vmatprep.subr.bf16.mxu1 %v8158_v15 }
 0x3e4   : > { %v11443_v37 = vpack.c.bf16 %v13410_v9, %v13409_v10  ;;  %v4641_v54 = vsub.f32 %v11376_v23, %v13411_v20  ;;  %v4648_v38 = vsub.f32 %v11381_v27, %v13412_v1  ;;  %v8162_v34 = vpack.c.bf16 %v4747_v14, %v4740_v16 }
 0x3e5   : > { %v4767_v57 = vsub.f32 %v11399_v53, %v12924_v2  ;;  %v13413_v43 = vand.u32 4294901760, %v11404_v40  ;;  %8119 = vmatprep.subr.bf16.mxu0 %v11437_v49  ;;  %v13414_v6 = vand.u32 4294901760, %v11003_v62  ;;  %v13415_v61 = vand.u32 4294901760, %v11033_v63  ;;  %8161 = vmatpush3.bf16.msra.mxu1 %v8160_v51 }
 0x3e6   : > { %v13416_v60 = vand.u32 4294901760, %v11054_v11  ;;  %v13417_v0 = vand.u32 4294901760, %v11104_v56  ;;  %v4642_v14 = vand.u32 4294901760, %v4641_v54  ;;  %v4649_v36 = vand.u32 4294901760, %v4648_v38  ;;  %8121 = vmatpush3.bf16.msra.mxu0 %v11443_v37  ;;  %8163 = vmatprep.subr.bf16.mxu1 %v8162_v34 }
 0x3e7   : > { %v4774_v44 = vsub.f32 %v11404_v40, %v13413_v43  ;;  %v11466_v13 = vpack.c.bf16 %v13415_v61, %v13414_v6  ;;  %v8164_v5 = vpack.c.bf16 %v4635_v41, %v4628_v55  ;;  %v8166_v10 = vpack.c.bf16 %v4761_v45, %v4754_v19 }
 0x3e8   : > { %v11472_v16 = vpack.c.bf16 %v13417_v0, %v13416_v60  ;;  %v13418_v15 = vand.u32 4294901760, %v10857_v32  ;;  %v13419_v62 = vand.u32 4294901760, %v10862_v58  ;;  %v4768_v11 = vand.u32 4294901760, %v4767_v57  ;;  %v13424_v57 = vld [vmem:[#allocation40_spill] sm:$0xff] }
 0x3e9   : > { %v4775_v56 = vand.u32 4294901760, %v4774_v44  ;;  %v13420_v20 = vand.u32 4294901760, %v10869_v22  ;;  %v13421_v51 = vand.u32 4294901760, %v10874_v25  ;;  %8123 = vmatprep.subr.bf16.mxu0 %v11466_v13  ;;  %v13422_v38 = vand.u32 4294901760, %v11152_v31  ;;  %8165 = vmatpush3.bf16.msra.mxu1 %v8164_v5 }
 0x3ea   : > { %v4655_v9 = vsub.f32 %v10857_v32, %v13418_v15  ;;  %v4662_v63 = vsub.f32 %v10862_v58, %v13419_v62  ;;  %v13423_v55 = vand.u32 4294901760, %v11167_v59  ;;  %v8168_v19 = vpack.c.bf16 %v4649_v36, %v4642_v14  ;;  %8125 = vmatpush3.bf16.msra.mxu0 %v11472_v16  ;;  %8167 = vmatprep.subr.bf16.mxu1 %v8166_v10 }
 0x3eb   : > { %v4781_v54 = vsub.f32 %v10869_v22, %v13420_v20  ;;  %v4788_v1 = vsub.f32 %v10874_v25, %v13421_v51  ;;  %v13425_v43 = vand.u32 4294901760, %v13424_v57  ;;  %v13426_v6 = vand.u32 4294901760, %v10929_v7  ;;  %v13432_v20 = vld [vmem:[#allocation10_spill] sm:$0xff] }
 0x3ec   : > { %v11492_v41 = vpack.c.bf16 %v13423_v55, %v13422_v38  ;;  %v4656_v45 = vand.u32 4294901760, %v4655_v9  ;;  %v4663_v34 = vand.u32 4294901760, %v4662_v63  ;;  %v13427_v31 = vand.u32 4294901760, %v11172_v30  ;;  %v13431_v30 = vld [vmem:[#allocation29_spill] sm:$0xff] }
 0x3ed   : > { %v4669_v44 = vsub.f32 %v13424_v57, %v13425_v43  ;;  %v4676_v61 = vsub.f32 %v10929_v7, %v13426_v6  ;;  %v13428_v59 = vand.u32 4294901760, %v11178_v4  ;;  %v8170_v0 = vpack.c.bf16 %v4775_v56, %v4768_v11  ;;  %8169 = vmatpush3.bf16.msra.mxu1 %v8168_v19 }
 0x3ee   : > { %v4782_v14 = vand.u32 4294901760, %v4781_v54  ;;  %v4789_v36 = vand.u32 4294901760, %v4788_v1  ;;  %8127 = vmatprep.subr.bf16.mxu0 %v11492_v41  ;;  %v13429_v5 = vand.u32 4294901760, %v11183_v17  ;;  %v13430_v15 = vand.u32 4294901760, %v11199_v29 }
 0x3ef   : > { %v11505_v60 = vpack.c.bf16 %v13428_v59, %v13427_v31  ;;  %v8172_v62 = vpack.c.bf16 %v4663_v34, %v4656_v45  ;;  %v4670_v10 = vand.u32 4294901760, %v4669_v44  ;;  %v4677_v63 = vand.u32 4294901760, %v4676_v61  ;;  %8171 = vmatprep.subr.bf16.mxu1 %v8170_v0  ;;  %v13454_v31 = vld [vmem:[#allocation33_spill] sm:$0xff] }
 0x3f0   : > { %v11512_v9 = vpack.c.bf16 %v13430_v15, %v13429_v5  ;;  %vm11516_vm7 = vcmp.eq.s32.totalorder %v13432_v20, %v13431_v30  ;;  %v13433_v4 = vmov 0  ;;  %v13436_v11 = vand.u32 4294901760, %v11222_v42  ;;  %v13460_v5 = vld [vmem:[#allocation37_spill] sm:$0xff] }
 0x3f1   : > { %v13434_v4 = vsel %vm11516_vm7, 4294967295, %v13433_v4  ;;  %8129 = vmatpush3.bf16.msra.mxu0 %v11505_v60  ;;  %v13437_v17 = vand.u32 4294901760, %v11239_v48  ;;  %v8174_v56 = vpack.c.bf16 %v4789_v36, %v4782_v14  ;;  %v13439_v54 = vand.u32 4294901760, %v11244_v33  ;;  %8173 = vmatpush3.bf16.msra.mxu1 %v8172_v62  ;;  %v13462_v62 = vld [vmem:[#allocation39_spill] sm:$0xff] }
 0x3f2   : > { %13435 = vst [vmem:[#allocation36_spill] sm:$0xff] %v13434_v4  ;;  %8131 = vmatprep.subr.bf16.mxu0 %v11512_v9  ;;  %v13440_v51 = vand.u32 4294901760, %v11249_v35  ;;  %v13442_v38 = vmov 0.0   ;;  %v8176_v19 = vpack.c.bf16 %v4677_v63, %v4670_v10  ;;  %v13443_v42 = vand.u32 4294901760, %v11288_v21  ;;  %v13449_v21 = vld [vmem:[#allocation8_spill] sm:$0xff] }
 0x3f3   : > { %v11525_v29 = vpack.c.bf16 %v13437_v17, %v13436_v11  ;;  %v6650_v55 = vsel %vm11516_vm7, 1.0, %v13442_v38  ;;  %8175 = vmatprep.subr.bf16.mxu1 %v8174_v56  ;;  %v13444_v48 = vand.u32 4294901760, %v11293_v52  ;;  %v13446_v35 = vand.u32 4294901760, %v11319_v12  ;;  %v13451_v52 = vld [vmem:[#allocation32_spill] sm:$0xff]  ;;  %v13465_v17 = vld [vmem:[#allocation45_spill] sm:$0xff] }
 0x3f4   : > { %v11532_v1 = vpack.c.bf16 %v13440_v51, %v13439_v54  ;;  %v11545_v33 = vsub.f32 %v6650_v55, %v6650_v55  ;;  %v13447_v34 = vand.u32 4294901760, %v11324_v26  ;;  %v13450_v44 = vand.u32 4294901760, %v13449_v21  ;;  %v13456_v12 = vld [vmem:[#allocation16_spill] sm:$0xff]  ;;  %v13466_v54 = vld [vmem:[#allocation46_spill] sm:$0xff]  ;;  %v13467_v51 = vld [vmem:[#allocation47_spill] sm:$0xff] }
 0x3f5   : > { %13438 = vst [vmem:[#allocation38_spill] sm:$0xff] %v11525_v29  ;;  %8133 = vmatpush3.bf16.msra.mxu0 %v11525_v29  ;;  %v11542_v45 = vpack.c.bf16 %v13444_v48, %v13443_v42  ;;  %8177 = vmatpush3.bf16.msra.mxu1 %v8176_v19  ;;  %v13452_v6 = vand.u32 4294901760, %v13451_v52  ;;  %v13455_v59 = vand.u32 4294901760, %v13454_v31  ;;  %v13457_v0 = vand.u32 4294901760, %v13456_v12  ;;  %v13464_v11 = vld [vmem:[#allocation44_spill] sm:$0xff]  ;;  %v13471_v21 = vld [vmem:[#allocation9_spill] sm:$0xff] }
 0x3f6   : > { %13441 = vst [vmem:[#allocation43_spill] sm:$0xff] %v11532_v1  ;;  %8135 = vmatprep.subr.bf16.mxu0 %v11532_v1  ;;  %v11551_v43 = vpack.c.bf16 %v13447_v34, %v13446_v35  ;;  %8211 = vmatprep.subr.bf16.mxu1 %v11301_v18  ;;  %v12925_v14 = vand.u32 4294901760, %v11545_v33  ;;  %v13459_v36 = vand.u32 4294901760, %v10907_v46  ;;  %v13461_v15 = vand.u32 4294901760, %v13460_v5  ;;  %v13468_v42 = vld [vmem:[#allocation48_spill] sm:$0xff]  ;;  %v13470_v34 = vld [vmem:[#allocation25_spill] sm:$0xff] }
 0x3f7   : > { %13445 = vst [vmem:[#allocation40_spill] sm:$0xff] %v11542_v45  ;;  %v11559_v61 = vpack.c.bf16 %v13452_v6, %v13450_v44  ;;  %v11566_v26 = vpack.c.bf16 %v13457_v0, %v13455_v59  ;;  %v13463_v10 = vand.u32 4294901760, %v13462_v62  ;;  %v8178_v56 = vpack.c.bf16 %v13465_v17, %v13464_v11  ;;  %v13469_v48 = vld [vmem:[#allocation24_spill] sm:$0xff]  ;;  %v13472_v52 = vld [vmem:[#allocation14_spill] sm:$0xff]  ;;  %v13473_v6 = vld [vmem:[#allocation15_spill] sm:$0xff] }
 0x3f8   : > { %13448 = vst [vmem:[#allocation10_spill] sm:$0xff] %v11551_v43  ;;  %6667 = vmatmul.mubr.msk.f32.vlgmr.msra.gmra.mrb[16].mxu1 %vm11516_vm7, %v13086_v24  ;;  %v4560_v20 = vsub.f32 %v11545_v33, %v12925_v14  ;;  %v8180_v55 = vpack.c.bf16 %v13467_v51, %v13466_v54  ;;  %v8182_v35 = vpack.c.bf16 %v13469_v48, %v13468_v42  ;;  %v13474_v59 = vld [vmem:[#allocation18_spill] sm:$0xff]  ;;  %v13479_v62 = vld [vmem:[#allocation28_spill] sm:$0xff]  ;;  %v13486_v14 = vld [vmem:[#allocation13_spill] sm:$0xff]  ;;  %v13487_v28 = vmov 0 }
 0x3f9   : > { %8137 = vmatpush3.bf16.msra.mxu0 %v11542_v45  ;;  %13453 = vst [vmem:[#allocation8_spill] sm:$0xff] %v11559_v61  ;;  %13458 = vst [vmem:[#allocation32_spill] sm:$0xff] %v11566_v26  ;;  %8213 = vmatpush3.bf16.msra.mxu1 %v11411_v50  ;;  %v11581_v63 = vpack.c.bf16 %v13463_v10, %v13461_v15  ;;  %v8184_v44 = vpack.c.bf16 %v13471_v21, %v13470_v34  ;;  %v13475_v12 = vld [vmem:[#allocation26_spill] sm:$0xff]  ;;  %v11654_v4 = vld [vmem:[%s12672_s3 + $0x3f0] sm:$0xff] }
 0x3fa   : > { %8139 = vmatprep.subr.bf16.mxu0 %v11551_v43  ;;  %5036 = vmatprep.mubr.f32.mxu1 %v13459_v36  ;;  %v4561_v19 = vand.u32 4294901760, %v4560_v20  ;;  %v8186_v31 = vpack.c.bf16 %v13473_v6, %v13472_v52  ;;  %v8188_v0 = vpack.c.bf16 %v13475_v12, %v13474_v59  ;;  %v13476_v36 = vld [vmem:[#allocation27_spill] sm:$0xff]  ;;  %v13478_v15 = vld [vmem:[#allocation34_spill] sm:$0xff]  ;;  %vm11638_vm8 = vcmp.eq.s32.totalorder %v13486_v14, %v13431_v30 }
 0x3fb   : > { %8215 = vmatprep.subr.bf16.mxu1 %v11437_v49  ;;  %v8192_v10 = vpack.c.bf16 %v13479_v62, %v13478_v15  ;;  %v11616_v20 = vld [vmem:[%s12672_s3 + $0x3e0] sm:$0xff]  ;;  %v13488_v28 = vsel %vm11638_vm8, 4294967295, %v13487_v28  ;;  %v8198_v14 = vpack.c.bf16 %v11349_v47, %v11344_v39  ;;  %13490 = vst [vmem:[#allocation45_spill] sm:$0xff] %v11654_v4  ;;  %v6653_v30 = vsel %vm11638_vm8, 1.0, %v13442_v38 }
 0x3fc   : > { %13480 = vst [vmem:[#allocation33_spill] sm:$0xff] %v11616_v20  ;;  %13489 = vst [vmem:[#allocation44_spill] sm:$0xff] %v13488_v28 }
 0x3fd   : > { %8141 = vmatpush3.bf16.msra.mxu0 %v11559_v61  ;;  %8217 = vmatpush3.bf16.msra.mxu1 %v11443_v37 }
 0x3fe   : > { %8143 = vmatprep.subr.bf16.mxu0 %v11566_v26  ;;  %8219 = vmatprep.subr.bf16.mxu1 %v11466_v13 }
 0x401   : > { %8145 = vmatpush3.bf16.msra.mxu0 %v11581_v63  ;;  %8221 = vmatpush3.bf16.msra.mxu1 %v11472_v16 }
 0x402   : > { %8179 = vmatprep.subr.bf16.mxu0 %v8178_v56  ;;  %8223 = vmatprep.subr.bf16.mxu1 %v11492_v41  ;;  %v6765_v56 = vpop.f32.mrb[4].mxu1 }
 0x403   : > { %v6766_v2 = vpop.f32.mrb[5].mxu1 }
 0x404   : > { %4562 = vmatmul.mubr.f32.vlgmr.msra.gmra.mrb[16].mxu0 %v4561_v19  ;;  %v13482_v19 = vld [vmem:[#allocation50_spill] sm:$0xff] }
 0x405   : > { %8181 = vmatpush3.bf16.msra.mxu0 %v8180_v55  ;;  %4929 = vmatprep.mubr.f32.mxu0 %v10907_v46  ;;  %v13477_v46 = vld [vmem:[#allocation11_spill] sm:$0xff]  ;;  %v13481_v55 = vld [vmem:[#allocation49_spill] sm:$0xff] }
 0x406   : > { %8183 = vmatprep.subr.bf16.mxu0 %v8182_v35  ;;  %8225 = vmatpush3.bf16.msra.mxu1 %v11505_v60  ;;  %v8190_v5 = vpack.c.bf16 %v13477_v46, %v13476_v36  ;;  %v8194_v35 = vpack.c.bf16 %v13482_v19, %v13481_v55 }
 0x407   : > { %8227 = vmatprep.subr.bf16.mxu1 %v11512_v9 }
 0x409   : > { %8185 = vmatpush3.bf16.msra.mxu0 %v8184_v44  ;;  %v11623_v44 = vld [vmem:[%s12672_s3 + $0x3e8] sm:$0xff] }
 0x40a   : > { %8187 = vmatprep.subr.bf16.mxu0 %v8186_v31  ;;  %8229 = vmatpush3.bf16.msra.mxu1 %v11525_v29  ;;  %13483 = vst [vmem:[#allocation16_spill] sm:$0xff] %v11623_v44  ;;  %v11628_v31 = vld [vmem:[%s12672_s3 + $0x360] sm:$0xff]  ;;  %v8202_v29 = vpack.c.bf16 %v11404_v40, %v11399_v53 }
 0x40b   : > { %8231 = vmatprep.subr.bf16.mxu1 %v11532_v1  ;;  %13484 = vst [vmem:[#allocation37_spill] sm:$0xff] %v11628_v31  ;;  %v8196_v1 = vpack.c.bf16 %v11339_v8, %v11334_v3  ;;  %v13496_v38 = vand.u32 4294901760, %v11628_v31 }
 0x40d   : > { %8189 = vmatpush3.bf16.msra.mxu0 %v8188_v0  ;;  %v11633_v0 = vld [vmem:[%s12672_s3 + $0x368] sm:$0xff]  ;;  %v11698_v28 = vsub.f32 %v11628_v31, %v13496_v38  ;;  %v8204_v31 = vpack.c.bf16 %v10862_v58, %v10857_v32  ;;  %v11737_v32 = vld [vmem:[%s12672_s3 + $0x390] sm:$0xff] }
 0x40e   : > { %8191 = vmatprep.subr.bf16.mxu0 %v8190_v5  ;;  %13485 = vst [vmem:[#allocation39_spill] sm:$0xff] %v11633_v0  ;;  %v6767_v5 = vadd.f32 %v6766_v2, %v6765_v56  ;;  %8233 = vmatpush3.bf16.msra.mxu1 %v11542_v45  ;;  %v11664_v2 = vld [vmem:[%s12672_s3 + $0x370] sm:$0xff]  ;;  %v8200_v56 = vpack.c.bf16 %v11381_v27, %v11376_v23  ;;  %v13495_v27 = vand.u32 4294901760, %v11623_v44 }
 0x40f   : > { %8235 = vmatprep.subr.bf16.mxu1 %v11551_v43  ;;  %13492 = vst [vmem:[#allocation47_spill] sm:$0xff] %v11664_v2  ;;  %v13494_v43 = vand.u32 4294901760, %v11616_v20  ;;  %v11709_v23 = vsub.f32 %v6653_v30, %v6653_v30  ;;  %v11725_v30 = vld [vmem:[%s12672_s3 + $0x300] sm:$0xff] }
 0x410   : > { %v11693_v40 = vsub.f32 %v11623_v44, %v13495_v27  ;;  %v6730_v44 = vpop.f32.mrb[4].mxu0 }
 0x411   : > { %8193 = vmatpush3.bf16.msra.mxu0 %v8192_v10  ;;  %v11659_v10 = vld [vmem:[%s12672_s3 + $0x3f8] sm:$0xff]  ;;  %v11682_v45 = vsub.f32 %v11616_v20, %v13494_v43  ;;  %v13497_v43 = vand.u32 4294901760, %v11633_v0  ;;  %v12946_v20 = vand.u32 4294901760, %v11654_v4  ;;  %13499 = vst [vmem:[#allocation25_spill] sm:$0xff] %v11709_v23  ;;  %v6731_v38 = vpop.f32.mrb[5].mxu0 }
 0x412   : > { %8195 = vmatprep.subr.bf16.mxu0 %v8194_v35  ;;  %13491 = vst [vmem:[#allocation46_spill] sm:$0xff] %v11659_v10  ;;  %v11669_v35 = vld [vmem:[%s12672_s3 + $0x378] sm:$0xff]  ;;  %8237 = vmatpush3.bf16.msra.mxu1 %v11559_v61  ;;  %v11688_v61 = vld [vmem:[%s12672_s3 + $0x380] sm:$0xff] }
 0x413   : > { %13493 = vst [vmem:[#allocation48_spill] sm:$0xff] %v11669_v35  ;;  %8239 = vmatprep.subr.bf16.mxu1 %v11566_v26  ;;  %v6732_v26 = vadd.f32 %v6731_v38, %v6730_v44  ;;  %v11750_v44 = vsub.f32 %v11654_v4, %v12946_v20  ;;  %v13503_v20 = vand.u32 4294901760, %v11545_v33 }
 0x415   : > { %8197 = vmatpush3.bf16.msra.mxu0 %v8196_v1  ;;  %v11703_v1 = vsub.f32 %v11633_v0, %v13497_v43  ;;  %v11719_v43 = vld [vmem:[%s12672_s3 + $0x388] sm:$0xff]  ;;  %v11767_v27 = vadd.f32 %v6767_v5, %v6732_v26  ;;  %v13505_v0 = vand.u32 4294901760, %v11693_v40  ;;  %v11788_v5 = vld [vmem:[%s12672_s3 + $0x310] sm:$0xff]  ;;  %v13511_v26 = vand.u32 4294901760, %v13464_v11 }
 0x416   : > { %8199 = vmatprep.subr.bf16.mxu0 %v8198_v14  ;;  %8241 = vmatpush3.bf16.msra.mxu1 %v11581_v63  ;;  %v8206_v14 = vpack.c.bf16 %v10874_v25, %v10869_v22  ;;  %v11732_v25 = vld [vmem:[%s12672_s3 + $0x308] sm:$0xff]  ;;  %v13501_v22 = vand.u32 4294901760, %v11664_v2 }
 0x417   : > { %13498 = vst [vmem:[#allocation24_spill] sm:$0xff] %v11703_v1  ;;  %8275 = vmatprep.subr.bf16.mxu1 %v11301_v18  ;;  %v11745_v18 = vld [vmem:[%s12672_s3 + $0x398] sm:$0xff] }
 0x418   : > { %v11760_v53 = vsub.f32 %v11664_v2, %v13501_v22  ;;  %v13513_v2 = vand.u32 4294901760, %v11688_v61 }
 0x419   : > { %8201 = vmatpush3.bf16.msra.mxu0 %v8200_v56  ;;  %v13500_v56 = vand.u32 4294901760, %v11659_v10  ;;  %5040 = vmatmul.mubr.f32.vlgmr.msra.gmra.mrb[18].mxu1 %v13503_v20  ;;  %v8208_v20 = vpack.c.bf16 %v10929_v7, %v13424_v57  ;;  %v13515_v57 = vand.u32 4294901760, %v11719_v43 }
 0x41a   : > { %8203 = vmatprep.subr.bf16.mxu0 %v8202_v29  ;;  %v13502_v29 = vand.u32 4294901760, %v11669_v35  ;;  %8277 = vmatpush3.bf16.msra.mxu1 %v11411_v50  ;;  %v11812_v50 = vsub.f32 %v11688_v61, %v13513_v2 }
 0x41b   : > { %v11755_v38 = vsub.f32 %v11659_v10, %v13500_v56  ;;  %v13504_v10 = vand.u32 4294901760, %v11682_v45  ;;  %6670 = vmatprep.mubr.msk.f32.mxu1 %vm10827_vm6, %v13086_v24  ;;  %v13509_v56 = vand.u32 4294901760, %v11703_v1  ;;  %8279 = vmatprep.subr.bf16.mxu1 %v11437_v49  ;;  %v11822_v11 = vsub.f32 %v11719_v43, %v13515_v57 }
 0x41c   : > { %v11765_v58 = vsub.f32 %v11669_v35, %v13502_v29  ;;  %13514 = vst [vmem:[#allocation15_spill] sm:$0xff] %v11812_v50  ;;  %v13521_v1 = vand.u32 4294901760, %v11737_v32 }
 0x41d   : > { %v11777_v22 = vpack.c.bf16 %v13505_v0, %v13504_v10  ;;  %v11793_v0 = vld [vmem:[%s12672_s3 + $0x318] sm:$0xff]  ;;  %v13508_v10 = vand.u32 4294901760, %v11698_v28  ;;  %8205 = vmatpush3.bf16.msra.mxu0 %v8204_v31  ;;  %v12955_v31 = vand.u32 4294901760, %v11750_v44  ;;  %v12954_v49 = vand.u32 4294901760, %v11755_v38  ;;  %13516 = vst [vmem:[#allocation18_spill] sm:$0xff] %v11822_v11 }
 0x41e   : > { %8207 = vmatprep.subr.bf16.mxu0 %v8206_v14  ;;  %v12956_v7 = vand.u32 4294901760, %v11765_v58  ;;  %8281 = vmatpush3.bf16.msra.mxu1 %v11443_v37  ;;  %v11840_v57 = vsub.f32 %v11737_v32, %v13521_v1  ;;  %v13526_v1 = vand.u32 4294901760, %v13467_v51  ;;  %v13527_v14 = vand.u32 4294901760, %v11745_v18 }
 0x41f   : > { %13506 = vst [vmem:[#allocation9_spill] sm:$0xff] %v11777_v22  ;;  %v11800_v4 = vpack.c.bf16 %v13509_v56, %v13508_v10  ;;  %v13512_v22 = vand.u32 4294901760, %v13465_v17  ;;  %v12957_v56 = vand.u32 4294901760, %v11760_v53  ;;  %v13517_v17 = vand.u32 4294901760, %v11725_v30  ;;  %8283 = vmatprep.subr.bf16.mxu1 %v11466_v13  ;;  %v11871_v13 = vld [vmem:[%s12672_s3 + $0x3a0] sm:$0xff] }
 0x420   : > { %13522 = vst [vmem:[#allocation11_spill] sm:$0xff] %v11840_v57  ;;  %v13531_v51 = vand.u32 4294901760, %v11709_v23 }
 0x421   : > { %13510 = vst [vmem:[#allocation14_spill] sm:$0xff] %v11800_v4  ;;  %v8242_v35 = vpack.c.bf16 %v13512_v22, %v13511_v26  ;;  %v11827_v2 = vsub.f32 %v11725_v30, %v13517_v17  ;;  %v13519_v26 = vand.u32 4294901760, %v11732_v25  ;;  %v11846_v17 = vpack.c.bf16 %v12954_v49, %v12955_v31  ;;  %8209 = vmatpush3.bf16.msra.mxu0 %v8208_v20 }
 0x422   : > { %v11852_v37 = vpack.c.bf16 %v12956_v7, %v12957_v56  ;;  %v11862_v4 = vsub.f32 %v11745_v18, %v13527_v14  ;;  %v13529_v49 = vand.u32 4294901760, %v13468_v42  ;;  %v13530_v31 = vand.u32 4294901760, %v13469_v48  ;;  %8285 = vmatpush3.bf16.msra.mxu1 %v11472_v16 }
 0x423   : > { %13518 = vst [vmem:[#allocation26_spill] sm:$0xff] %v11827_v2  ;;  %v11835_v10 = vsub.f32 %v11732_v25, %v13519_v26  ;;  %13523 = vst [vmem:[#allocation34_spill] sm:$0xff] %v11846_v17  ;;  %v13525_v26 = vand.u32 4294901760, %v13466_v54  ;;  %8243 = vmatprep.subr.bf16.mxu0 %v8242_v35  ;;  %v11876_v54 = vld [vmem:[%s12672_s3 + $0x3a8] sm:$0xff]  ;;  %v11881_v20 = vsub.f32 %v11709_v23, %v13531_v51  ;;  %v13532_v42 = vand.u32 4294901760, %v13470_v34 }
 0x424   : > { %13524 = vst [vmem:[#allocation28_spill] sm:$0xff] %v11852_v37  ;;  %13528 = vst [vmem:[#allocation49_spill] sm:$0xff] %v11862_v4  ;;  %v8246_v7 = vpack.c.bf16 %v13530_v31, %v13529_v49  ;;  %v13533_v48 = vand.u32 4294901760, %v13471_v21  ;;  %v12959_v31 = vand.u32 4294901760, %v11812_v50  ;;  %v13534_v49 = vand.u32 4294901760, %v11788_v5  ;;  %4932 = vmatmul.mubr.f32.vlgmr.msra.gmra.mrb[18].mxu0 %v11545_v33  ;;  %8287 = vmatprep.subr.bf16.mxu1 %v11492_v41 }
 0x425   : > { %13520 = vst [vmem:[#allocation27_spill] sm:$0xff] %v11835_v10  ;;  %v8244_v22 = vpack.c.bf16 %v13526_v1, %v13525_v26  ;;  %v13536_v26 = vand.u32 4294901760, %v11793_v0  ;;  %6668 = vmatprep.mubr.msk.f32.mxu0 %vm10827_vm6, %v13086_v24  ;;  %v13538_v16 = vand.u32 4294901760, %v13472_v52  ;;  %v13539_v33 = vand.u32 4294901760, %v13473_v6 }
 0x426   : > { %v8248_v35 = vpack.c.bf16 %v13533_v48, %v13532_v42  ;;  %v11891_v14 = vsub.f32 %v11788_v5, %v13534_v49  ;;  %v11907_v48 = vld [vmem:[%s12672_s3 + $0x320] sm:$0xff]  ;;  %v12960_v42 = vand.u32 4294901760, %v11876_v54  ;;  %v13541_v51 = vand.u32 4294901760, %v13475_v12  ;;  %v11940_v12 = vld [vmem:[%s12672_s3 + $0x328] sm:$0xff]  ;;  %8289 = vmatpush3.bf16.msra.mxu1 %v11505_v60 }
 0x427   : > { %v11896_v1 = vsub.f32 %v11793_v0, %v13536_v26  ;;  %8245 = vmatpush3.bf16.msra.mxu0 %v8244_v22  ;;  %v8250_v49 = vpack.c.bf16 %v13539_v33, %v13538_v16  ;;  %v12958_v26 = vand.u32 4294901760, %v11862_v4  ;;  %v13540_v22 = vand.u32 4294901760, %v13474_v59  ;;  %8291 = vmatprep.subr.bf16.mxu1 %v11512_v9 }
 0x428   : > { %13535 = vst [vmem:[#allocation50_spill] sm:$0xff] %v11891_v14  ;;  %8247 = vmatprep.subr.bf16.mxu0 %v8246_v7  ;;  %v13542_v34 = vand.u32 4294901760, %v13476_v36  ;;  %v13543_v52 = vand.u32 4294901760, %v13477_v46  ;;  %v13544_v16 = vand.u32 4294901760, %v13478_v15  ;;  %v13545_v33 = vand.u32 4294901760, %v13479_v62 }
 0x429   : > { %13537 = vst [vmem:[#allocation13_spill] sm:$0xff] %v11896_v1  ;;  %v8252_v21 = vpack.c.bf16 %v13541_v51, %v13540_v22  ;;  %v5545_v41 = vsub.f32 %v11812_v50, %v12959_v31  ;;  %v13546_v46 = vand.u32 4294901760, %v11822_v11  ;;  %v13547_v62 = vand.u32 4294901760, %v11827_v2 }
 0x42a   : > { %v8254_v6 = vpack.c.bf16 %v13543_v52, %v13542_v34  ;;  %v8256_v56 = vpack.c.bf16 %v13545_v33, %v13544_v16  ;;  %v13548_v51 = vand.u32 4294901760, %v11835_v10  ;;  %v13549_v52 = vand.u32 4294901760, %v11840_v57 }
 0x42b   : > { %v5552_v15 = vsub.f32 %v11822_v11, %v13546_v46  ;;  %v5433_v34 = vsub.f32 %v11827_v2, %v13547_v62  ;;  %8249 = vmatpush3.bf16.msra.mxu0 %v8248_v35  ;;  %v5566_v60 = vsub.f32 %v11862_v4, %v12958_v26  ;;  %v13550_v33 = vand.u32 4294901760, %v11871_v13  ;;  %v13574_v4 = vld [vmem:[#allocation35_spill] sm:$0xff] }
 0x42c   : > { %v5440_v22 = vsub.f32 %v11835_v10, %v13548_v51  ;;  %v11956_v16 = vsub.f32 %v11840_v57, %v13549_v52  ;;  %v11970_v62 = vsub.f32 %v11876_v54, %v12960_v42  ;;  %8251 = vmatprep.subr.bf16.mxu0 %v8250_v49  ;;  %v13553_v51 = vand.u32 4294901760, %v13481_v55  ;;  %v13559_v49 = vld [vmem:[#allocation51_spill] sm:$0xff] }
 0x42d   : > { %v11965_v46 = vsub.f32 %v11871_v13, %v13550_v33  ;;  %v13554_v35 = vand.u32 4294901760, %v13482_v19  ;;  %v13555_v52 = vand.u32 4294901760, %v11334_v3  ;;  %v13556_v26 = vand.u32 4294901760, %v11339_v8  ;;  %v13561_v55 = vld [vmem:[#allocation19_spill] sm:$0xff] }
 0x42e   : > { %13552 = vst [vmem:[#allocation53_spill] sm:$0xff] %v11970_v62  ;;  %v13557_v33 = vand.u32 4294901760, %v11344_v39  ;;  %v13558_v36 = vand.u32 4294901760, %v11349_v47  ;;  %v13560_v7 = vand.u32 4294901760, %v13559_v49  ;;  %v13562_v29 = vand.u32 4294901760, %v13561_v55 }
 0x42f   : > { %13551 = vst [vmem:[#allocation52_spill] sm:$0xff] %v11965_v46  ;;  %v8258_v9 = vpack.c.bf16 %v13554_v35, %v13553_v51  ;;  %v11980_v31 = vpack.c.bf16 %v13556_v26, %v13555_v52  ;;  %v13563_v3 = vand.u32 4294901760, %v11891_v14  ;;  %v13564_v26 = vand.u32 4294901760, %v11896_v1  ;;  %v12009_v51 = vld [vmem:[%s12672_s3 + $0x3b0] sm:$0xff]  ;;  %v13567_v35 = vld [vmem:[#allocation38_spill] sm:$0xff]  ;;  %8253 = vmatpush3.bf16.msra.mxu0 %v8252_v21 }
 0x430   : > { %v11986_v59 = vpack.c.bf16 %v13558_v36, %v13557_v33  ;;  %v11993_v19 = vpack.c.bf16 %v13562_v29, %v13560_v7  ;;  %v13565_v47 = vand.u32 4294901760, %v11907_v48  ;;  %v12014_v29 = vld [vmem:[%s12672_s3 + $0x3b8] sm:$0xff]  ;;  %v12019_v7 = vld [vmem:[%s12672_s3 + $0x330] sm:$0xff]  ;;  %8293 = vmatpush3.bf16.msra.mxu1 %v13567_v35  ;;  %v5546_v52 = vand.u32 4294901760, %v5545_v41  ;;  %v6835_v35 = vpop.f32.mrb[6].mxu1  ;;  %8255 = vmatprep.subr.bf16.mxu0 %v8254_v6  ;;  %v12047_v6 = vld [vmem:[%s12672_s3 + $0x3c8] sm:$0xff] }
 0x431   : > { %v5447_v8 = vsub.f32 %v11891_v14, %v13563_v3  ;;  %v5454_v39 = vsub.f32 %v11896_v1, %v13564_v26  ;;  %v5553_v33 = vand.u32 4294901760, %v5552_v15  ;;  %v5434_v49 = vand.u32 4294901760, %v5433_v34  ;;  %v12025_v3 = vld [vmem:[%s12672_s3 + $0x338] sm:$0xff]  ;;  %v13568_v26 = vld [vmem:[#allocation43_spill] sm:$0xff]  ;;  %v13572_v1 = vld [vmem:[#allocation20_spill] sm:$0xff] }
 0x432   : > { %v12004_v36 = vsub.f32 %v11907_v48, %v13565_v47  ;;  %v5441_v55 = vand.u32 4294901760, %v5440_v22  ;;  %8295 = vmatprep.subr.bf16.mxu1 %v13568_v26  ;;  %v5560_v47 = vand.u32 4294901760, %v11956_v16  ;;  %v5567_v42 = vand.u32 4294901760, %v5566_v60  ;;  %v12042_v16 = vld [vmem:[%s12672_s3 + $0x3c0] sm:$0xff]  ;;  %v6836_v60 = vpop.f32.mrb[7].mxu1  ;;  %v13571_v22 = vld [vmem:[#allocation40_spill] sm:$0xff] }
 0x433   : > { %v13569_v41 = vand.u32 4294901760, %v11940_v12  ;;  %v5448_v26 = vand.u32 4294901760, %v5447_v8  ;;  %v12051_v21 = vadd.f32 %v6836_v60, %v6835_v35  ;;  %v8338_v37 = vpack.c.bf16 %v5553_v33, %v5546_v52  ;;  %v12063_v8 = vld [vmem:[%s12672_s3 + $0x340] sm:$0xff]  ;;  %8257 = vmatpush3.bf16.msra.mxu0 %v8256_v56  ;;  %v12082_v56 = vld [vmem:[%s12672_s3 + $0x3d0] sm:$0xff]  ;;  %v12087_v33 = vld [vmem:[%s12672_s3 + $0x3d8] sm:$0xff] }
 0x434   : > { %13566 = vst [vmem:[#allocation51_spill] sm:$0xff] %v12004_v36  ;;  %v12978_v17 = vand.u32 4294901760, %v12004_v36  ;;  %8297 = vmatpush3.bf16.msra.mxu1 %v13571_v22  ;;  %v13573_v14 = vand.u32 4294901760, %v13572_v1  ;;  %v13575_v57 = vand.u32 4294901760, %v13574_v4  ;;  %v12058_v2 = vpack.c.bf16 %v5441_v55, %v5434_v49  ;;  %13580 = vst [vmem:[#allocation43_spill] sm:$0xff] %v12082_v56  ;;  %8259 = vmatprep.subr.bf16.mxu0 %v8258_v9 }
 0x435   : > { %v12034_v15 = vsub.f32 %v11940_v12, %v13569_v41  ;;  %v5455_v41 = vand.u32 4294901760, %v5454_v39  ;;  %v13576_v39 = vld [vmem:[#allocation10_spill] sm:$0xff]  ;;  %v13577_v35 = vand.u32 4294901760, %v11965_v46  ;;  %v13578_v52 = vand.u32 4294901760, %v11970_v62 }
 0x436   : > { %v8266_v10 = vpack.c.bf16 %v13575_v57, %v13573_v14  ;;  %8299 = vmatprep.subr.bf16.mxu1 %v13576_v39  ;;  %v12077_v14 = vld [vmem:[%s12672_s3 + $0x348] sm:$0xff]  ;;  %v13581_v55 = vand.u32 4294901760, %v12009_v51  ;;  %v13582_v39 = vand.u32 4294901760, %v12014_v29  ;;  %v8342_v4 = vpack.c.bf16 %v5567_v42, %v5560_v47  ;;  %v12123_v47 = vld [vmem:[%s12672_s3 + $0x350] sm:$0xff] }
 0x437   : > { %13570 = vst [vmem:[#allocation19_spill] sm:$0xff] %v12034_v15  ;;  %v5573_v22 = vsub.f32 %v11965_v46, %v13577_v35  ;;  %v5580_v1 = vsub.f32 %v11970_v62, %v13578_v52  ;;  %13579 = vst [vmem:[#allocation38_spill] sm:$0xff] %v12077_v14  ;;  %v13584_v52 = vand.u32 4294901760, %v12019_v7  ;;  %v12105_v34 = vpack.c.bf16 %v5455_v41, %v5448_v26  ;;  %v13588_v62 = vld [vmem:[#allocation8_spill] sm:$0xff]  ;;  %v12128_v26 = vld [vmem:[%s12672_s3 + $0x358] sm:$0xff] }
 0x438   : > { %v12093_v60 = vsub.f32 %v12009_v51, %v13581_v55  ;;  %v12098_v35 = vsub.f32 %v12014_v29, %v13582_v39  ;;  %v5461_v9 = vsub.f32 %v12004_v36, %v12978_v17  ;;  %v13586_v55 = vand.u32 4294901760, %v12025_v3  ;;  %8301 = vmatpush3.bf16.msra.mxu1 %v13588_v62  ;;  %8261 = vmatpush3.bf16.msra.mxu0 %v11980_v31  ;;  %v13589_v62 = vld [vmem:[#allocation32_spill] sm:$0xff]  ;;  %v6800_v36 = vpop.f32.mrb[6].mxu0 }
 0x439   : > { %v12103_v57 = vsub.f32 %v12019_v7, %v13584_v52  ;;  %8303 = vmatprep.subr.bf16.mxu1 %v13589_v62  ;;  %v5574_v41 = vand.u32 4294901760, %v5573_v22  ;;  %v13590_v17 = vand.u32 4294901760, %v12042_v16  ;;  %v13592_v52 = vand.u32 4294901760, %v12047_v6  ;;  %8263 = vmatprep.subr.bf16.mxu0 %v11986_v59  ;;  %v6801_v23 = vpop.f32.mrb[7].mxu0 }
 0x43a   : > { %13583 = vst [vmem:[#allocation40_spill] sm:$0xff] %v12098_v35  ;;  %v12113_v49 = vsub.f32 %v12025_v3, %v13586_v55  ;;  %v5581_v55 = vand.u32 4294901760, %v5580_v1  ;;  %v13593_v39 = vand.u32 4294901760, %v12034_v15  ;;  %v13594_v59 = vand.u32 4294901760, %v12063_v8 }
 0x43b   : > { %13585 = vst [vmem:[#allocation20_spill] sm:$0xff] %v12103_v57  ;;  %v12135_v42 = vsub.f32 %v12042_v16, %v13590_v17  ;;  %v12140_v46 = vsub.f32 %v12047_v6, %v13592_v52  ;;  %v5462_v17 = vand.u32 4294901760, %v5461_v9  ;;  %v13595_v22 = vand.u32 4294901760, %v12077_v14 }
 0x43c   : > { %13587 = vst [vmem:[#allocation35_spill] sm:$0xff] %v12113_v49  ;;  %v5468_v31 = vsub.f32 %v12034_v15, %v13593_v39  ;;  %8305 = vmatpush3.bf16.msra.mxu1 %v11581_v63  ;;  %v12156_v39 = vsub.f32 %v12063_v8, %v13594_v59  ;;  %v13596_v9 = vand.u32 4294901760, %v12082_v56  ;;  %v13597_v52 = vand.u32 4294901760, %v12087_v33  ;;  %8265 = vmatpush3.bf16.msra.mxu0 %v11993_v19 }
 0x43d   : > { %13591 = vst [vmem:[#allocation10_spill] sm:$0xff] %v12135_v42  ;;  %v12161_v1 = vsub.f32 %v12077_v14, %v13595_v22  ;;  %v6802_v63 = vadd.f32 %v6801_v23, %v6800_v36  ;;  %8339 = vmatprep.subr.bf16.mxu1 %v8338_v37  ;;  %v8346_v59 = vpack.c.bf16 %v5581_v55, %v5574_v41  ;;  %v12997_v62 = vand.u32 4294901760, %v12135_v42  ;;  %v13606_v22 = vld [vmem:[#allocation41_spill] sm:$0xff] }
 0x43e   : > { %v12166_v11 = vsub.f32 %v12082_v56, %v13596_v9  ;;  %v12171_v50 = vsub.f32 %v12087_v33, %v13597_v52  ;;  %8267 = vmatprep.subr.bf16.mxu0 %v8266_v10  ;;  %v5469_v15 = vand.u32 4294901760, %v5468_v31  ;;  %v13598_v14 = vand.u32 4294901760, %v12093_v60 }
 0x43f   : > { %v13599_v56 = vand.u32 4294901760, %v12098_v35  ;;  %v13600_v23 = vand.u32 4294901760, %v12103_v57  ;;  %v3210_v37 = vadd.f32 %v6802_v63, %v11767_v27  ;;  %6671 = vmatmul.mubr.msk.f32.vlgmr.msra.gmra.mrb[20].mxu1 %vm11516_vm7, %v13086_v24  ;;  %v13602_v10 = vand.u32 4294901760, %v12113_v49  ;;  %v13608_v63 = vld [vmem:[#allocation42_spill] sm:$0xff] }
 0x440   : > { %v5587_v9 = vsub.f32 %v12093_v60, %v13598_v14  ;;  %v13603_v14 = vand.u32 4294901760, %v12123_v47  ;;  %8341 = vmatpush3.bf16.msra.mxu1 %v12058_v2  ;;  %6672 = vmatprep.mubr.msk.f32.mxu1 %vm11638_vm8, %v13086_v24  ;;  %v13607_v2 = vand.u32 4294901760, %v12140_v46 }
 0x441   : > { %v5594_v52 = vsub.f32 %v12098_v35, %v13599_v56  ;;  %v5475_v19 = vsub.f32 %v12103_v57, %v13600_v23  ;;  %v5482_v41 = vsub.f32 %v12113_v49, %v13602_v10  ;;  %v13604_v56 = vand.u32 4294901760, %v12128_v26  ;;  %8269 = vmatpush3.bf16.msra.mxu0 %v13606_v22  ;;  %8343 = vmatprep.subr.bf16.mxu1 %v8342_v4 }
 0x442   : > { %v12195_v55 = vsub.f32 %v12123_v47, %v13603_v14  ;;  %v5608_v27 = vsub.f32 %v12140_v46, %v13607_v2  ;;  %v12218_v49 = vadd.f32 %v12051_v21, %v3210_v37  ;;  %8271 = vmatprep.subr.bf16.mxu0 %v13608_v63  ;;  %v13609_v10 = vand.u32 4294901760, %v11688_v61 }
 0x443   : > { %v12200_v31 = vsub.f32 %v12128_v26, %v13604_v56  ;;  %v5601_v56 = vsub.f32 %v12135_v42, %v12997_v62  ;;  %v13610_v14 = vand.u32 4294901760, %v11719_v43  ;;  %v8348_v4 = vpack.c.bf16 %v5469_v15, %v5462_v17 }
 0x444   : > { %v5588_v22 = vand.u32 4294901760, %v5587_v9  ;;  %v5595_v57 = vand.u32 4294901760, %v5594_v52  ;;  %v5476_v35 = vand.u32 4294901760, %v5475_v19  ;;  %v5483_v62 = vand.u32 4294901760, %v5482_v41  ;;  %8345 = vmatpush3.bf16.msra.mxu1 %v12105_v34  ;;  %v13615_v19 = vld [vmem:[#allocation23_spill] sm:$0xff] }
 0x445   : > { %v12225_v23 = vpack.c.bf16 %v13610_v14, %v13609_v10  ;;  %v13000_v42 = vand.u32 4294901760, %v12195_v55  ;;  %v13611_v21 = vand.u32 4294901760, %v12156_v39  ;;  %v13612_v61 = vand.u32 4294901760, %v12161_v1  ;;  %8273 = vmatpush3.bf16.msra.mxu0 %v13615_v19  ;;  %8347 = vmatprep.subr.bf16.mxu1 %v8346_v59 }
 0x446   : > { %v13613_v15 = vand.u32 4294901760, %v12166_v11  ;;  %v13614_v9 = vand.u32 4294901760, %v12171_v50  ;;  %v13616_v34 = vand.u32 4294901760, %v11725_v30  ;;  %v13617_v41 = vand.u32 4294901760, %v11732_v25 }
 0x447   : > { %v5489_v37 = vsub.f32 %v12156_v39, %v13611_v21  ;;  %v5496_v43 = vsub.f32 %v12161_v1, %v13612_v61  ;;  %v5602_v10 = vand.u32 4294901760, %v5601_v56  ;;  %v5609_v14 = vand.u32 4294901760, %v5608_v27  ;;  %8307 = vmatprep.subr.bf16.mxu0 %v12225_v23 }
 0x448   : > { %v5615_v17 = vsub.f32 %v12166_v11, %v13613_v15  ;;  %v5622_v52 = vsub.f32 %v12171_v50, %v13614_v9  ;;  %v12247_v63 = vpack.c.bf16 %v13617_v41, %v13616_v34  ;;  %v5417_v21 = vand.u32 4294901760, %v11881_v20  ;;  %6669 = vmatmul.mubr.msk.f32.vlgmr.msra.gmra.mrb[20].mxu0 %vm11516_vm7, %v13086_v24  ;;  %8349 = vmatpush3.bf16.msra.mxu1 %v8348_v4 }
 0x449   : > { %v8350_v61 = vpack.c.bf16 %v5595_v57, %v5588_v22  ;;  %v13618_v15 = vand.u32 4294901760, %v11737_v32  ;;  %v13619_v9 = vand.u32 4294901760, %v11745_v18  ;;  %v8352_v59 = vpack.c.bf16 %v5483_v62, %v5476_v35 }
 0x44a   : > { %v13620_v30 = vand.u32 4294901760, %v11788_v5  ;;  %v13621_v25 = vand.u32 4294901760, %v11793_v0  ;;  %v5503_v27 = vsub.f32 %v12195_v55, %v13000_v42  ;;  %v13622_v20 = vand.u32 4294901760, %v12200_v31  ;;  %8309 = vmatpush3.bf16.msra.mxu0 %v12247_v63  ;;  %5418 = vmatprep.mubr.f32.mxu0 %v5417_v21 }
 0x44b   : > { %v12255_v2 = vpack.c.bf16 %v13619_v9, %v13618_v15  ;;  %v5490_v32 = vand.u32 4294901760, %v5489_v37  ;;  %v5497_v18 = vand.u32 4294901760, %v5496_v43  ;;  %v5616_v5 = vand.u32 4294901760, %v5615_v17  ;;  %8351 = vmatprep.subr.bf16.mxu1 %v8350_v61 }
 0x44c   : > { %v12261_v19 = vpack.c.bf16 %v13621_v25, %v13620_v30  ;;  %v5510_v57 = vsub.f32 %v12200_v31, %v13622_v20  ;;  %v5623_v35 = vand.u32 4294901760, %v5622_v52  ;;  %v8354_v0 = vpack.c.bf16 %v5609_v14, %v5602_v10  ;;  %8353 = vmatpush3.bf16.msra.mxu1 %v8352_v59 }
 0x44d   : > { %v13623_v62 = vand.u32 4294901760, %v11682_v45  ;;  %v13624_v22 = vand.u32 4294901760, %v11693_v40  ;;  %8311 = vmatprep.subr.bf16.mxu0 %v12255_v2  ;;  %v13625_v4 = vand.u32 4294901760, %v11871_v13  ;;  %v13626_v37 = vand.u32 4294901760, %v11876_v54  ;;  %v13630_v13 = vld [vmem:[#allocation24_spill] sm:$0xff] }
 0x44e   : > { %v13627_v17 = vand.u32 4294901760, %v11907_v48  ;;  %v13628_v52 = vand.u32 4294901760, %v11940_v12  ;;  %v5504_v10 = vand.u32 4294901760, %v5503_v27  ;;  %v5511_v14 = vand.u32 4294901760, %v5510_v57  ;;  %8313 = vmatpush3.bf16.msra.mxu0 %v12261_v19  ;;  %8355 = vmatprep.subr.bf16.mxu1 %v8354_v0 }
 0x44f   : > { %v5629_v56 = vsub.f32 %v11682_v45, %v13623_v62  ;;  %v5636_v34 = vsub.f32 %v11693_v40, %v13624_v22  ;;  %v12284_v43 = vpack.c.bf16 %v13626_v37, %v13625_v4  ;;  %v8356_v21 = vpack.c.bf16 %v5497_v18, %v5490_v32 }
 0x450   : > { %v12290_v41 = vpack.c.bf16 %v13628_v52, %v13627_v17  ;;  %v8358_v15 = vpack.c.bf16 %v5623_v35, %v5616_v5  ;;  %v13629_v61 = vand.u32 4294901760, %v11698_v28  ;;  %v13631_v30 = vand.u32 4294901760, %v13630_v13 }
 0x451   : > { %v5630_v48 = vand.u32 4294901760, %v5629_v56  ;;  %v5637_v12 = vand.u32 4294901760, %v5636_v34  ;;  %v13632_v25 = vand.u32 4294901760, %v11750_v44  ;;  %v13633_v59 = vand.u32 4294901760, %v11755_v38  ;;  %8315 = vmatprep.subr.bf16.mxu0 %v12284_v43  ;;  %8357 = vmatpush3.bf16.msra.mxu1 %v8356_v21 }
 0x452   : > { %v5517_v9 = vsub.f32 %v11698_v28, %v13629_v61  ;;  %v5524_v54 = vsub.f32 %v13630_v13, %v13631_v30  ;;  %v13634_v57 = vand.u32 4294901760, %v12009_v51  ;;  %v13635_v32 = vand.u32 4294901760, %v12014_v29  ;;  %8317 = vmatpush3.bf16.msra.mxu0 %v12290_v41  ;;  %8359 = vmatprep.subr.bf16.mxu1 %v8358_v15  ;;  %v13642_v15 = vld [vmem:[#allocation29_spill] sm:$0xff]  ;;  %v13643_v30 = vld [vmem:[#allocation12_spill] sm:$0xff] }
 0x453   : > { %v5643_v27 = vsub.f32 %v11750_v44, %v13632_v25  ;;  %v5650_v20 = vsub.f32 %v11755_v38, %v13633_v59  ;;  %v8360_v5 = vpack.c.bf16 %v5511_v14, %v5504_v10  ;;  %v13636_v62 = vand.u32 4294901760, %v11760_v53  ;;  %v6905_v10 = vpop.f32.mrb[8].mxu1 }
 0x454   : > { %v12310_v18 = vpack.c.bf16 %v13635_v32, %v13634_v57  ;;  %v5518_v35 = vand.u32 4294901760, %v5517_v9  ;;  %v5525_v0 = vand.u32 4294901760, %v5524_v54  ;;  %v13637_v22 = vand.u32 4294901760, %v11765_v58  ;;  %v6906_v9 = vpop.f32.mrb[9].mxu1 }
 0x455   : > { %v5531_v56 = vsub.f32 %v11760_v53, %v13636_v62  ;;  %v13638_v51 = vand.u32 4294901760, %v12019_v7  ;;  %v13639_v29 = vand.u32 4294901760, %v12025_v3  ;;  %v8362_v37 = vpack.c.bf16 %v5637_v12, %v5630_v48  ;;  %8361 = vmatpush3.bf16.msra.mxu1 %v8360_v5 }
 0x456   : > { %v5538_v34 = vsub.f32 %v11765_v58, %v13637_v22  ;;  %v5644_v17 = vand.u32 4294901760, %v5643_v27  ;;  %v5651_v52 = vand.u32 4294901760, %v5650_v20  ;;  %8319 = vmatprep.subr.bf16.mxu0 %v12310_v18  ;;  %v13640_v14 = vand.u32 4294901760, %v12042_v16  ;;  %v13649_v20 = vld [vmem:[#allocation43_spill] sm:$0xff] }
 0x457   : > { %v12323_v4 = vpack.c.bf16 %v13639_v29, %v13638_v51  ;;  %v13641_v21 = vand.u32 4294901760, %v12047_v6  ;;  %vm12334_vm9 = vcmp.eq.s32.totalorder %v13643_v30, %v13642_v15  ;;  %v6907_v3 = vadd.f32 %v6906_v9, %v6905_v10  ;;  %8363 = vmatprep.subr.bf16.mxu1 %v8362_v37  ;;  %v13647_v6 = vld [vmem:[#allocation38_spill] sm:$0xff]  ;;  %v13657_v29 = vld [vmem:[#allocation16_spill] sm:$0xff]  ;;  %v13663_v30 = vld [vmem:[#allocation45_spill] sm:$0xff] }
 0x458   : > { %v8364_v54 = vpack.c.bf16 %v5525_v0, %v5518_v35  ;;  %v5532_v48 = vand.u32 4294901760, %v5531_v56  ;;  %v5539_v12 = vand.u32 4294901760, %v5538_v34  ;;  %v13646_v16 = vand.u32 4294901760, %v12063_v8  ;;  %v13655_v34 = vld [vmem:[#allocation33_spill] sm:$0xff] }
 0x459   : > { %v12330_v61 = vpack.c.bf16 %v13641_v21, %v13640_v14  ;;  %8321 = vmatpush3.bf16.msra.mxu0 %v12323_v4  ;;  %v13648_v25 = vand.u32 4294901760, %v13647_v6  ;;  %v8366_v59 = vpack.c.bf16 %v5651_v52, %v5644_v17  ;;  %v13650_v57 = vand.u32 4294901760, %v13649_v20  ;;  %v6870_v52 = vpop.f32.mrb[8].mxu0  ;;  %v13661_v21 = vld [vmem:[#allocation39_spill] sm:$0xff] }
 0x45a   : > { %v13651_v32 = vand.u32 4294901760, %v12087_v33  ;;  %v13652_v35 = vmov 0.0   ;;  %8365 = vmatpush3.bf16.msra.mxu1 %v8364_v54  ;;  %v8368_v62 = vpack.c.bf16 %v5539_v12, %v5532_v48  ;;  %v13653_v8 = vand.u32 4294901760, %v12123_v47  ;;  %v6871_v10 = vpop.f32.mrb[9].mxu0  ;;  %v13659_v47 = vld [vmem:[#allocation37_spill] sm:$0xff]  ;;  %v13665_v48 = vld [vmem:[#allocation46_spill] sm:$0xff] }
 0x45b   : > { %v12343_v27 = vpack.c.bf16 %v13648_v25, %v13646_v16  ;;  %8323 = vmatprep.subr.bf16.mxu0 %v12330_v61  ;;  %v6652_v0 = vsel %vm12334_vm9, 1.0, %v13652_v35  ;;  %8367 = vmatprep.subr.bf16.mxu1 %v8366_v59  ;;  %v13654_v56 = vand.u32 4294901760, %v12128_v26  ;;  %v13656_v51 = vand.u32 4294901760, %v13655_v34  ;;  %v13667_v59 = vld [vmem:[#allocation25_spill] sm:$0xff]  ;;  %v13673_v34 = vld [vmem:[#allocation15_spill] sm:$0xff] }
 0x45c   : > { %v12350_v5 = vpack.c.bf16 %v13651_v32, %v13650_v57  ;;  %v12363_v33 = vsub.f32 %v6652_v0, %v6652_v0  ;;  %v13658_v37 = vand.u32 4294901760, %v13657_v29  ;;  %v6872_v14 = vadd.f32 %v6871_v10, %v6870_v52  ;;  %v13669_v57 = vld [vmem:[#allocation47_spill] sm:$0xff]  ;;  %v13671_v0 = vld [vmem:[#allocation48_spill] sm:$0xff] }
 0x45d   : > { %8325 = vmatpush3.bf16.msra.mxu0 %v12343_v27  ;;  %v12360_v22 = vpack.c.bf16 %v13654_v56, %v13653_v8  ;;  %v13660_v26 = vand.u32 4294901760, %v13659_v47  ;;  %v13662_v9 = vand.u32 4294901760, %v13661_v21  ;;  %v13664_v54 = vand.u32 4294901760, %v13663_v30  ;;  %v13676_v52 = vld [vmem:[#allocation27_spill] sm:$0xff]  ;;  %v13678_v47 = vld [vmem:[#allocation49_spill] sm:$0xff]  ;;  %v13679_v21 = vld [vmem:[#allocation50_spill] sm:$0xff] }
 0x45e   : > { %8327 = vmatprep.subr.bf16.mxu0 %v12350_v5  ;;  %v12369_v17 = vpack.c.bf16 %v13658_v37, %v13656_v51  ;;  %8369 = vmatpush3.bf16.msra.mxu1 %v8368_v62  ;;  %v13666_v12 = vand.u32 4294901760, %v13665_v48  ;;  %v13001_v6 = vand.u32 4294901760, %v12363_v33  ;;  %v3486_v25 = vadd.f32 %v6872_v14, %v12218_v49  ;;  %v13674_v51 = vld [vmem:[#allocation18_spill] sm:$0xff]  ;;  %v13682_v48 = vld [vmem:[#allocation53_spill] sm:$0xff] }
 0x45f   : > { %8403 = vmatprep.subr.bf16.mxu1 %v12225_v23  ;;  %v12377_v15 = vpack.c.bf16 %v13662_v9, %v13660_v26  ;;  %v13668_v20 = vand.u32 4294901760, %v13667_v59  ;;  %v13670_v32 = vand.u32 4294901760, %v13669_v57  ;;  %v13672_v62 = vand.u32 4294901760, %v13671_v0  ;;  %v13675_v37 = vld [vmem:[#allocation26_spill] sm:$0xff]  ;;  %v13680_v9 = vld [vmem:[#allocation13_spill] sm:$0xff]  ;;  %v13686_v0 = vld [vmem:[#allocation20_spill] sm:$0xff] }
 0x460   : > { %v12384_v16 = vpack.c.bf16 %v13666_v12, %v13664_v54  ;;  %v3590_v49 = vadd.f32 %v6907_v3, %v3486_v25  ;;  %v5422_v56 = vsub.f32 %v12363_v33, %v13001_v6  ;;  %v8370_v29 = vpack.c.bf16 %v13674_v51, %v13673_v34  ;;  %v13677_v3 = vld [vmem:[#allocation11_spill] sm:$0xff]  ;;  %v13681_v54 = vld [vmem:[#allocation52_spill] sm:$0xff] }
 0x461   : > { %8329 = vmatpush3.bf16.msra.mxu0 %v12360_v22  ;;  %6673 = vmatmul.mubr.msk.f32.vlgmr.msra.gmra.mrb[22].mxu1 %vm12334_vm9, %v13086_v24  ;;  %v12400_v8 = vpack.c.bf16 %v13672_v62, %v13670_v32  ;;  %v8372_v10 = vpack.c.bf16 %v13676_v52, %v13675_v37  ;;  %v8374_v26 = vpack.c.bf16 %v13678_v47, %v13677_v3  ;;  %v13683_v25 = vld [vmem:[#allocation51_spill] sm:$0xff] }
 0x462   : > { %8331 = vmatprep.subr.bf16.mxu0 %v12369_v17  ;;  %8405 = vmatpush3.bf16.msra.mxu1 %v12247_v63  ;;  %v5423_v14 = vand.u32 4294901760, %v5422_v56  ;;  %v8376_v30 = vpack.c.bf16 %v13680_v9, %v13679_v21  ;;  %v8378_v12 = vpack.c.bf16 %v13682_v48, %v13681_v54  ;;  %v13687_v62 = vld [vmem:[#allocation35_spill] sm:$0xff]  ;;  %v8398_v42 = vpack.c.bf16 %v11755_v38, %v11750_v44 }
 0x463   : > { %5898 = vmatprep.mubr.f32.mxu1 %v13668_v20  ;;  %8407 = vmatprep.subr.bf16.mxu1 %v12255_v2  ;;  %v13684_v20 = vld [vmem:[#allocation19_spill] sm:$0xff]  ;;  %v8384_v56 = vpack.c.bf16 %v13687_v62, %v13686_v0  ;;  %v13691_v44 = vand.u32 4294901760, %v13673_v34  ;;  %v13692_v38 = vand.u32 4294901760, %v13674_v51  ;;  %v13700_v34 = vand.u32 4294901760, %v13682_v48 }
 0x464   : > { %v8380_v57 = vpack.c.bf16 %v13684_v20, %v13683_v25  ;;  %v13702_v51 = vand.u32 4294901760, %v13684_v20 }
 0x465   : > { %8333 = vmatpush3.bf16.msra.mxu0 %v12377_v15 }
 0x466   : > { %8335 = vmatprep.subr.bf16.mxu0 %v12384_v16  ;;  %8409 = vmatpush3.bf16.msra.mxu1 %v12261_v19 }
 0x467   : > { %8411 = vmatprep.subr.bf16.mxu1 %v12284_v43 }
 0x469   : > { %8337 = vmatpush3.bf16.msra.mxu0 %v12400_v8 }
 0x46a   : > { %8371 = vmatprep.subr.bf16.mxu0 %v8370_v29  ;;  %8413 = vmatpush3.bf16.msra.mxu1 %v12290_v41  ;;  %v6975_v29 = vpop.f32.mrb[10].mxu1 }
 0x46b   : > { %8415 = vmatprep.subr.bf16.mxu1 %v12310_v18 }
 0x46c   : > { %5424 = vmatmul.mubr.f32.vlgmr.msra.gmra.mrb[22].mxu0 %v5423_v14 }
 0x46d   : > { %8373 = vmatpush3.bf16.msra.mxu0 %v8372_v10  ;;  %5791 = vmatprep.mubr.f32.mxu0 %v13667_v59  ;;  %v13685_v59 = vld [vmem:[#allocation40_spill] sm:$0xff]  ;;  %v13688_v10 = vld [vmem:[#allocation10_spill] sm:$0xff] }
 0x46e   : > { %8375 = vmatprep.subr.bf16.mxu0 %v8374_v26  ;;  %8417 = vmatpush3.bf16.msra.mxu1 %v12323_v4  ;;  %v8382_v32 = vpack.c.bf16 %v13685_v59, %v12093_v60  ;;  %v8386_v14 = vpack.c.bf16 %v12140_v46, %v13688_v10  ;;  %v6976_v26 = vpop.f32.mrb[11].mxu1 }
 0x46f   : > { %8419 = vmatprep.subr.bf16.mxu1 %v12330_v61 }
 0x471   : > { %8377 = vmatpush3.bf16.msra.mxu0 %v8376_v30  ;;  %v6977_v30 = vadd.f32 %v6976_v26, %v6975_v29  ;;  %v6940_v29 = vpop.f32.mrb[10].mxu0 }
 0x472   : > { %8379 = vmatprep.subr.bf16.mxu0 %v8378_v12  ;;  %8421 = vmatpush3.bf16.msra.mxu1 %v12343_v27  ;;  %v8388_v12 = vpack.c.bf16 %v12161_v1, %v12156_v39  ;;  %v6941_v26 = vpop.f32.mrb[11].mxu0 }
 0x473   : > { %8423 = vmatprep.subr.bf16.mxu1 %v12350_v5 }
 0x475   : > { %8381 = vmatpush3.bf16.msra.mxu0 %v8380_v57  ;;  %v8390_v57 = vpack.c.bf16 %v12171_v50, %v12166_v11 }
 0x476   : > { %8383 = vmatprep.subr.bf16.mxu0 %v8382_v32  ;;  %8425 = vmatpush3.bf16.msra.mxu1 %v12360_v22  ;;  %v8392_v32 = vpack.c.bf16 %v12200_v31, %v12195_v55 }
 0x477   : > { %8427 = vmatprep.subr.bf16.mxu1 %v12369_v17 }
 0x479   : > { %8385 = vmatpush3.bf16.msra.mxu0 %v8384_v56  ;;  %v8394_v56 = vpack.c.bf16 %v11693_v40, %v11682_v45 }
 0x47a   : > { %8387 = vmatprep.subr.bf16.mxu0 %v8386_v14  ;;  %8429 = vmatpush3.bf16.msra.mxu1 %v12377_v15  ;;  %v6942_v14 = vadd.f32 %v6941_v26, %v6940_v29 }
 0x47b   : > { %8431 = vmatprep.subr.bf16.mxu1 %v12384_v16 }
 0x47c   : > { %v3702_v6 = vadd.f32 %v6942_v14, %v3590_v49  ;;  %v13699_v49 = vand.u32 4294901760, %v13681_v54  ;;  %v13708_v54 = vand.u32 4294901760, %v12140_v46  ;;  %v13713_v46 = vand.u32 4294901760, %v12195_v55 }
 0x47d   : > { %8389 = vmatpush3.bf16.msra.mxu0 %v8388_v12  ;;  %v8396_v12 = vpack.c.bf16 %v13630_v13, %v11698_v28  ;;  %v8400_v28 = vpack.c.bf16 %v11765_v58, %v11760_v53  ;;  %v13694_v13 = vand.u32 4294901760, %v13676_v52  ;;  %v13695_v53 = vand.u32 4294901760, %v13677_v3 }
 0x47e   : > { %8391 = vmatprep.subr.bf16.mxu0 %v8390_v57  ;;  %8433 = vmatpush3.bf16.msra.mxu1 %v12400_v8  ;;  %v13689_v57 = vand.u32 4294901760, %v12363_v33  ;;  %v3934_v45 = vadd.f32 %v6977_v30, %v3702_v6  ;;  %v13696_v58 = vand.u32 4294901760, %v13678_v47  ;;  %v13703_v52 = vand.u32 4294901760, %v12093_v60  ;;  %v13720_v30 = vld [vmem:[#allocation28_spill] sm:$0xff] }
 0x47f   : > { %8467 = vmatprep.subr.bf16.mxu1 %v12225_v23  ;;  %v8434_v23 = vpack.c.bf16 %v13692_v38, %v13691_v44 }
 0x481   : > { %8393 = vmatpush3.bf16.msra.mxu0 %v8392_v32  ;;  %5902 = vmatmul.mubr.f32.vlgmr.msra.gmra.mrb[24].mxu1 %v13689_v57 }
 0x482   : > { %8395 = vmatprep.subr.bf16.mxu0 %v8394_v56  ;;  %8469 = vmatpush3.bf16.msra.mxu1 %v12247_v63  ;;  %v13693_v63 = vand.u32 4294901760, %v13675_v37  ;;  %v8592_v56 = vld [vmem:[%s8865_s15] sm:$0xff]  ;;  %s6692_s15 = sshll.u32 %s8749_s25, 7 }
 0x483   : > { %6676 = vmatprep.mubr.msk.f32.mxu1 %vm11638_vm8, %v13086_v24  ;;  %8471 = vmatprep.subr.bf16.mxu1 %v12255_v2  ;;  %s12595_s13 = scalar_lea.hbm %s12673_s4, %s6692_s15 }
 0x484   : > { %v8436_v2 = vpack.c.bf16 %v13694_v13, %v13693_v63 }
 0x485   : > { %8397 = vmatpush3.bf16.msra.mxu0 %v8396_v12 }
 0x486   : > { %8399 = vmatprep.subr.bf16.mxu0 %v8398_v42  ;;  %8473 = vmatpush3.bf16.msra.mxu1 %v12261_v19  ;;  %v8438_v42 = vpack.c.bf16 %v13696_v58, %v13695_v53  ;;  %v13697_v19 = vand.u32 4294901760, %v13679_v21  ;;  %v7045_v21 = vpop.f32.mrb[12].mxu1 }
 0x487   : > { %8475 = vmatprep.subr.bf16.mxu1 %v12284_v43  ;;  %v13698_v43 = vand.u32 4294901760, %v13680_v9  ;;  %v13707_v9 = vand.u32 4294901760, %v13688_v10  ;;  %v7046_v48 = vpop.f32.mrb[13].mxu1 }
 0x489   : > { %8401 = vmatpush3.bf16.msra.mxu0 %v8400_v28  ;;  %v8440_v6 = vpack.c.bf16 %v13698_v43, %v13697_v19  ;;  %v8450_v60 = vpack.c.bf16 %v13708_v54, %v13707_v9 }
 0x48a   : > { %8435 = vmatprep.subr.bf16.mxu0 %v8434_v23  ;;  %8477 = vmatpush3.bf16.msra.mxu1 %v12290_v41  ;;  %v13701_v41 = vand.u32 4294901760, %v13683_v25  ;;  %v7047_v25 = vadd.f32 %v7046_v48, %v7045_v21 }
 0x48b   : > { %8479 = vmatprep.subr.bf16.mxu1 %v12310_v18  ;;  %v13704_v18 = vand.u32 4294901760, %v13685_v59  ;;  %v13711_v59 = vand.u32 4294901760, %v12166_v11  ;;  %v13716_v11 = vld [vmem:[#allocation9_spill] sm:$0xff] }
 0x48c   : > { %5794 = vmatmul.mubr.f32.vlgmr.msra.gmra.mrb[24].mxu0 %v12363_v33  ;;  %v8442_v33 = vpack.c.bf16 %v13700_v34, %v13699_v49  ;;  %v8444_v37 = vpack.c.bf16 %v13702_v51, %v13701_v41 }
 0x48d   : > { %8437 = vmatpush3.bf16.msra.mxu0 %v8436_v2  ;;  %6674 = vmatprep.mubr.msk.f32.mxu0 %vm11638_vm8, %v13086_v24  ;;  %v8446_v3 = vpack.c.bf16 %v13704_v18, %v13703_v52 }
 0x48e   : > { %8439 = vmatprep.subr.bf16.mxu0 %v8438_v42  ;;  %8481 = vmatpush3.bf16.msra.mxu1 %v12323_v4  ;;  %v13705_v4 = vand.u32 4294901760, %v13686_v0  ;;  %v13712_v0 = vand.u32 4294901760, %v12171_v50 }
 0x48f   : > { %8483 = vmatprep.subr.bf16.mxu1 %v12330_v61  ;;  %v13706_v61 = vand.u32 4294901760, %v13687_v62 }
 0x490   : > { %v8454_v62 = vpack.c.bf16 %v13712_v0, %v13711_v59 }
 0x491   : > { %8441 = vmatpush3.bf16.msra.mxu0 %v8440_v6  ;;  %v8448_v47 = vpack.c.bf16 %v13706_v61, %v13705_v4 }
 0x492   : > { %8443 = vmatprep.subr.bf16.mxu0 %v8442_v33  ;;  %8485 = vmatpush3.bf16.msra.mxu1 %v12343_v27  ;;  %v13709_v27 = vand.u32 4294901760, %v12156_v39  ;;  %v7010_v39 = vpop.f32.mrb[12].mxu0 }
 0x493   : > { %8487 = vmatprep.subr.bf16.mxu1 %v12350_v5  ;;  %v13710_v5 = vand.u32 4294901760, %v12161_v1  ;;  %v7011_v1 = vpop.f32.mrb[13].mxu0 }
 0x494   : > { %v7012_v10 = vadd.f32 %v7011_v1, %v7010_v39 }
 0x495   : > { %8445 = vmatpush3.bf16.msra.mxu0 %v8444_v37  ;;  %v8452_v20 = vpack.c.bf16 %v13710_v5, %v13709_v27 }
 0x496   : > { %8447 = vmatprep.subr.bf16.mxu0 %v8446_v3  ;;  %8489 = vmatpush3.bf16.msra.mxu1 %v12360_v22  ;;  %v13714_v22 = vand.u32 4294901760, %v12200_v31  ;;  %v13718_v31 = vld [vmem:[#allocation14_spill] sm:$0xff] }
 0x497   : > { %8491 = vmatprep.subr.bf16.mxu1 %v12369_v17 }
 0x498   : > { %v8456_v17 = vpack.c.bf16 %v13714_v22, %v13713_v46 }
 0x499   : > { %8449 = vmatpush3.bf16.msra.mxu0 %v8448_v47 }
 0x49a   : > { %8451 = vmatprep.subr.bf16.mxu0 %v8450_v60  ;;  %8493 = vmatpush3.bf16.msra.mxu1 %v12377_v15  ;;  %v4072_v15 = vadd.f32 %v7012_v10, %v3934_v45 }
 0x49b   : > { %8495 = vmatprep.subr.bf16.mxu1 %v12384_v16 }
 0x49c   : > { %v4180_v16 = vadd.f32 %v7047_v25, %v4072_v15 }
 0x49d   : > { %8453 = vmatpush3.bf16.msra.mxu0 %v8452_v20 }
 0x49e   : > { %8455 = vmatprep.subr.bf16.mxu0 %v8454_v62  ;;  %8497 = vmatpush3.bf16.msra.mxu1 %v12400_v8  ;;  %v13719_v8 = vld [vmem:[#allocation34_spill] sm:$0xff] }
 0x49f   : > { %6681 = vmatprep.subr.msk.mxu1 %vm10390_vm4, %v13086_v24 }
 0x4a1   : > { %8457 = vmatpush3.bf16.msra.mxu0 %v8456_v17  ;;  %6677 = vmatmul.mubr.msk.f32.vlgmr.msra.gmra.mrb[26].mxu1 %vm12334_vm9, %v13086_v24 }
 0x4a2   : > { %8459 = vmatprep.subr.bf16.mxu0 %v13716_v11  ;;  %6682 = vmatpush1.msk.msra.mxu1 %vm10700_vm5, %v13086_v24 }
 0x4a3   : > { %6333 = vmatprep.mubr.f32.mxu1 %v13652_v35  ;;  %6687 = vmatprep.subr.msk.mxu1 %vm11638_vm8, %v13086_v24 }
 0x4a5   : > { %8461 = vmatpush3.bf16.msra.mxu0 %v13718_v31  ;;  %6683 = vmatmul.mubr.msk.f32.vlgmr.msra.gmra.mrb[28].mxu1 %vm6194_vm10, %v13086_v24 }
 0x4a6   : > { %8463 = vmatprep.subr.bf16.mxu0 %v13719_v8  ;;  %6688 = vmatpush1.msk.msra.mxu1 %vm12334_vm9, %v13086_v24 }
 0x4a7   : > { %6475 = vmatprep.mubr.f32.mxu1 %v13652_v35 }
 0x4a9   : > { %8465 = vmatpush3.bf16.msra.mxu0 %v13720_v30  ;;  %6689 = vmatmul.mubr.msk.f32.vlgmr.msra.gmra.mrb[30].mxu1 %vm6194_vm10, %v13086_v24 }
 0x4aa   : > { %6678 = vmatprep.subr.msk.mxu0 %vm9915_vm2, %v13086_v24 }
 0x4ab   : > { %v7115_v7 = vpop.f32.mrb[14].mxu1 }
 0x4ac   : > { %6675 = vmatmul.mubr.msk.f32.vlgmr.msra.gmra.mrb[26].mxu0 %vm12334_vm9, %v13086_v24  ;;  %v7116_v26 = vpop.f32.mrb[15].mxu1 }
 0x4ad   : > { %6679 = vmatpush1.msk.msra.mxu0 %vm9921_vm3, %v13086_v24  ;;  %6262 = vmatprep.mubr.f32.mxu0 %v13652_v35  ;;  %v7117_v14 = vadd.f32 %v7116_v26, %v7115_v7 }
 0x4ae   : > { %6684 = vmatprep.subr.msk.mxu0 %vm10827_vm6, %v13086_v24 }
 0x4b0   : > { %6680 = vmatmul.mubr.msk.f32.vlgmr.msra.gmra.mrb[28].mxu0 %vm6194_vm10, %v13086_v24 }
 0x4b1   : > { %6685 = vmatpush1.msk.msra.mxu0 %vm11516_vm7, %v13086_v24  ;;  %6404 = vmatprep.mubr.f32.mxu0 %v13652_v35 }
 0x4b4   : > { %6686 = vmatmul.mubr.msk.f32.vlgmr.msra.gmra.mrb[30].mxu0 %vm6194_vm10, %v13086_v24  ;;  %v7080_v12 = vpop.f32.mrb[14].mxu0 }
 0x4b5   : > { %v7081_v57 = vpop.f32.mrb[15].mxu0 }
 0x4b6   : > { %v7082_v40 = vadd.f32 %v7081_v57, %v7080_v12 }
 0x4b8   : > { %v4348_v28 = vadd.f32 %v7082_v40, %v4180_v16 }
 0x4ba   : > { %v4452_v45 = vadd.f32 %v7117_v14, %v4348_v28 }
 0x4cb   : > { %v7185_v44 = vpop.f32.mrb[16].mxu1 }
 0x4cc   : > { %v7186_v38 = vpop.f32.mrb[17].mxu1 }
 0x4cd   : > { %v7187_v23 = vadd.f32 %v7186_v38, %v7185_v44 }
 0x4d7   : > { %v7150_v63 = vpop.f32.mrb[16].mxu0 }
 0x4d8   : > { %v7151_v13 = vpop.f32.mrb[17].mxu0 }
 0x4d9   : > { %v7152_v36 = vadd.f32 %v7151_v13, %v7150_v63 }
 0x4db   : > { %v4564_v2 = vadd.f32 %v7152_v36, %v4452_v45 }
 0x4dd   : > { %v4796_v53 = vadd.f32 %v7187_v23, %v4564_v2 }
 0x4ec   : > { %v7255_v35 = vpop.f32.mrb[18].mxu1 }
 0x4ed   : > { %v7256_v58 = vpop.f32.mrb[19].mxu1 }
 0x4ee   : > { %v7257_v42 = vadd.f32 %v7256_v58, %v7255_v35 }
 0x4f7   : > { %v7220_v24 = vpop.f32.mrb[18].mxu0 }
 0x4f8   : > { %v7221_v19 = vpop.f32.mrb[19].mxu0 }
 0x4f9   : > { %v7222_v43 = vadd.f32 %v7221_v19, %v7220_v24 }
 0x4fb   : > { %v4934_v6 = vadd.f32 %v7222_v43, %v4796_v53 }
 0x4fd   : > { %v5042_v49 = vadd.f32 %v7257_v42, %v4934_v6 }
 0x512   : > { %v7325_v34 = vpop.f32.mrb[20].mxu1 }
 0x513   : > { %v7326_v33 = vpop.f32.mrb[21].mxu1 }
 0x514   : > { %v7327_v41 = vadd.f32 %v7326_v33, %v7325_v34 }
 0x51b   : > { %v7290_v51 = vpop.f32.mrb[20].mxu0 }
 0x51c   : > { %v7291_v37 = vpop.f32.mrb[21].mxu0 }
 0x51d   : > { %v7292_v52 = vadd.f32 %v7291_v37, %v7290_v51 }
 0x51f   : > { %v5210_v18 = vadd.f32 %v7292_v52, %v5042_v49 }
 0x521   : > { %v5314_v3 = vadd.f32 %v7327_v41, %v5210_v18 }
 0x534   : > { %v7395_v4 = vpop.f32.mrb[22].mxu1 }
 0x535   : > { %v7396_v61 = vpop.f32.mrb[23].mxu1 }
 0x536   : > { %v7397_v47 = vadd.f32 %v7396_v61, %v7395_v4 }
 0x53f   : > { %v7360_v21 = vpop.f32.mrb[22].mxu0 }
 0x540   : > { %v7361_v9 = vpop.f32.mrb[23].mxu0 }
 0x541   : > { %v7362_v54 = vadd.f32 %v7361_v9, %v7360_v21 }
 0x543   : > { %v5426_v60 = vadd.f32 %v7362_v54, %v5314_v3 }
 0x545   : > { %v5658_v48 = vadd.f32 %v7397_v47, %v5426_v60 }
 0x554   : > { %v7465_v25 = vpop.f32.mrb[24].mxu1 }
 0x555   : > { %v7466_v27 = vpop.f32.mrb[25].mxu1 }
 0x556   : > { %v7467_v5 = vadd.f32 %v7466_v27, %v7465_v25 }
 0x55f   : > { %v7430_v20 = vpop.f32.mrb[24].mxu0 }
 0x560   : > { %v7431_v59 = vpop.f32.mrb[25].mxu0 }
 0x561   : > { %v7432_v0 = vadd.f32 %v7431_v59, %v7430_v20 }
 0x563   : > { %v5796_v62 = vadd.f32 %v7432_v0, %v5658_v48 }
 0x565   : > { %v5904_v46 = vadd.f32 %v7467_v5, %v5796_v62 }
 0x574   : > { %v7535_v22 = vpop.f32.mrb[26].mxu1 }
 0x575   : > { %v7536_v17 = vpop.f32.mrb[27].mxu1 }
 0x576   : > { %v7537_v39 = vadd.f32 %v7536_v17, %v7535_v22 }
 0x578   : > { %v6335_v1 = vpop.f32.mrb[28].mxu1 }
 0x579   : > { %6484 = vst [vmem:[%s12576_s29 + $0x10] sm:$0xff] %v6335_v1  ;;  %v6337_v10 = vpop.f32.mrb[29].mxu1 }
 0x57a   : > { %6485 = vst [vmem:[%s12576_s29 + $0x18] sm:$0xff] %v6337_v10 }
 0x57c   : > { %v6477_v50 = vpop.f32.mrb[30].mxu1 }
 0x57d   : > { %6488 = vst [vmem:[%s12576_s29 + $0x30] sm:$0xff] %v6477_v50  ;;  %v6479_v15 = vpop.f32.mrb[31].mxu1 }
 0x57e   : > { %6489 = vst [vmem:[%s12576_s29 + $0x38] sm:$0xff] %v6479_v15 }
 0x57f   : > { %v7500_v11 = vpop.f32.mrb[26].mxu0 }
 0x580   : > { %v7501_v55 = vpop.f32.mrb[27].mxu0 }
 0x581   : > { %v7502_v31 = vadd.f32 %v7501_v55, %v7500_v11 }
 0x583   : > { %v6072_v16 = vadd.f32 %v7502_v31, %v5904_v46  ;;  %v6264_v8 = vpop.f32.mrb[28].mxu0 }
 0x584   : > { %6482 = vst [vmem:[%s12576_s29] sm:$0xff] %v6264_v8  ;;  %v6266_v30 = vpop.f32.mrb[29].mxu0 }
 0x585   : > { %v6176_v32 = vadd.f32 %v7537_v39, %v6072_v16  ;;  %6483 = vst [vmem:[%s12576_s29 + $0x8] sm:$0xff] %v6266_v30 }
 0x587   : > { %v6180_v29 = vsub.f32 %v6176_v32, %v8592_v56  ;;  %v6406_v7 = vpop.f32.mrb[30].mxu0  ;;  %6179 = vst.msk [vmem:[%s246_s10] sm:$0xff] %vm341_vm0, %v6176_v32 }
 0x588   : > { %6486 = vst [vmem:[%s12576_s29 + $0x20] sm:$0xff] %v6406_v7  ;;  %v6408_v26 = vpop.f32.mrb[31].mxu0 }
 0x589   : > { %v6181_v14 = vmul.f32 %v6180_v29, %v6180_v29  ;;  %6487 = vst [vmem:[%s12576_s29 + $0x28] sm:$0xff] %v6408_v26 }
 0x58b   : > { %v6182_v12 = vsel %vm341_vm0, %v6181_v14, 0.0 }
 0x58c   : > { %v6183_v57 = vrot.slane %v6182_v12, 4 }
 0x58e   : > { %v6184_v40 = vadd.f32 %v6183_v57, %v6182_v12 }
 0x590   : > { %v6185_v28 = vrot.slane %v6184_v40, 2 }
 0x592   : > { %v6186_v45 = vadd.f32 %v6185_v28, %v6184_v40 }
 0x594   : > { %v6187_v44 = vrot.slane %v6186_v45, 1 }
 0x596   : > { %v6188_v38 = vadd.f32 %v6187_v44, %v6186_v45 }
 0x598   : > { %v6189_v23 = vsel %vm341_vm0, %v6188_v38, 0.0 }
 0x599   : > { %6190 = vadd.xlane.f32.xlu1 %v6189_v23 }
 0x59a   : > { %8606 = shalt.err (!%p8603_p3)
}
 0x59b   : > { %s8607_s10 = scalar_lea.hbm %s12595_s13, 128  ;;  %s8611_s12 = scalar_lea.hbm %s12673_s4, 256 }
 0x59c   : > { %p8608_p4 = scmp.ne.s32.totalorder %s12595_s13, %s8607_s10  ;;  %p8612_p9 = scmp.lt.u32.totalorder %s12595_s13, %s12673_s4 }
 0x59d   : > { %p8613_p10 = scmp.lt.u32.totalorder %s8611_s12, %s8607_s10  ;;  %p8615_p12 = scmp.lt.u32.totalorder %s8607_s10, %s12595_s13 }
 0x59e   : > { %p8609_p7 = pnand %p8608_p4, %p8766_p5 }
 0x59f   : > { %p8614_p11 = por %p8613_p10, %p8612_p9 }
 0x5a0   : > { %p8610_p8 = pneg %p8609_p7 }
 0x5a1   : > { %p8616_p13 = por %p8615_p12, %p8614_p11 }
 0x5a3   : > { %p8617_p0 = pnand %p8616_p13, %p8610_p8 }
 0x5a5   : > { %8620 = shalt.err (!%p8617_p0)
}
 0x5a6   : > { %8546 = dma.vmem_to_hbm [thread:$0]  (%p8766_p5), %s12597_s14, 128, %s12595_s13, %s6491_s17  }
 0x5a7   : > { %s12627_s15 = scalar_lea.hbm %s12675_s6, %s6697_s16  ;;  %s6529_s11 = sshll.u32 %s12576_s29, 4  ;;  %s6530_s11 = int_to_ptr.vmem [resolvable:$true] %s6529_s11 }
 0x5a8   : > { %s6499_s10 = scalar_lea.sflag [#allocation5], %s12573_s26  ;;  %s8621_s12 = scalar_lea.vmem %s6530_s11, 1024 }
 0x5a9   : > { %p8622_p1 = scmp.ne.s32.totalorder %s6530_s11, %s8621_s12  ;;  %s8692_s20 = smov [#allocation4]  }
 0x5aa   : > { %s8625_s28 = sshll.u32 %s8692_s20, 4  ;;  %s8626_s28 = int_to_ptr.vmem [resolvable:$false] %s8625_s28 }
 0x5ab   : > { %p8623_p2 = pnand %p8622_p1, %p8766_p5  ;;  %s8627_s0 = scalar_lea.vmem %s8626_s28, 2048 }
 0x5ac   : > { %p8628_p4 = scmp.lt.s32.totalorder %s6530_s11, %s8626_s28  ;;  %p8629_p7 = scmp.lt.s32.totalorder %s8627_s0, %s8621_s12 }
 0x5ad   : > { %p8624_p3 = pneg %p8623_p2 }
 0x5ae   : > { %p8630_p8 = por %p8629_p7, %p8628_p4 }
 0x5b0   : > { %p8631_p9 = pnand %p8630_p8, %p8624_p3 }
 0x5b2   : > { %8634 = shalt.err (!%p8631_p9)
}
 0x5b3   : > { %s8635_s25 = scalar_lea.hbm %s12627_s15, 1024  ;;  %s8639_s13 = scalar_lea.hbm %s12675_s6, 2048 }
 0x5b4   : > { %p8636_p10 = scmp.ne.s32.totalorder %s12627_s15, %s8635_s25  ;;  %p8640_p13 = scmp.lt.u32.totalorder %s12627_s15, %s12675_s6 }
 0x5b5   : > { %p8641_p0 = scmp.lt.u32.totalorder %s8639_s13, %s8635_s25  ;;  %p8643_p2 = scmp.lt.u32.totalorder %s8635_s25, %s12627_s15 }
 0x5b6   : > { %p8637_p11 = pnand %p8636_p10, %p8766_p5 }
 0x5b7   : > { %p8642_p1 = por %p8641_p0, %p8640_p13 }
 0x5b8   : > { %p8638_p12 = pneg %p8637_p11 }
 0x5b9   : > { %p8644_p3 = por %p8643_p2, %p8642_p1 }
 0x5bb   : > { %p8645_p4 = pnand %p8644_p3, %p8638_p12 }
 0x5bd   : > { %8648 = shalt.err (!%p8645_p4)
}
 0x5be   : > { %8547 = dma.vmem_to_hbm [thread:$0]  (%p8766_p5), %s6530_s11, 1024, %s12627_s15, %s6499_s10   ;;  %vm6192_vm0 = vcmask 0  }
 0x5bf   : > { %s265_s19 = scalar_lea.vmem %s12674_s5, %s8826_s18 }
 0x626   : > { %v6191_v63 = vpop.xlane.xlu1 %6190 }
 0x627   : > { %6193 = vst.msk [vmem:[%s265_s19] sm:$0x1] %vm6192_vm0, %v6191_v63 }
 0x628 PF: > { %p8557_p7 = scmp.ge.s32.totalorder %s8687_s24, 2  ;;  %s6541_s9 = sand.u32 1, %s8675_s21  }
 0x629   : > { %s6542_s12 = scalar_lea.sflag [#allocation3], %s6541_s9 }
 0x62a   : > { %p8551_p8 = pnand %p8557_p7, %p8770_p6 }
 0x62c   : > { %8666 = dma.done.wait (!%p8551_p8), %s6542_s12, 128  }
 0x62d   : > { %8668 = vsyncadd (!%p8551_p8), %s6542_s12, 4294967168  ;;  %s6557_s7 = scalar_lea.sflag [#allocation5], %s6541_s9 }
 0x62e   : > { %8670 = dma.done.wait (!%p8551_p8), %s6557_s7, 1024  }
 0x62f   : > { %8672 = vsyncadd (!%p8551_p8), %s6557_s7, 4294966272  ;;  %p20_p5 = scmp.ge.s32.totalorder %s8753_s27, 4   ;;  %s13724_s21 = smov %s8679_s22 }
 0x630   : > { %s13725_s22 = smov %s8683_s23  ;;  %s13726_s23 = smov %s8764_s30 }
 0x631   : > { %s13727_s24 = smov %s8753_s27  ;;  %22 = sbr.rel (!%p20_p5) target bundleno = 7 (0x7), region = 100 }
 0x638   :  { %6562 = vsyncpa [#allocation3], 1 }
 0x639   :  { %6564 = vsyncpa [#allocation3 + $0x1], 1 }
 0x63a   :  { %6565 = vsyncpa [#allocation5], 1 }
 0x63b   :  { %6567 = vsyncpa [#allocation5 + $0x1], 1 }

</bundles_post_ra>
